<compile_context>
chip_gen: v7x
topology: tpu7x:2x2x1
jax: 0.10.0
libtpu: 0.0.40
codegen_flags: <defaults>
</compile_context>

<pallas_src>
import jax
import jax.numpy as jnp
from jax import lax
from jax.experimental import pallas as pl
from jax.experimental.pallas import tpu as pltpu

# ----------------------------- configuration -------------------------------
VOCAB = 16
SEQ = 8
BATCH = 2
EMB = 32          # embedding_size == hidden_size (small stand-in for 512)
HID = EMB
PAD_IDX = 0
START_IDX = 1


def _vmem():
    return pl.BlockSpec(memory_space=pltpu.MemorySpace.VMEM)


# ----------------------------- fused kernel --------------------------------
def nfo_fused_kernel(tok_ref,
                     enc_emb_ref, dec_emb_ref,
                     wih_e_ref, whh_e_ref, b_e_ref,
                     wfe_ref, bfe_ref, w1_ref, b1_ref, w2_ref, b2_ref,
                     wih_d_ref, whh_d_ref, b_d_ref,
                     wc_ref, bc_ref, wo_ref, bo_ref,
                     score_ref, logp_ref):
    B, S = tok_ref.shape
    H = whh_e_ref.shape[0]
    V = enc_emb_ref.shape[0]
    f32 = jnp.float32

    # ---- hoisted weight/bias reads (one vld each, kept resident) ----
    whh_e = whh_e_ref[...]
    whh_d = whh_d_ref[...]
    wc = wc_ref[...]
    bc = bc_ref[...]
    wo = wo_ref[...]
    bo = bo_ref[...]

    tok = tok_ref[...]                                        # [B,S] int32
    mask_bs = (tok != PAD_IDX).astype(f32)                    # [B,S]

    # ---- in-kernel embedding lookup via one-hot matmul (MXU) ----
    iota_v = lax.broadcasted_iota(jnp.int32, (B, S, V), 2)
    oh_enc = (tok[:, :, None] == iota_v).astype(f32)          # [B,S,V]
    start_oh = (lax.broadcasted_iota(jnp.int32, (B, 1, V), 2)
                == START_IDX).astype(f32)                     # [B,1,V]
    # teacher forcing: decoder input t is target token t-1, step 0 = START
    oh_dec = jnp.concatenate([start_oh, oh_enc[:, :-1, :]], axis=1)

    x_enc = jnp.dot(oh_enc.reshape(B * S, V), enc_emb_ref[...],
                    preferred_element_type=f32)               # [B*S,E]
    x_dec = jnp.dot(oh_dec.reshape(B * S, V), dec_emb_ref[...],
                    preferred_element_type=f32)               # [B*S,E]

    # ---- bulk input-to-hidden projections (hoisted out of the recurrences) ----
    gxe = (jnp.dot(x_enc, wih_e_ref[...], preferred_element_type=f32)
           + b_e_ref[...]).reshape(B, S, 4 * H)
    gxd = (jnp.dot(x_dec, wih_d_ref[...], preferred_element_type=f32)
           + b_d_ref[...]).reshape(B, S, 4 * H)

    def lstm_cell(gx_t, h_prev, c_prev, whh):
        gates = gx_t + jnp.dot(h_prev, whh, preferred_element_type=f32)
        i_g = jax.nn.sigmoid(gates[:, 0 * H:1 * H])
        f_g = jax.nn.sigmoid(gates[:, 1 * H:2 * H])
        g_g = jnp.tanh(gates[:, 2 * H:3 * H])
        o_g = jax.nn.sigmoid(gates[:, 3 * H:4 * H])
        c_new = f_g * c_prev + i_g * g_g
        h_new = o_g * jnp.tanh(c_new)
        return h_new, c_new

    # ---------------- encoder: mask-gated LSTM (pack_padded stand-in) ----------
    h = jnp.zeros((B, H), f32)
    c = jnp.zeros((B, H), f32)
    enc_outs = []
    for t in range(S):                          # fully unrolled, S static
        h_new, c_new = lstm_cell(gxe[:, t, :], h, c, whh_e)
        m_t = mask_bs[:, t:t + 1]               # [B,1]
        h = jnp.where(m_t > 0.5, h_new, h)
        c = jnp.where(m_t > 0.5, c_new, c)
        enc_outs.append(h_new * m_t)            # zero padded positions
    eo = jnp.stack(enc_outs, axis=1)            # [B,S,H] encoder outputs

    # ---------------- extract_feature + predictor ----------------
    # TODO(synk): reference uses valid_length = mask.sum(-1)+1; the exact
    # normalizer of extract_feature is not shipped, masked mean is used here.
    count = jnp.maximum(jnp.sum(mask_bs, axis=1, keepdims=True), 1.0)   # [B,1]
    pooled = jnp.sum(eo, axis=1) / count                                # [B,H]
    emb = jnp.tanh(jnp.dot(pooled, wfe_ref[...], preferred_element_type=f32)
                   + bfe_ref[...])
    h1 = jax.nn.relu(jnp.dot(emb, w1_ref[...], preferred_element_type=f32)
                     + b1_ref[...])
    score_ref[...] = jax.nn.sigmoid(
        jnp.dot(h1, w2_ref[...], preferred_element_type=f32) + b2_ref[...])

    # ---------------- decoder: teacher-forced attention LSTM ----------------
    mask3 = mask_bs[:, None, :]                 # [B,1,S]
    h_d, c_d = h, c                             # init from encoder last hidden
    combs = []
    for t in range(S):                          # fully unrolled
        h_d, c_d = lstm_cell(gxd[:, t, :], h_d, c_d, whh_d)
        # masked dot attention over encoder outputs (MXU contractions)
        e = jnp.einsum('bqh,bsh->bqs', h_d[:, None, :], eo,
                       preferred_element_type=f32)            # [B,1,S]
        e = jnp.where(mask3 > 0.5, e, -1e9)
        e = e - jnp.max(e, axis=-1, keepdims=True)
        p = jnp.exp(e)
        a = p * pl.reciprocal(jnp.sum(p, axis=-1, keepdims=True), approx=True)
        ctx = jnp.einsum('bqs,bsh->bqh', a, eo,
                         preferred_element_type=f32)[:, 0, :]  # [B,H]
        comb = jnp.tanh(jnp.dot(jnp.concatenate([h_d, ctx], axis=-1), wc,
                                preferred_element_type=f32) + bc)
        combs.append(comb)

    # bulk output projection + log-softmax (hoisted out of the loop),
    # single store of the whole [B,S,V] slab.
    comb_all = jnp.stack(combs, axis=1).reshape(B * S, H)      # [B*S,H]
    logits = jnp.dot(comb_all, wo, preferred_element_type=f32) + bo
    lmax = jnp.max(logits, axis=-1, keepdims=True)
    lse = jnp.log(jnp.sum(jnp.exp(logits - lmax), axis=-1, keepdims=True)) + lmax
    logp_ref[...] = (logits - lse).reshape(B, S, V)


# ---------------------------- full forward (EPD) -----------------------------
def nfo_controller_forward(tokens, params):
    """tokens: int32 [B,S].  Returns (scores [B,1], log_probs [B,S,V], symbols [B,S])."""
    B, S = tokens.shape
    scores, logp = pl.pallas_call(
        nfo_fused_kernel,
        out_shape=(jax.ShapeDtypeStruct((B, 1), jnp.float32),
                   jax.ShapeDtypeStruct((B, S, VOCAB), jnp.float32)),
        in_specs=[_vmem()] * 19,
        out_specs=(_vmem(), _vmem()),
    )(tokens,
      params["enc_embed"], params["dec_embed"],
      params["wih_e"], params["whh_e"], params["b_e"],
      params["wfe"], params["bfe"], params["w1"], params["b1"],
      params["w2"], params["b2"],
      params["wih_d"], params["whh_d"], params["b_d"],
      params["wc"], params["bc"], params["wo"], params["bo"])
    symbols = jnp.argmax(logp, axis=-1).astype(jnp.int32)      # [B,S]
    return scores, logp, symbols


# ------------------------------- param setup ---------------------------------
def make_params(key):
    ks = jax.random.split(key, 20)
    n = iter(range(20))

    def init(shape, scale=0.1):
        return scale * jax.random.normal(ks[next(n)], shape, dtype=jnp.float32)

    return {
        # encoder
        "enc_embed": init((VOCAB, EMB)),
        "wih_e": init((EMB, 4 * HID)),
        "whh_e": init((HID, 4 * HID)),
        "b_e": init((1, 4 * HID)),
        # extract_feature
        "wfe": init((HID, EMB)),
        "bfe": init((1, EMB)),
        # predictor
        "w1": init((EMB, EMB)),
        "b1": init((1, EMB)),
        "w2": init((EMB, 1)),
        "b2": init((1, 1)),
        # decoder
        "dec_embed": init((VOCAB, EMB)),
        "wih_d": init((EMB, 4 * HID)),
        "whh_d": init((HID, 4 * HID)),
        "b_d": init((1, 4 * HID)),
        "wc": init((2 * HID, HID)),
        "bc": init((1, HID)),
        "wo": init((HID, VOCAB)),
        "bo": init((1, VOCAB)),
    }


if __name__ == "__main__":
    key = jax.random.PRNGKey(0)
    pkey, tkey = jax.random.split(key)
    params = make_params(pkey)

    tokens = jax.random.randint(tkey, (BATCH, SEQ), 2, VOCAB, dtype=jnp.int32)
    # introduce some padding (padding_idx = 0) at the tail of example 0
    tokens = tokens.at[0, SEQ - 2:].set(PAD_IDX)

    scores, logp, symbols = nfo_controller_forward(tokens, params)
    jax.block_until_ready((scores, logp, symbols))

    assert scores.shape == (BATCH, 1)
    assert logp.shape == (BATCH, SEQ, VOCAB)
    assert symbols.shape == (BATCH, SEQ)
    assert bool(jnp.all(jnp.isfinite(scores))) and bool(jnp.all(jnp.isfinite(logp)))
    print("KERNEL_OK")
</pallas_src>

<mosaic_0001>
module attributes {stable_mosaic.version = 11 : i64} {
  func.func @nfo_fused_kernel(%arg0: memref<2x8xi32, #tpu.memory_space<vmem>>, %arg1: memref<16x32xf32, #tpu.memory_space<vmem>>, %arg2: memref<16x32xf32, #tpu.memory_space<vmem>>, %arg3: memref<32x128xf32, #tpu.memory_space<vmem>>, %arg4: memref<32x128xf32, #tpu.memory_space<vmem>>, %arg5: memref<1x128xf32, #tpu.memory_space<vmem>>, %arg6: memref<32x32xf32, #tpu.memory_space<vmem>>, %arg7: memref<1x32xf32, #tpu.memory_space<vmem>>, %arg8: memref<32x32xf32, #tpu.memory_space<vmem>>, %arg9: memref<1x32xf32, #tpu.memory_space<vmem>>, %arg10: memref<32x1xf32, #tpu.memory_space<vmem>>, %arg11: memref<1x1xf32, #tpu.memory_space<vmem>>, %arg12: memref<32x128xf32, #tpu.memory_space<vmem>>, %arg13: memref<32x128xf32, #tpu.memory_space<vmem>>, %arg14: memref<1x128xf32, #tpu.memory_space<vmem>>, %arg15: memref<64x32xf32, #tpu.memory_space<vmem>>, %arg16: memref<1x32xf32, #tpu.memory_space<vmem>>, %arg17: memref<32x16xf32, #tpu.memory_space<vmem>>, %arg18: memref<1x16xf32, #tpu.memory_space<vmem>>, %arg19: memref<2x1xf32, #tpu.memory_space<vmem>>, %arg20: memref<2x8x16xf32, #tpu.memory_space<vmem>>) attributes {dimension_semantics = [], scalar_prefetch = 0 : i64, scratch_operands = 0 : i64, tpu.core_type = #tpu.core_type<tc>} {
    %c0 = arith.constant 0 : index
    %c0_0 = arith.constant 0 : index
    %0 = vector.load %arg4[%c0, %c0_0] : memref<32x128xf32, #tpu.memory_space<vmem>>, vector<32x128xf32>
    %c0_1 = arith.constant 0 : index
    %c0_2 = arith.constant 0 : index
    %1 = vector.load %arg13[%c0_1, %c0_2] : memref<32x128xf32, #tpu.memory_space<vmem>>, vector<32x128xf32>
    %c0_3 = arith.constant 0 : index
    %c0_4 = arith.constant 0 : index
    %2 = vector.load %arg15[%c0_3, %c0_4] : memref<64x32xf32, #tpu.memory_space<vmem>>, vector<64x32xf32>
    %c0_5 = arith.constant 0 : index
    %c0_6 = arith.constant 0 : index
    %3 = vector.load %arg16[%c0_5, %c0_6] : memref<1x32xf32, #tpu.memory_space<vmem>>, vector<1x32xf32>
    %c0_7 = arith.constant 0 : index
    %c0_8 = arith.constant 0 : index
    %4 = vector.load %arg17[%c0_7, %c0_8] : memref<32x16xf32, #tpu.memory_space<vmem>>, vector<32x16xf32>
    %c0_9 = arith.constant 0 : index
    %c0_10 = arith.constant 0 : index
    %5 = vector.load %arg18[%c0_9, %c0_10] : memref<1x16xf32, #tpu.memory_space<vmem>>, vector<1x16xf32>
    %c0_11 = arith.constant 0 : index
    %c0_12 = arith.constant 0 : index
    %6 = vector.load %arg0[%c0_11, %c0_12] : memref<2x8xi32, #tpu.memory_space<vmem>>, vector<2x8xi32>
    %c0_i32 = arith.constant 0 : i32
    %7 = vector.broadcast %c0_i32 : i32 to vector<2x8xi32>
    %8 = arith.cmpi ne, %6, %7 : vector<2x8xi32>
    %9 = arith.extui %8 : vector<2x8xi1> to vector<2x8xi32>
    %10 = arith.sitofp %9 : vector<2x8xi32> to vector<2x8xf32>
    %11 = tpu.iota {dimensions = array<i32: 2>} : vector<2x8x16xi32>
    %12 = vector.shape_cast %6 : vector<2x8xi32> to vector<2x8x1xi32>
    %13 = vector.broadcast %12 : vector<2x8x1xi32> to vector<2x8x16xi32>
    %14 = arith.cmpi eq, %13, %11 : vector<2x8x16xi32>
    %15 = arith.extui %14 : vector<2x8x16xi1> to vector<2x8x16xi32>
    %16 = arith.sitofp %15 : vector<2x8x16xi32> to vector<2x8x16xf32>
    %17 = tpu.iota {dimensions = array<i32: 2>} : vector<2x1x16xi32>
    %c1_i32 = arith.constant 1 : i32
    %18 = vector.broadcast %c1_i32 : i32 to vector<2x1x16xi32>
    %19 = arith.cmpi eq, %17, %18 : vector<2x1x16xi32>
    %20 = arith.extui %19 : vector<2x1x16xi1> to vector<2x1x16xi32>
    %21 = arith.sitofp %20 : vector<2x1x16xi32> to vector<2x1x16xf32>
    %22 = vector.extract_strided_slice %16 {offsets = [0, 0, 0], sizes = [2, 7, 16], strides = [1, 1, 1]} : vector<2x8x16xf32> to vector<2x7x16xf32>
    %23 = tpu.concatenate %21, %22 in 1 : vector<2x1x16xf32>, vector<2x7x16xf32> -> vector<2x8x16xf32>
    %24 = vector.shape_cast %16 : vector<2x8x16xf32> to vector<16x16xf32>
    %c0_13 = arith.constant 0 : index
    %c0_14 = arith.constant 0 : index
    %25 = vector.load %arg1[%c0_13, %c0_14] : memref<16x32xf32, #tpu.memory_space<vmem>>, vector<16x32xf32>
    %cst = arith.constant dense<0.000000e+00> : vector<16x32xf32>
    %26 = tpu.matmul %24, %25, %cst {dimension_numbers = #tpu.dot_dimension_numbers<[1], [0], [0], [1], [0, 0, 1, 1], [], []>} : vector<16x16xf32>, vector<16x32xf32>, vector<16x32xf32> -> vector<16x32xf32>
    %27 = vector.shape_cast %23 : vector<2x8x16xf32> to vector<16x16xf32>
    %c0_15 = arith.constant 0 : index
    %c0_16 = arith.constant 0 : index
    %28 = vector.load %arg2[%c0_15, %c0_16] : memref<16x32xf32, #tpu.memory_space<vmem>>, vector<16x32xf32>
    %cst_17 = arith.constant dense<0.000000e+00> : vector<16x32xf32>
    %29 = tpu.matmul %27, %28, %cst_17 {dimension_numbers = #tpu.dot_dimension_numbers<[1], [0], [0], [1], [0, 0, 1, 1], [], []>} : vector<16x16xf32>, vector<16x32xf32>, vector<16x32xf32> -> vector<16x32xf32>
    %c0_18 = arith.constant 0 : index
    %c0_19 = arith.constant 0 : index
    %30 = vector.load %arg3[%c0_18, %c0_19] : memref<32x128xf32, #tpu.memory_space<vmem>>, vector<32x128xf32>
    %cst_20 = arith.constant dense<0.000000e+00> : vector<16x128xf32>
    %31 = tpu.matmul %26, %30, %cst_20 {dimension_numbers = #tpu.dot_dimension_numbers<[1], [0], [0], [1], [0, 0, 1, 1], [], []>} : vector<16x32xf32>, vector<32x128xf32>, vector<16x128xf32> -> vector<16x128xf32>
    %c0_21 = arith.constant 0 : index
    %c0_22 = arith.constant 0 : index
    %32 = vector.load %arg5[%c0_21, %c0_22] : memref<1x128xf32, #tpu.memory_space<vmem>>, vector<1x128xf32>
    %33 = vector.broadcast %32 : vector<1x128xf32> to vector<16x128xf32>
    %34 = arith.addf %31, %33 : vector<16x128xf32>
    %35 = vector.shape_cast %34 : vector<16x128xf32> to vector<2x8x128xf32>
    %c0_23 = arith.constant 0 : index
    %c0_24 = arith.constant 0 : index
    %36 = vector.load %arg12[%c0_23, %c0_24] : memref<32x128xf32, #tpu.memory_space<vmem>>, vector<32x128xf32>
    %cst_25 = arith.constant dense<0.000000e+00> : vector<16x128xf32>
    %37 = tpu.matmul %29, %36, %cst_25 {dimension_numbers = #tpu.dot_dimension_numbers<[1], [0], [0], [1], [0, 0, 1, 1], [], []>} : vector<16x32xf32>, vector<32x128xf32>, vector<16x128xf32> -> vector<16x128xf32>
    %c0_26 = arith.constant 0 : index
    %c0_27 = arith.constant 0 : index
    %38 = vector.load %arg14[%c0_26, %c0_27] : memref<1x128xf32, #tpu.memory_space<vmem>>, vector<1x128xf32>
    %39 = vector.broadcast %38 : vector<1x128xf32> to vector<16x128xf32>
    %40 = arith.addf %37, %39 : vector<16x128xf32>
    %41 = vector.shape_cast %40 : vector<16x128xf32> to vector<2x8x128xf32>
    %cst_28 = arith.constant 0.000000e+00 : f32
    %42 = vector.broadcast %cst_28 : f32 to vector<2x32xf32>
    %cst_29 = arith.constant 0.000000e+00 : f32
    %43 = vector.broadcast %cst_29 : f32 to vector<2x32xf32>
    %44 = vector.extract_strided_slice %35 {offsets = [0, 0, 0], sizes = [2, 1, 128], strides = [1, 1, 1]} : vector<2x8x128xf32> to vector<2x1x128xf32>
    %45 = vector.shape_cast %44 : vector<2x1x128xf32> to vector<2x128xf32>
    %cst_30 = arith.constant dense<0.000000e+00> : vector<2x128xf32>
    %46 = tpu.matmul %42, %0, %cst_30 {dimension_numbers = #tpu.dot_dimension_numbers<[1], [0], [0], [1], [0, 0, 1, 1], [], []>} : vector<2x32xf32>, vector<32x128xf32>, vector<2x128xf32> -> vector<2x128xf32>
    %47 = arith.addf %45, %46 : vector<2x128xf32>
    %48 = vector.extract_strided_slice %47 {offsets = [0, 0], sizes = [2, 32], strides = [1, 1]} : vector<2x128xf32> to vector<2x32xf32>
    %49 = arith.negf %48 : vector<2x32xf32>
    %50 = math.exp %49 : vector<2x32xf32>
    %cst_31 = arith.constant 1.000000e+00 : f32
    %51 = vector.broadcast %cst_31 : f32 to vector<2x32xf32>
    %52 = arith.addf %51, %50 : vector<2x32xf32>
    %53 = arith.divf %51, %52 : vector<2x32xf32>
    %54 = vector.extract_strided_slice %47 {offsets = [0, 32], sizes = [2, 32], strides = [1, 1]} : vector<2x128xf32> to vector<2x32xf32>
    %55 = arith.negf %54 : vector<2x32xf32>
    %56 = math.exp %55 : vector<2x32xf32>
    %cst_32 = arith.constant 1.000000e+00 : f32
    %57 = vector.broadcast %cst_32 : f32 to vector<2x32xf32>
    %58 = arith.addf %57, %56 : vector<2x32xf32>
    %59 = arith.divf %57, %58 : vector<2x32xf32>
    %60 = vector.extract_strided_slice %47 {offsets = [0, 64], sizes = [2, 32], strides = [1, 1]} : vector<2x128xf32> to vector<2x32xf32>
    %61 = math.tanh %60 : vector<2x32xf32>
    %62 = vector.extract_strided_slice %47 {offsets = [0, 96], sizes = [2, 32], strides = [1, 1]} : vector<2x128xf32> to vector<2x32xf32>
    %63 = arith.negf %62 : vector<2x32xf32>
    %64 = math.exp %63 : vector<2x32xf32>
    %cst_33 = arith.constant 1.000000e+00 : f32
    %65 = vector.broadcast %cst_33 : f32 to vector<2x32xf32>
    %66 = arith.addf %65, %64 : vector<2x32xf32>
    %67 = arith.divf %65, %66 : vector<2x32xf32>
    %68 = arith.mulf %59, %43 : vector<2x32xf32>
    %69 = arith.mulf %53, %61 : vector<2x32xf32>
    %70 = arith.addf %68, %69 : vector<2x32xf32>
    %71 = math.tanh %70 : vector<2x32xf32>
    %72 = arith.mulf %67, %71 : vector<2x32xf32>
    %73 = vector.extract_strided_slice %10 {offsets = [0, 0], sizes = [2, 1], strides = [1, 1]} : vector<2x8xf32> to vector<2x1xf32>
    %cst_34 = arith.constant 5.000000e-01 : f32
    %74 = vector.broadcast %cst_34 : f32 to vector<2x1xf32>
    %75 = arith.cmpf ogt, %73, %74 : vector<2x1xf32>
    %76 = vector.shape_cast %75 : vector<2x1xi1> to vector<2x1xi1>
    %77 = vector.broadcast %76 : vector<2x1xi1> to vector<2x32xi1>
    %78 = arith.select %77, %72, %42 : vector<2x32xi1>, vector<2x32xf32>
    %cst_35 = arith.constant 5.000000e-01 : f32
    %79 = vector.broadcast %cst_35 : f32 to vector<2x1xf32>
    %80 = arith.cmpf ogt, %73, %79 : vector<2x1xf32>
    %81 = vector.shape_cast %80 : vector<2x1xi1> to vector<2x1xi1>
    %82 = vector.broadcast %81 : vector<2x1xi1> to vector<2x32xi1>
    %83 = arith.select %82, %70, %43 : vector<2x32xi1>, vector<2x32xf32>
    %84 = vector.broadcast %73 : vector<2x1xf32> to vector<2x32xf32>
    %85 = arith.mulf %72, %84 : vector<2x32xf32>
    %86 = vector.extract_strided_slice %35 {offsets = [0, 1, 0], sizes = [2, 1, 128], strides = [1, 1, 1]} : vector<2x8x128xf32> to vector<2x1x128xf32>
    %87 = vector.shape_cast %86 : vector<2x1x128xf32> to vector<2x128xf32>
    %cst_36 = arith.constant dense<0.000000e+00> : vector<2x128xf32>
    %88 = tpu.matmul %78, %0, %cst_36 {dimension_numbers = #tpu.dot_dimension_numbers<[1], [0], [0], [1], [0, 0, 1, 1], [], []>} : vector<2x32xf32>, vector<32x128xf32>, vector<2x128xf32> -> vector<2x128xf32>
    %89 = arith.addf %87, %88 : vector<2x128xf32>
    %90 = vector.extract_strided_slice %89 {offsets = [0, 0], sizes = [2, 32], strides = [1, 1]} : vector<2x128xf32> to vector<2x32xf32>
    %91 = arith.negf %90 : vector<2x32xf32>
    %92 = math.exp %91 : vector<2x32xf32>
    %cst_37 = arith.constant 1.000000e+00 : f32
    %93 = vector.broadcast %cst_37 : f32 to vector<2x32xf32>
    %94 = arith.addf %93, %92 : vector<2x32xf32>
    %95 = arith.divf %93, %94 : vector<2x32xf32>
    %96 = vector.extract_strided_slice %89 {offsets = [0, 32], sizes = [2, 32], strides = [1, 1]} : vector<2x128xf32> to vector<2x32xf32>
    %97 = arith.negf %96 : vector<2x32xf32>
    %98 = math.exp %97 : vector<2x32xf32>
    %cst_38 = arith.constant 1.000000e+00 : f32
    %99 = vector.broadcast %cst_38 : f32 to vector<2x32xf32>
    %100 = arith.addf %99, %98 : vector<2x32xf32>
    %101 = arith.divf %99, %100 : vector<2x32xf32>
    %102 = vector.extract_strided_slice %89 {offsets = [0, 64], sizes = [2, 32], strides = [1, 1]} : vector<2x128xf32> to vector<2x32xf32>
    %103 = math.tanh %102 : vector<2x32xf32>
    %104 = vector.extract_strided_slice %89 {offsets = [0, 96], sizes = [2, 32], strides = [1, 1]} : vector<2x128xf32> to vector<2x32xf32>
    %105 = arith.negf %104 : vector<2x32xf32>
    %106 = math.exp %105 : vector<2x32xf32>
    %cst_39 = arith.constant 1.000000e+00 : f32
    %107 = vector.broadcast %cst_39 : f32 to vector<2x32xf32>
    %108 = arith.addf %107, %106 : vector<2x32xf32>
    %109 = arith.divf %107, %108 : vector<2x32xf32>
    %110 = arith.mulf %101, %83 : vector<2x32xf32>
    %111 = arith.mulf %95, %103 : vector<2x32xf32>
    %112 = arith.addf %110, %111 : vector<2x32xf32>
    %113 = math.tanh %112 : vector<2x32xf32>
    %114 = arith.mulf %109, %113 : vector<2x32xf32>
    %115 = vector.extract_strided_slice %10 {offsets = [0, 1], sizes = [2, 1], strides = [1, 1]} : vector<2x8xf32> to vector<2x1xf32>
    %cst_40 = arith.constant 5.000000e-01 : f32
    %116 = vector.broadcast %cst_40 : f32 to vector<2x1xf32>
    %117 = arith.cmpf ogt, %115, %116 : vector<2x1xf32>
    %118 = vector.shape_cast %117 : vector<2x1xi1> to vector<2x1xi1>
    %119 = vector.broadcast %118 : vector<2x1xi1> to vector<2x32xi1>
    %120 = arith.select %119, %114, %78 : vector<2x32xi1>, vector<2x32xf32>
    %cst_41 = arith.constant 5.000000e-01 : f32
    %121 = vector.broadcast %cst_41 : f32 to vector<2x1xf32>
    %122 = arith.cmpf ogt, %115, %121 : vector<2x1xf32>
    %123 = vector.shape_cast %122 : vector<2x1xi1> to vector<2x1xi1>
    %124 = vector.broadcast %123 : vector<2x1xi1> to vector<2x32xi1>
    %125 = arith.select %124, %112, %83 : vector<2x32xi1>, vector<2x32xf32>
    %126 = vector.broadcast %115 : vector<2x1xf32> to vector<2x32xf32>
    %127 = arith.mulf %114, %126 : vector<2x32xf32>
    %128 = vector.extract_strided_slice %35 {offsets = [0, 2, 0], sizes = [2, 1, 128], strides = [1, 1, 1]} : vector<2x8x128xf32> to vector<2x1x128xf32>
    %129 = vector.shape_cast %128 : vector<2x1x128xf32> to vector<2x128xf32>
    %cst_42 = arith.constant dense<0.000000e+00> : vector<2x128xf32>
    %130 = tpu.matmul %120, %0, %cst_42 {dimension_numbers = #tpu.dot_dimension_numbers<[1], [0], [0], [1], [0, 0, 1, 1], [], []>} : vector<2x32xf32>, vector<32x128xf32>, vector<2x128xf32> -> vector<2x128xf32>
    %131 = arith.addf %129, %130 : vector<2x128xf32>
    %132 = vector.extract_strided_slice %131 {offsets = [0, 0], sizes = [2, 32], strides = [1, 1]} : vector<2x128xf32> to vector<2x32xf32>
    %133 = arith.negf %132 : vector<2x32xf32>
    %134 = math.exp %133 : vector<2x32xf32>
    %cst_43 = arith.constant 1.000000e+00 : f32
    %135 = vector.broadcast %cst_43 : f32 to vector<2x32xf32>
    %136 = arith.addf %135, %134 : vector<2x32xf32>
    %137 = arith.divf %135, %136 : vector<2x32xf32>
    %138 = vector.extract_strided_slice %131 {offsets = [0, 32], sizes = [2, 32], strides = [1, 1]} : vector<2x128xf32> to vector<2x32xf32>
    %139 = arith.negf %138 : vector<2x32xf32>
    %140 = math.exp %139 : vector<2x32xf32>
    %cst_44 = arith.constant 1.000000e+00 : f32
    %141 = vector.broadcast %cst_44 : f32 to vector<2x32xf32>
    %142 = arith.addf %141, %140 : vector<2x32xf32>
    %143 = arith.divf %141, %142 : vector<2x32xf32>
    %144 = vector.extract_strided_slice %131 {offsets = [0, 64], sizes = [2, 32], strides = [1, 1]} : vector<2x128xf32> to vector<2x32xf32>
    %145 = math.tanh %144 : vector<2x32xf32>
    %146 = vector.extract_strided_slice %131 {offsets = [0, 96], sizes = [2, 32], strides = [1, 1]} : vector<2x128xf32> to vector<2x32xf32>
    %147 = arith.negf %146 : vector<2x32xf32>
    %148 = math.exp %147 : vector<2x32xf32>
    %cst_45 = arith.constant 1.000000e+00 : f32
    %149 = vector.broadcast %cst_45 : f32 to vector<2x32xf32>
    %150 = arith.addf %149, %148 : vector<2x32xf32>
    %151 = arith.divf %149, %150 : vector<2x32xf32>
    %152 = arith.mulf %143, %125 : vector<2x32xf32>
    %153 = arith.mulf %137, %145 : vector<2x32xf32>
    %154 = arith.addf %152, %153 : vector<2x32xf32>
    %155 = math.tanh %154 : vector<2x32xf32>
    %156 = arith.mulf %151, %155 : vector<2x32xf32>
    %157 = vector.extract_strided_slice %10 {offsets = [0, 2], sizes = [2, 1], strides = [1, 1]} : vector<2x8xf32> to vector<2x1xf32>
    %cst_46 = arith.constant 5.000000e-01 : f32
    %158 = vector.broadcast %cst_46 : f32 to vector<2x1xf32>
    %159 = arith.cmpf ogt, %157, %158 : vector<2x1xf32>
    %160 = vector.shape_cast %159 : vector<2x1xi1> to vector<2x1xi1>
    %161 = vector.broadcast %160 : vector<2x1xi1> to vector<2x32xi1>
    %162 = arith.select %161, %156, %120 : vector<2x32xi1>, vector<2x32xf32>
    %cst_47 = arith.constant 5.000000e-01 : f32
    %163 = vector.broadcast %cst_47 : f32 to vector<2x1xf32>
    %164 = arith.cmpf ogt, %157, %163 : vector<2x1xf32>
    %165 = vector.shape_cast %164 : vector<2x1xi1> to vector<2x1xi1>
    %166 = vector.broadcast %165 : vector<2x1xi1> to vector<2x32xi1>
    %167 = arith.select %166, %154, %125 : vector<2x32xi1>, vector<2x32xf32>
    %168 = vector.broadcast %157 : vector<2x1xf32> to vector<2x32xf32>
    %169 = arith.mulf %156, %168 : vector<2x32xf32>
    %170 = vector.extract_strided_slice %35 {offsets = [0, 3, 0], sizes = [2, 1, 128], strides = [1, 1, 1]} : vector<2x8x128xf32> to vector<2x1x128xf32>
    %171 = vector.shape_cast %170 : vector<2x1x128xf32> to vector<2x128xf32>
    %cst_48 = arith.constant dense<0.000000e+00> : vector<2x128xf32>
    %172 = tpu.matmul %162, %0, %cst_48 {dimension_numbers = #tpu.dot_dimension_numbers<[1], [0], [0], [1], [0, 0, 1, 1], [], []>} : vector<2x32xf32>, vector<32x128xf32>, vector<2x128xf32> -> vector<2x128xf32>
    %173 = arith.addf %171, %172 : vector<2x128xf32>
    %174 = vector.extract_strided_slice %173 {offsets = [0, 0], sizes = [2, 32], strides = [1, 1]} : vector<2x128xf32> to vector<2x32xf32>
    %175 = arith.negf %174 : vector<2x32xf32>
    %176 = math.exp %175 : vector<2x32xf32>
    %cst_49 = arith.constant 1.000000e+00 : f32
    %177 = vector.broadcast %cst_49 : f32 to vector<2x32xf32>
    %178 = arith.addf %177, %176 : vector<2x32xf32>
    %179 = arith.divf %177, %178 : vector<2x32xf32>
    %180 = vector.extract_strided_slice %173 {offsets = [0, 32], sizes = [2, 32], strides = [1, 1]} : vector<2x128xf32> to vector<2x32xf32>
    %181 = arith.negf %180 : vector<2x32xf32>
    %182 = math.exp %181 : vector<2x32xf32>
    %cst_50 = arith.constant 1.000000e+00 : f32
    %183 = vector.broadcast %cst_50 : f32 to vector<2x32xf32>
    %184 = arith.addf %183, %182 : vector<2x32xf32>
    %185 = arith.divf %183, %184 : vector<2x32xf32>
    %186 = vector.extract_strided_slice %173 {offsets = [0, 64], sizes = [2, 32], strides = [1, 1]} : vector<2x128xf32> to vector<2x32xf32>
    %187 = math.tanh %186 : vector<2x32xf32>
    %188 = vector.extract_strided_slice %173 {offsets = [0, 96], sizes = [2, 32], strides = [1, 1]} : vector<2x128xf32> to vector<2x32xf32>
    %189 = arith.negf %188 : vector<2x32xf32>
    %190 = math.exp %189 : vector<2x32xf32>
    %cst_51 = arith.constant 1.000000e+00 : f32
    %191 = vector.broadcast %cst_51 : f32 to vector<2x32xf32>
    %192 = arith.addf %191, %190 : vector<2x32xf32>
    %193 = arith.divf %191, %192 : vector<2x32xf32>
    %194 = arith.mulf %185, %167 : vector<2x32xf32>
    %195 = arith.mulf %179, %187 : vector<2x32xf32>
    %196 = arith.addf %194, %195 : vector<2x32xf32>
    %197 = math.tanh %196 : vector<2x32xf32>
    %198 = arith.mulf %193, %197 : vector<2x32xf32>
    %199 = vector.extract_strided_slice %10 {offsets = [0, 3], sizes = [2, 1], strides = [1, 1]} : vector<2x8xf32> to vector<2x1xf32>
    %cst_52 = arith.constant 5.000000e-01 : f32
    %200 = vector.broadcast %cst_52 : f32 to vector<2x1xf32>
    %201 = arith.cmpf ogt, %199, %200 : vector<2x1xf32>
    %202 = vector.shape_cast %201 : vector<2x1xi1> to vector<2x1xi1>
    %203 = vector.broadcast %202 : vector<2x1xi1> to vector<2x32xi1>
    %204 = arith.select %203, %198, %162 : vector<2x32xi1>, vector<2x32xf32>
    %cst_53 = arith.constant 5.000000e-01 : f32
    %205 = vector.broadcast %cst_53 : f32 to vector<2x1xf32>
    %206 = arith.cmpf ogt, %199, %205 : vector<2x1xf32>
    %207 = vector.shape_cast %206 : vector<2x1xi1> to vector<2x1xi1>
    %208 = vector.broadcast %207 : vector<2x1xi1> to vector<2x32xi1>
    %209 = arith.select %208, %196, %167 : vector<2x32xi1>, vector<2x32xf32>
    %210 = vector.broadcast %199 : vector<2x1xf32> to vector<2x32xf32>
    %211 = arith.mulf %198, %210 : vector<2x32xf32>
    %212 = vector.extract_strided_slice %35 {offsets = [0, 4, 0], sizes = [2, 1, 128], strides = [1, 1, 1]} : vector<2x8x128xf32> to vector<2x1x128xf32>
    %213 = vector.shape_cast %212 : vector<2x1x128xf32> to vector<2x128xf32>
    %cst_54 = arith.constant dense<0.000000e+00> : vector<2x128xf32>
    %214 = tpu.matmul %204, %0, %cst_54 {dimension_numbers = #tpu.dot_dimension_numbers<[1], [0], [0], [1], [0, 0, 1, 1], [], []>} : vector<2x32xf32>, vector<32x128xf32>, vector<2x128xf32> -> vector<2x128xf32>
    %215 = arith.addf %213, %214 : vector<2x128xf32>
    %216 = vector.extract_strided_slice %215 {offsets = [0, 0], sizes = [2, 32], strides = [1, 1]} : vector<2x128xf32> to vector<2x32xf32>
    %217 = arith.negf %216 : vector<2x32xf32>
    %218 = math.exp %217 : vector<2x32xf32>
    %cst_55 = arith.constant 1.000000e+00 : f32
    %219 = vector.broadcast %cst_55 : f32 to vector<2x32xf32>
    %220 = arith.addf %219, %218 : vector<2x32xf32>
    %221 = arith.divf %219, %220 : vector<2x32xf32>
    %222 = vector.extract_strided_slice %215 {offsets = [0, 32], sizes = [2, 32], strides = [1, 1]} : vector<2x128xf32> to vector<2x32xf32>
    %223 = arith.negf %222 : vector<2x32xf32>
    %224 = math.exp %223 : vector<2x32xf32>
    %cst_56 = arith.constant 1.000000e+00 : f32
    %225 = vector.broadcast %cst_56 : f32 to vector<2x32xf32>
    %226 = arith.addf %225, %224 : vector<2x32xf32>
    %227 = arith.divf %225, %226 : vector<2x32xf32>
    %228 = vector.extract_strided_slice %215 {offsets = [0, 64], sizes = [2, 32], strides = [1, 1]} : vector<2x128xf32> to vector<2x32xf32>
    %229 = math.tanh %228 : vector<2x32xf32>
    %230 = vector.extract_strided_slice %215 {offsets = [0, 96], sizes = [2, 32], strides = [1, 1]} : vector<2x128xf32> to vector<2x32xf32>
    %231 = arith.negf %230 : vector<2x32xf32>
    %232 = math.exp %231 : vector<2x32xf32>
    %cst_57 = arith.constant 1.000000e+00 : f32
    %233 = vector.broadcast %cst_57 : f32 to vector<2x32xf32>
    %234 = arith.addf %233, %232 : vector<2x32xf32>
    %235 = arith.divf %233, %234 : vector<2x32xf32>
    %236 = arith.mulf %227, %209 : vector<2x32xf32>
    %237 = arith.mulf %221, %229 : vector<2x32xf32>
    %238 = arith.addf %236, %237 : vector<2x32xf32>
    %239 = math.tanh %238 : vector<2x32xf32>
    %240 = arith.mulf %235, %239 : vector<2x32xf32>
    %241 = vector.extract_strided_slice %10 {offsets = [0, 4], sizes = [2, 1], strides = [1, 1]} : vector<2x8xf32> to vector<2x1xf32>
    %cst_58 = arith.constant 5.000000e-01 : f32
    %242 = vector.broadcast %cst_58 : f32 to vector<2x1xf32>
    %243 = arith.cmpf ogt, %241, %242 : vector<2x1xf32>
    %244 = vector.shape_cast %243 : vector<2x1xi1> to vector<2x1xi1>
    %245 = vector.broadcast %244 : vector<2x1xi1> to vector<2x32xi1>
    %246 = arith.select %245, %240, %204 : vector<2x32xi1>, vector<2x32xf32>
    %cst_59 = arith.constant 5.000000e-01 : f32
    %247 = vector.broadcast %cst_59 : f32 to vector<2x1xf32>
    %248 = arith.cmpf ogt, %241, %247 : vector<2x1xf32>
    %249 = vector.shape_cast %248 : vector<2x1xi1> to vector<2x1xi1>
    %250 = vector.broadcast %249 : vector<2x1xi1> to vector<2x32xi1>
    %251 = arith.select %250, %238, %209 : vector<2x32xi1>, vector<2x32xf32>
    %252 = vector.broadcast %241 : vector<2x1xf32> to vector<2x32xf32>
    %253 = arith.mulf %240, %252 : vector<2x32xf32>
    %254 = vector.extract_strided_slice %35 {offsets = [0, 5, 0], sizes = [2, 1, 128], strides = [1, 1, 1]} : vector<2x8x128xf32> to vector<2x1x128xf32>
    %255 = vector.shape_cast %254 : vector<2x1x128xf32> to vector<2x128xf32>
    %cst_60 = arith.constant dense<0.000000e+00> : vector<2x128xf32>
    %256 = tpu.matmul %246, %0, %cst_60 {dimension_numbers = #tpu.dot_dimension_numbers<[1], [0], [0], [1], [0, 0, 1, 1], [], []>} : vector<2x32xf32>, vector<32x128xf32>, vector<2x128xf32> -> vector<2x128xf32>
    %257 = arith.addf %255, %256 : vector<2x128xf32>
    %258 = vector.extract_strided_slice %257 {offsets = [0, 0], sizes = [2, 32], strides = [1, 1]} : vector<2x128xf32> to vector<2x32xf32>
    %259 = arith.negf %258 : vector<2x32xf32>
    %260 = math.exp %259 : vector<2x32xf32>
    %cst_61 = arith.constant 1.000000e+00 : f32
    %261 = vector.broadcast %cst_61 : f32 to vector<2x32xf32>
    %262 = arith.addf %261, %260 : vector<2x32xf32>
    %263 = arith.divf %261, %262 : vector<2x32xf32>
    %264 = vector.extract_strided_slice %257 {offsets = [0, 32], sizes = [2, 32], strides = [1, 1]} : vector<2x128xf32> to vector<2x32xf32>
    %265 = arith.negf %264 : vector<2x32xf32>
    %266 = math.exp %265 : vector<2x32xf32>
    %cst_62 = arith.constant 1.000000e+00 : f32
    %267 = vector.broadcast %cst_62 : f32 to vector<2x32xf32>
    %268 = arith.addf %267, %266 : vector<2x32xf32>
    %269 = arith.divf %267, %268 : vector<2x32xf32>
    %270 = vector.extract_strided_slice %257 {offsets = [0, 64], sizes = [2, 32], strides = [1, 1]} : vector<2x128xf32> to vector<2x32xf32>
    %271 = math.tanh %270 : vector<2x32xf32>
    %272 = vector.extract_strided_slice %257 {offsets = [0, 96], sizes = [2, 32], strides = [1, 1]} : vector<2x128xf32> to vector<2x32xf32>
    %273 = arith.negf %272 : vector<2x32xf32>
    %274 = math.exp %273 : vector<2x32xf32>
    %cst_63 = arith.constant 1.000000e+00 : f32
    %275 = vector.broadcast %cst_63 : f32 to vector<2x32xf32>
    %276 = arith.addf %275, %274 : vector<2x32xf32>
    %277 = arith.divf %275, %276 : vector<2x32xf32>
    %278 = arith.mulf %269, %251 : vector<2x32xf32>
    %279 = arith.mulf %263, %271 : vector<2x32xf32>
    %280 = arith.addf %278, %279 : vector<2x32xf32>
    %281 = math.tanh %280 : vector<2x32xf32>
    %282 = arith.mulf %277, %281 : vector<2x32xf32>
    %283 = vector.extract_strided_slice %10 {offsets = [0, 5], sizes = [2, 1], strides = [1, 1]} : vector<2x8xf32> to vector<2x1xf32>
    %cst_64 = arith.constant 5.000000e-01 : f32
    %284 = vector.broadcast %cst_64 : f32 to vector<2x1xf32>
    %285 = arith.cmpf ogt, %283, %284 : vector<2x1xf32>
    %286 = vector.shape_cast %285 : vector<2x1xi1> to vector<2x1xi1>
    %287 = vector.broadcast %286 : vector<2x1xi1> to vector<2x32xi1>
    %288 = arith.select %287, %282, %246 : vector<2x32xi1>, vector<2x32xf32>
    %cst_65 = arith.constant 5.000000e-01 : f32
    %289 = vector.broadcast %cst_65 : f32 to vector<2x1xf32>
    %290 = arith.cmpf ogt, %283, %289 : vector<2x1xf32>
    %291 = vector.shape_cast %290 : vector<2x1xi1> to vector<2x1xi1>
    %292 = vector.broadcast %291 : vector<2x1xi1> to vector<2x32xi1>
    %293 = arith.select %292, %280, %251 : vector<2x32xi1>, vector<2x32xf32>
    %294 = vector.broadcast %283 : vector<2x1xf32> to vector<2x32xf32>
    %295 = arith.mulf %282, %294 : vector<2x32xf32>
    %296 = vector.extract_strided_slice %35 {offsets = [0, 6, 0], sizes = [2, 1, 128], strides = [1, 1, 1]} : vector<2x8x128xf32> to vector<2x1x128xf32>
    %297 = vector.shape_cast %296 : vector<2x1x128xf32> to vector<2x128xf32>
    %cst_66 = arith.constant dense<0.000000e+00> : vector<2x128xf32>
    %298 = tpu.matmul %288, %0, %cst_66 {dimension_numbers = #tpu.dot_dimension_numbers<[1], [0], [0], [1], [0, 0, 1, 1], [], []>} : vector<2x32xf32>, vector<32x128xf32>, vector<2x128xf32> -> vector<2x128xf32>
    %299 = arith.addf %297, %298 : vector<2x128xf32>
    %300 = vector.extract_strided_slice %299 {offsets = [0, 0], sizes = [2, 32], strides = [1, 1]} : vector<2x128xf32> to vector<2x32xf32>
    %301 = arith.negf %300 : vector<2x32xf32>
    %302 = math.exp %301 : vector<2x32xf32>
    %cst_67 = arith.constant 1.000000e+00 : f32
    %303 = vector.broadcast %cst_67 : f32 to vector<2x32xf32>
    %304 = arith.addf %303, %302 : vector<2x32xf32>
    %305 = arith.divf %303, %304 : vector<2x32xf32>
    %306 = vector.extract_strided_slice %299 {offsets = [0, 32], sizes = [2, 32], strides = [1, 1]} : vector<2x128xf32> to vector<2x32xf32>
    %307 = arith.negf %306 : vector<2x32xf32>
    %308 = math.exp %307 : vector<2x32xf32>
    %cst_68 = arith.constant 1.000000e+00 : f32
    %309 = vector.broadcast %cst_68 : f32 to vector<2x32xf32>
    %310 = arith.addf %309, %308 : vector<2x32xf32>
    %311 = arith.divf %309, %310 : vector<2x32xf32>
    %312 = vector.extract_strided_slice %299 {offsets = [0, 64], sizes = [2, 32], strides = [1, 1]} : vector<2x128xf32> to vector<2x32xf32>
    %313 = math.tanh %312 : vector<2x32xf32>
    %314 = vector.extract_strided_slice %299 {offsets = [0, 96], sizes = [2, 32], strides = [1, 1]} : vector<2x128xf32> to vector<2x32xf32>
    %315 = arith.negf %314 : vector<2x32xf32>
    %316 = math.exp %315 : vector<2x32xf32>
    %cst_69 = arith.constant 1.000000e+00 : f32
    %317 = vector.broadcast %cst_69 : f32 to vector<2x32xf32>
    %318 = arith.addf %317, %316 : vector<2x32xf32>
    %319 = arith.divf %317, %318 : vector<2x32xf32>
    %320 = arith.mulf %311, %293 : vector<2x32xf32>
    %321 = arith.mulf %305, %313 : vector<2x32xf32>
    %322 = arith.addf %320, %321 : vector<2x32xf32>
    %323 = math.tanh %322 : vector<2x32xf32>
    %324 = arith.mulf %319, %323 : vector<2x32xf32>
    %325 = vector.extract_strided_slice %10 {offsets = [0, 6], sizes = [2, 1], strides = [1, 1]} : vector<2x8xf32> to vector<2x1xf32>
    %cst_70 = arith.constant 5.000000e-01 : f32
    %326 = vector.broadcast %cst_70 : f32 to vector<2x1xf32>
    %327 = arith.cmpf ogt, %325, %326 : vector<2x1xf32>
    %328 = vector.shape_cast %327 : vector<2x1xi1> to vector<2x1xi1>
    %329 = vector.broadcast %328 : vector<2x1xi1> to vector<2x32xi1>
    %330 = arith.select %329, %324, %288 : vector<2x32xi1>, vector<2x32xf32>
    %cst_71 = arith.constant 5.000000e-01 : f32
    %331 = vector.broadcast %cst_71 : f32 to vector<2x1xf32>
    %332 = arith.cmpf ogt, %325, %331 : vector<2x1xf32>
    %333 = vector.shape_cast %332 : vector<2x1xi1> to vector<2x1xi1>
    %334 = vector.broadcast %333 : vector<2x1xi1> to vector<2x32xi1>
    %335 = arith.select %334, %322, %293 : vector<2x32xi1>, vector<2x32xf32>
    %336 = vector.broadcast %325 : vector<2x1xf32> to vector<2x32xf32>
    %337 = arith.mulf %324, %336 : vector<2x32xf32>
    %338 = vector.extract_strided_slice %35 {offsets = [0, 7, 0], sizes = [2, 1, 128], strides = [1, 1, 1]} : vector<2x8x128xf32> to vector<2x1x128xf32>
    %339 = vector.shape_cast %338 : vector<2x1x128xf32> to vector<2x128xf32>
    %cst_72 = arith.constant dense<0.000000e+00> : vector<2x128xf32>
    %340 = tpu.matmul %330, %0, %cst_72 {dimension_numbers = #tpu.dot_dimension_numbers<[1], [0], [0], [1], [0, 0, 1, 1], [], []>} : vector<2x32xf32>, vector<32x128xf32>, vector<2x128xf32> -> vector<2x128xf32>
    %341 = arith.addf %339, %340 : vector<2x128xf32>
    %342 = vector.extract_strided_slice %341 {offsets = [0, 0], sizes = [2, 32], strides = [1, 1]} : vector<2x128xf32> to vector<2x32xf32>
    %343 = arith.negf %342 : vector<2x32xf32>
    %344 = math.exp %343 : vector<2x32xf32>
    %cst_73 = arith.constant 1.000000e+00 : f32
    %345 = vector.broadcast %cst_73 : f32 to vector<2x32xf32>
    %346 = arith.addf %345, %344 : vector<2x32xf32>
    %347 = arith.divf %345, %346 : vector<2x32xf32>
    %348 = vector.extract_strided_slice %341 {offsets = [0, 32], sizes = [2, 32], strides = [1, 1]} : vector<2x128xf32> to vector<2x32xf32>
    %349 = arith.negf %348 : vector<2x32xf32>
    %350 = math.exp %349 : vector<2x32xf32>
    %cst_74 = arith.constant 1.000000e+00 : f32
    %351 = vector.broadcast %cst_74 : f32 to vector<2x32xf32>
    %352 = arith.addf %351, %350 : vector<2x32xf32>
    %353 = arith.divf %351, %352 : vector<2x32xf32>
    %354 = vector.extract_strided_slice %341 {offsets = [0, 64], sizes = [2, 32], strides = [1, 1]} : vector<2x128xf32> to vector<2x32xf32>
    %355 = math.tanh %354 : vector<2x32xf32>
    %356 = vector.extract_strided_slice %341 {offsets = [0, 96], sizes = [2, 32], strides = [1, 1]} : vector<2x128xf32> to vector<2x32xf32>
    %357 = arith.negf %356 : vector<2x32xf32>
    %358 = math.exp %357 : vector<2x32xf32>
    %cst_75 = arith.constant 1.000000e+00 : f32
    %359 = vector.broadcast %cst_75 : f32 to vector<2x32xf32>
    %360 = arith.addf %359, %358 : vector<2x32xf32>
    %361 = arith.divf %359, %360 : vector<2x32xf32>
    %362 = arith.mulf %353, %335 : vector<2x32xf32>
    %363 = arith.mulf %347, %355 : vector<2x32xf32>
    %364 = arith.addf %362, %363 : vector<2x32xf32>
    %365 = math.tanh %364 : vector<2x32xf32>
    %366 = arith.mulf %361, %365 : vector<2x32xf32>
    %367 = vector.extract_strided_slice %10 {offsets = [0, 7], sizes = [2, 1], strides = [1, 1]} : vector<2x8xf32> to vector<2x1xf32>
    %cst_76 = arith.constant 5.000000e-01 : f32
    %368 = vector.broadcast %cst_76 : f32 to vector<2x1xf32>
    %369 = arith.cmpf ogt, %367, %368 : vector<2x1xf32>
    %370 = vector.shape_cast %369 : vector<2x1xi1> to vector<2x1xi1>
    %371 = vector.broadcast %370 : vector<2x1xi1> to vector<2x32xi1>
    %372 = arith.select %371, %366, %330 : vector<2x32xi1>, vector<2x32xf32>
    %cst_77 = arith.constant 5.000000e-01 : f32
    %373 = vector.broadcast %cst_77 : f32 to vector<2x1xf32>
    %374 = arith.cmpf ogt, %367, %373 : vector<2x1xf32>
    %375 = vector.shape_cast %374 : vector<2x1xi1> to vector<2x1xi1>
    %376 = vector.broadcast %375 : vector<2x1xi1> to vector<2x32xi1>
    %377 = arith.select %376, %364, %335 : vector<2x32xi1>, vector<2x32xf32>
    %378 = vector.broadcast %367 : vector<2x1xf32> to vector<2x32xf32>
    %379 = arith.mulf %366, %378 : vector<2x32xf32>
    %380 = vector.shape_cast %85 : vector<2x32xf32> to vector<2x1x32xf32>
    %381 = vector.shape_cast %127 : vector<2x32xf32> to vector<2x1x32xf32>
    %382 = vector.shape_cast %169 : vector<2x32xf32> to vector<2x1x32xf32>
    %383 = vector.shape_cast %211 : vector<2x32xf32> to vector<2x1x32xf32>
    %384 = vector.shape_cast %253 : vector<2x32xf32> to vector<2x1x32xf32>
    %385 = vector.shape_cast %295 : vector<2x32xf32> to vector<2x1x32xf32>
    %386 = vector.shape_cast %337 : vector<2x32xf32> to vector<2x1x32xf32>
    %387 = vector.shape_cast %379 : vector<2x32xf32> to vector<2x1x32xf32>
    %388 = tpu.concatenate %380, %381, %382, %383, %384, %385, %386, %387 in 1 : vector<2x1x32xf32>, vector<2x1x32xf32>, vector<2x1x32xf32>, vector<2x1x32xf32>, vector<2x1x32xf32>, vector<2x1x32xf32>, vector<2x1x32xf32>, vector<2x1x32xf32> -> vector<2x8x32xf32>
    %cst_78 = arith.constant dense<0.000000e+00> : vector<2xf32>
    %389 = vector.multi_reduction <add>, %10, %cst_78 [1] : vector<2x8xf32> to vector<2xf32>
    %390 = vector.shape_cast %389 : vector<2xf32> to vector<2x1xf32>
    %cst_79 = arith.constant 1.000000e+00 : f32
    %391 = vector.broadcast %cst_79 : f32 to vector<2x1xf32>
    %392 = arith.maximumf %390, %391 : vector<2x1xf32>
    %cst_80 = arith.constant dense<0.000000e+00> : vector<2x32xf32>
    %393 = vector.multi_reduction <add>, %388, %cst_80 [1] : vector<2x8x32xf32> to vector<2x32xf32>
    %394 = vector.broadcast %392 : vector<2x1xf32> to vector<2x32xf32>
    %395 = arith.divf %393, %394 : vector<2x32xf32>
    %c0_81 = arith.constant 0 : index
    %c0_82 = arith.constant 0 : index
    %396 = vector.load %arg6[%c0_81, %c0_82] : memref<32x32xf32, #tpu.memory_space<vmem>>, vector<32x32xf32>
    %cst_83 = arith.constant dense<0.000000e+00> : vector<2x32xf32>
    %397 = tpu.matmul %395, %396, %cst_83 {dimension_numbers = #tpu.dot_dimension_numbers<[1], [0], [0], [1], [0, 0, 1, 1], [], []>} : vector<2x32xf32>, vector<32x32xf32>, vector<2x32xf32> -> vector<2x32xf32>
    %c0_84 = arith.constant 0 : index
    %c0_85 = arith.constant 0 : index
    %398 = vector.load %arg7[%c0_84, %c0_85] : memref<1x32xf32, #tpu.memory_space<vmem>>, vector<1x32xf32>
    %399 = vector.broadcast %398 : vector<1x32xf32> to vector<2x32xf32>
    %400 = arith.addf %397, %399 : vector<2x32xf32>
    %401 = math.tanh %400 : vector<2x32xf32>
    %c0_86 = arith.constant 0 : index
    %c0_87 = arith.constant 0 : index
    %402 = vector.load %arg8[%c0_86, %c0_87] : memref<32x32xf32, #tpu.memory_space<vmem>>, vector<32x32xf32>
    %cst_88 = arith.constant dense<0.000000e+00> : vector<2x32xf32>
    %403 = tpu.matmul %401, %402, %cst_88 {dimension_numbers = #tpu.dot_dimension_numbers<[1], [0], [0], [1], [0, 0, 1, 1], [], []>} : vector<2x32xf32>, vector<32x32xf32>, vector<2x32xf32> -> vector<2x32xf32>
    %c0_89 = arith.constant 0 : index
    %c0_90 = arith.constant 0 : index
    %404 = vector.load %arg9[%c0_89, %c0_90] : memref<1x32xf32, #tpu.memory_space<vmem>>, vector<1x32xf32>
    %405 = vector.broadcast %404 : vector<1x32xf32> to vector<2x32xf32>
    %406 = arith.addf %403, %405 : vector<2x32xf32>
    %cst_91 = arith.constant 0.000000e+00 : f32
    %407 = vector.broadcast %cst_91 : f32 to vector<2x32xf32>
    %408 = arith.maximumf %406, %407 : vector<2x32xf32>
    %c0_92 = arith.constant 0 : index
    %c0_93 = arith.constant 0 : index
    %409 = vector.load %arg10[%c0_92, %c0_93] : memref<32x1xf32, #tpu.memory_space<vmem>>, vector<32x1xf32>
    %cst_94 = arith.constant dense<0.000000e+00> : vector<2x1xf32>
    %410 = tpu.matmul %408, %409, %cst_94 {dimension_numbers = #tpu.dot_dimension_numbers<[1], [0], [0], [1], [0, 0, 1, 1], [], []>} : vector<2x32xf32>, vector<32x1xf32>, vector<2x1xf32> -> vector<2x1xf32>
    %c0_95 = arith.constant 0 : index
    %c0_96 = arith.constant 0 : index
    %411 = vector.load %arg11[%c0_95, %c0_96] : memref<1x1xf32, #tpu.memory_space<vmem>>, vector<1x1xf32>
    %412 = vector.broadcast %411 : vector<1x1xf32> to vector<2x1xf32>
    %413 = arith.addf %410, %412 : vector<2x1xf32>
    %414 = arith.negf %413 : vector<2x1xf32>
    %415 = math.exp %414 : vector<2x1xf32>
    %cst_97 = arith.constant 1.000000e+00 : f32
    %416 = vector.broadcast %cst_97 : f32 to vector<2x1xf32>
    %417 = arith.addf %416, %415 : vector<2x1xf32>
    %418 = arith.divf %416, %417 : vector<2x1xf32>
    %c0_98 = arith.constant 0 : index
    %c0_99 = arith.constant 0 : index
    %419 = vector.load %arg19[%c0_98, %c0_99] : memref<2x1xf32, #tpu.memory_space<vmem>>, vector<2x1xf32>
    tpu.vector_store %arg19[%c0_98, %c0_99], %418 {strides = array<i32>} : memref<2x1xf32, #tpu.memory_space<vmem>>, vector<2x1xf32>,
    %420 = vector.shape_cast %10 : vector<2x8xf32> to vector<2x1x8xf32>
    %421 = vector.extract_strided_slice %41 {offsets = [0, 0, 0], sizes = [2, 1, 128], strides = [1, 1, 1]} : vector<2x8x128xf32> to vector<2x1x128xf32>
    %422 = vector.shape_cast %421 : vector<2x1x128xf32> to vector<2x128xf32>
    %cst_100 = arith.constant dense<0.000000e+00> : vector<2x128xf32>
    %423 = tpu.matmul %372, %1, %cst_100 {dimension_numbers = #tpu.dot_dimension_numbers<[1], [0], [0], [1], [0, 0, 1, 1], [], []>} : vector<2x32xf32>, vector<32x128xf32>, vector<2x128xf32> -> vector<2x128xf32>
    %424 = arith.addf %422, %423 : vector<2x128xf32>
    %425 = vector.extract_strided_slice %424 {offsets = [0, 0], sizes = [2, 32], strides = [1, 1]} : vector<2x128xf32> to vector<2x32xf32>
    %426 = arith.negf %425 : vector<2x32xf32>
    %427 = math.exp %426 : vector<2x32xf32>
    %cst_101 = arith.constant 1.000000e+00 : f32
    %428 = vector.broadcast %cst_101 : f32 to vector<2x32xf32>
    %429 = arith.addf %428, %427 : vector<2x32xf32>
    %430 = arith.divf %428, %429 : vector<2x32xf32>
    %431 = vector.extract_strided_slice %424 {offsets = [0, 32], sizes = [2, 32], strides = [1, 1]} : vector<2x128xf32> to vector<2x32xf32>
    %432 = arith.negf %431 : vector<2x32xf32>
    %433 = math.exp %432 : vector<2x32xf32>
    %cst_102 = arith.constant 1.000000e+00 : f32
    %434 = vector.broadcast %cst_102 : f32 to vector<2x32xf32>
    %435 = arith.addf %434, %433 : vector<2x32xf32>
    %436 = arith.divf %434, %435 : vector<2x32xf32>
    %437 = vector.extract_strided_slice %424 {offsets = [0, 64], sizes = [2, 32], strides = [1, 1]} : vector<2x128xf32> to vector<2x32xf32>
    %438 = math.tanh %437 : vector<2x32xf32>
    %439 = vector.extract_strided_slice %424 {offsets = [0, 96], sizes = [2, 32], strides = [1, 1]} : vector<2x128xf32> to vector<2x32xf32>
    %440 = arith.negf %439 : vector<2x32xf32>
    %441 = math.exp %440 : vector<2x32xf32>
    %cst_103 = arith.constant 1.000000e+00 : f32
    %442 = vector.broadcast %cst_103 : f32 to vector<2x32xf32>
    %443 = arith.addf %442, %441 : vector<2x32xf32>
    %444 = arith.divf %442, %443 : vector<2x32xf32>
    %445 = arith.mulf %436, %377 : vector<2x32xf32>
    %446 = arith.mulf %430, %438 : vector<2x32xf32>
    %447 = arith.addf %445, %446 : vector<2x32xf32>
    %448 = math.tanh %447 : vector<2x32xf32>
    %449 = arith.mulf %444, %448 : vector<2x32xf32>
    %450 = vector.shape_cast %449 : vector<2x32xf32> to vector<2x1x32xf32>
    "tpu.trace_start"() <{level = 10 : i32, message = "bqh,bsh->bqs"}> : () -> ()
    %cst_104 = arith.constant dense<0.000000e+00> : vector<2x1x8xf32>
    %451 = tpu.matmul %450, %388, %cst_104 {dimension_numbers = #tpu.dot_dimension_numbers<[2], [2], [1], [1], [0, 0, 0, 1, 1, 1], [0], [0]>} : vector<2x1x32xf32>, vector<2x8x32xf32>, vector<2x1x8xf32> -> vector<2x1x8xf32>
    %cst_105 = arith.constant 5.000000e-01 : f32
    "tpu.trace_stop"() : () -> ()
    %452 = vector.broadcast %cst_105 : f32 to vector<2x1x8xf32>
    %453 = arith.cmpf ogt, %420, %452 : vector<2x1x8xf32>
    %cst_106 = arith.constant -1.000000e+09 : f32
    %454 = vector.broadcast %cst_106 : f32 to vector<2x1x8xf32>
    %455 = arith.select %453, %451, %454 : vector<2x1x8xi1>, vector<2x1x8xf32>
    %cst_107 = arith.constant dense<0xFF800000> : vector<2x1xf32>
    %456 = vector.multi_reduction <maximumf>, %455, %cst_107 [2] : vector<2x1x8xf32> to vector<2x1xf32>
    %457 = vector.shape_cast %456 : vector<2x1xf32> to vector<2x1x1xf32>
    %458 = vector.broadcast %457 : vector<2x1x1xf32> to vector<2x1x8xf32>
    %459 = arith.subf %455, %458 : vector<2x1x8xf32>
    %460 = math.exp %459 : vector<2x1x8xf32>
    %cst_108 = arith.constant dense<0.000000e+00> : vector<2x1xf32>
    %461 = vector.multi_reduction <add>, %460, %cst_108 [2] : vector<2x1x8xf32> to vector<2x1xf32>
    %462 = vector.shape_cast %461 : vector<2x1xf32> to vector<2x1x1xf32>
    %463 = tpu.reciprocal %462 {approx = true} : vector<2x1x1xf32> -> vector<2x1x1xf32>
    %464 = vector.broadcast %463 : vector<2x1x1xf32> to vector<2x1x8xf32>
    %465 = arith.mulf %460, %464 : vector<2x1x8xf32>
    "tpu.trace_start"() <{level = 10 : i32, message = "bqs,bsh->bqh"}> : () -> ()
    %cst_109 = arith.constant dense<0.000000e+00> : vector<2x1x32xf32>
    %466 = tpu.matmul %465, %388, %cst_109 {dimension_numbers = #tpu.dot_dimension_numbers<[2], [1], [1], [2], [0, 0, 0, 1, 1, 2], [0], [0]>} : vector<2x1x8xf32>, vector<2x8x32xf32>, vector<2x1x32xf32> -> vector<2x1x32xf32>
    "tpu.trace_stop"() : () -> ()
    %467 = vector.shape_cast %466 : vector<2x1x32xf32> to vector<2x32xf32>
    %468 = tpu.concatenate %449, %467 in 1 : vector<2x32xf32>, vector<2x32xf32> -> vector<2x64xf32>
    %cst_110 = arith.constant dense<0.000000e+00> : vector<2x32xf32>
    %469 = tpu.matmul %468, %2, %cst_110 {dimension_numbers = #tpu.dot_dimension_numbers<[1], [0], [0], [1], [0, 0, 1, 1], [], []>} : vector<2x64xf32>, vector<64x32xf32>, vector<2x32xf32> -> vector<2x32xf32>
    %470 = vector.broadcast %3 : vector<1x32xf32> to vector<2x32xf32>
    %471 = arith.addf %469, %470 : vector<2x32xf32>
    %472 = math.tanh %471 : vector<2x32xf32>
    %473 = vector.extract_strided_slice %41 {offsets = [0, 1, 0], sizes = [2, 1, 128], strides = [1, 1, 1]} : vector<2x8x128xf32> to vector<2x1x128xf32>
    %474 = vector.shape_cast %473 : vector<2x1x128xf32> to vector<2x128xf32>
    %cst_111 = arith.constant dense<0.000000e+00> : vector<2x128xf32>
    %475 = tpu.matmul %449, %1, %cst_111 {dimension_numbers = #tpu.dot_dimension_numbers<[1], [0], [0], [1], [0, 0, 1, 1], [], []>} : vector<2x32xf32>, vector<32x128xf32>, vector<2x128xf32> -> vector<2x128xf32>
    %476 = arith.addf %474, %475 : vector<2x128xf32>
    %477 = vector.extract_strided_slice %476 {offsets = [0, 0], sizes = [2, 32], strides = [1, 1]} : vector<2x128xf32> to vector<2x32xf32>
    %478 = arith.negf %477 : vector<2x32xf32>
    %479 = math.exp %478 : vector<2x32xf32>
    %cst_112 = arith.constant 1.000000e+00 : f32
    %480 = vector.broadcast %cst_112 : f32 to vector<2x32xf32>
    %481 = arith.addf %480, %479 : vector<2x32xf32>
    %482 = arith.divf %480, %481 : vector<2x32xf32>
    %483 = vector.extract_strided_slice %476 {offsets = [0, 32], sizes = [2, 32], strides = [1, 1]} : vector<2x128xf32> to vector<2x32xf32>
    %484 = arith.negf %483 : vector<2x32xf32>
    %485 = math.exp %484 : vector<2x32xf32>
    %cst_113 = arith.constant 1.000000e+00 : f32
    %486 = vector.broadcast %cst_113 : f32 to vector<2x32xf32>
    %487 = arith.addf %486, %485 : vector<2x32xf32>
    %488 = arith.divf %486, %487 : vector<2x32xf32>
    %489 = vector.extract_strided_slice %476 {offsets = [0, 64], sizes = [2, 32], strides = [1, 1]} : vector<2x128xf32> to vector<2x32xf32>
    %490 = math.tanh %489 : vector<2x32xf32>
    %491 = vector.extract_strided_slice %476 {offsets = [0, 96], sizes = [2, 32], strides = [1, 1]} : vector<2x128xf32> to vector<2x32xf32>
    %492 = arith.negf %491 : vector<2x32xf32>
    %493 = math.exp %492 : vector<2x32xf32>
    %cst_114 = arith.constant 1.000000e+00 : f32
    %494 = vector.broadcast %cst_114 : f32 to vector<2x32xf32>
    %495 = arith.addf %494, %493 : vector<2x32xf32>
    %496 = arith.divf %494, %495 : vector<2x32xf32>
    %497 = arith.mulf %488, %447 : vector<2x32xf32>
    %498 = arith.mulf %482, %490 : vector<2x32xf32>
    %499 = arith.addf %497, %498 : vector<2x32xf32>
    %500 = math.tanh %499 : vector<2x32xf32>
    %501 = arith.mulf %496, %500 : vector<2x32xf32>
    %502 = vector.shape_cast %501 : vector<2x32xf32> to vector<2x1x32xf32>
    "tpu.trace_start"() <{level = 10 : i32, message = "bqh,bsh->bqs"}> : () -> ()
    %cst_115 = arith.constant dense<0.000000e+00> : vector<2x1x8xf32>
    %503 = tpu.matmul %502, %388, %cst_115 {dimension_numbers = #tpu.dot_dimension_numbers<[2], [2], [1], [1], [0, 0, 0, 1, 1, 1], [0], [0]>} : vector<2x1x32xf32>, vector<2x8x32xf32>, vector<2x1x8xf32> -> vector<2x1x8xf32>
    %cst_116 = arith.constant 5.000000e-01 : f32
    "tpu.trace_stop"() : () -> ()
    %504 = vector.broadcast %cst_116 : f32 to vector<2x1x8xf32>
    %505 = arith.cmpf ogt, %420, %504 : vector<2x1x8xf32>
    %cst_117 = arith.constant -1.000000e+09 : f32
    %506 = vector.broadcast %cst_117 : f32 to vector<2x1x8xf32>
    %507 = arith.select %505, %503, %506 : vector<2x1x8xi1>, vector<2x1x8xf32>
    %cst_118 = arith.constant dense<0xFF800000> : vector<2x1xf32>
    %508 = vector.multi_reduction <maximumf>, %507, %cst_118 [2] : vector<2x1x8xf32> to vector<2x1xf32>
    %509 = vector.shape_cast %508 : vector<2x1xf32> to vector<2x1x1xf32>
    %510 = vector.broadcast %509 : vector<2x1x1xf32> to vector<2x1x8xf32>
    %511 = arith.subf %507, %510 : vector<2x1x8xf32>
    %512 = math.exp %511 : vector<2x1x8xf32>
    %cst_119 = arith.constant dense<0.000000e+00> : vector<2x1xf32>
    %513 = vector.multi_reduction <add>, %512, %cst_119 [2] : vector<2x1x8xf32> to vector<2x1xf32>
    %514 = vector.shape_cast %513 : vector<2x1xf32> to vector<2x1x1xf32>
    %515 = tpu.reciprocal %514 {approx = true} : vector<2x1x1xf32> -> vector<2x1x1xf32>
    %516 = vector.broadcast %515 : vector<2x1x1xf32> to vector<2x1x8xf32>
    %517 = arith.mulf %512, %516 : vector<2x1x8xf32>
    "tpu.trace_start"() <{level = 10 : i32, message = "bqs,bsh->bqh"}> : () -> ()
    %cst_120 = arith.constant dense<0.000000e+00> : vector<2x1x32xf32>
    %518 = tpu.matmul %517, %388, %cst_120 {dimension_numbers = #tpu.dot_dimension_numbers<[2], [1], [1], [2], [0, 0, 0, 1, 1, 2], [0], [0]>} : vector<2x1x8xf32>, vector<2x8x32xf32>, vector<2x1x32xf32> -> vector<2x1x32xf32>
    "tpu.trace_stop"() : () -> ()
    %519 = vector.shape_cast %518 : vector<2x1x32xf32> to vector<2x32xf32>
    %520 = tpu.concatenate %501, %519 in 1 : vector<2x32xf32>, vector<2x32xf32> -> vector<2x64xf32>
    %cst_121 = arith.constant dense<0.000000e+00> : vector<2x32xf32>
    %521 = tpu.matmul %520, %2, %cst_121 {dimension_numbers = #tpu.dot_dimension_numbers<[1], [0], [0], [1], [0, 0, 1, 1], [], []>} : vector<2x64xf32>, vector<64x32xf32>, vector<2x32xf32> -> vector<2x32xf32>
    %522 = vector.broadcast %3 : vector<1x32xf32> to vector<2x32xf32>
    %523 = arith.addf %521, %522 : vector<2x32xf32>
    %524 = math.tanh %523 : vector<2x32xf32>
    %525 = vector.extract_strided_slice %41 {offsets = [0, 2, 0], sizes = [2, 1, 128], strides = [1, 1, 1]} : vector<2x8x128xf32> to vector<2x1x128xf32>
    %526 = vector.shape_cast %525 : vector<2x1x128xf32> to vector<2x128xf32>
    %cst_122 = arith.constant dense<0.000000e+00> : vector<2x128xf32>
    %527 = tpu.matmul %501, %1, %cst_122 {dimension_numbers = #tpu.dot_dimension_numbers<[1], [0], [0], [1], [0, 0, 1, 1], [], []>} : vector<2x32xf32>, vector<32x128xf32>, vector<2x128xf32> -> vector<2x128xf32>
    %528 = arith.addf %526, %527 : vector<2x128xf32>
    %529 = vector.extract_strided_slice %528 {offsets = [0, 0], sizes = [2, 32], strides = [1, 1]} : vector<2x128xf32> to vector<2x32xf32>
    %530 = arith.negf %529 : vector<2x32xf32>
    %531 = math.exp %530 : vector<2x32xf32>
    %cst_123 = arith.constant 1.000000e+00 : f32
    %532 = vector.broadcast %cst_123 : f32 to vector<2x32xf32>
    %533 = arith.addf %532, %531 : vector<2x32xf32>
    %534 = arith.divf %532, %533 : vector<2x32xf32>
    %535 = vector.extract_strided_slice %528 {offsets = [0, 32], sizes = [2, 32], strides = [1, 1]} : vector<2x128xf32> to vector<2x32xf32>
    %536 = arith.negf %535 : vector<2x32xf32>
    %537 = math.exp %536 : vector<2x32xf32>
    %cst_124 = arith.constant 1.000000e+00 : f32
    %538 = vector.broadcast %cst_124 : f32 to vector<2x32xf32>
    %539 = arith.addf %538, %537 : vector<2x32xf32>
    %540 = arith.divf %538, %539 : vector<2x32xf32>
    %541 = vector.extract_strided_slice %528 {offsets = [0, 64], sizes = [2, 32], strides = [1, 1]} : vector<2x128xf32> to vector<2x32xf32>
    %542 = math.tanh %541 : vector<2x32xf32>
    %543 = vector.extract_strided_slice %528 {offsets = [0, 96], sizes = [2, 32], strides = [1, 1]} : vector<2x128xf32> to vector<2x32xf32>
    %544 = arith.negf %543 : vector<2x32xf32>
    %545 = math.exp %544 : vector<2x32xf32>
    %cst_125 = arith.constant 1.000000e+00 : f32
    %546 = vector.broadcast %cst_125 : f32 to vector<2x32xf32>
    %547 = arith.addf %546, %545 : vector<2x32xf32>
    %548 = arith.divf %546, %547 : vector<2x32xf32>
    %549 = arith.mulf %540, %499 : vector<2x32xf32>
    %550 = arith.mulf %534, %542 : vector<2x32xf32>
    %551 = arith.addf %549, %550 : vector<2x32xf32>
    %552 = math.tanh %551 : vector<2x32xf32>
    %553 = arith.mulf %548, %552 : vector<2x32xf32>
    %554 = vector.shape_cast %553 : vector<2x32xf32> to vector<2x1x32xf32>
    "tpu.trace_start"() <{level = 10 : i32, message = "bqh,bsh->bqs"}> : () -> ()
    %cst_126 = arith.constant dense<0.000000e+00> : vector<2x1x8xf32>
    %555 = tpu.matmul %554, %388, %cst_126 {dimension_numbers = #tpu.dot_dimension_numbers<[2], [2], [1], [1], [0, 0, 0, 1, 1, 1], [0], [0]>} : vector<2x1x32xf32>, vector<2x8x32xf32>, vector<2x1x8xf32> -> vector<2x1x8xf32>
    %cst_127 = arith.constant 5.000000e-01 : f32
    "tpu.trace_stop"() : () -> ()
    %556 = vector.broadcast %cst_127 : f32 to vector<2x1x8xf32>
    %557 = arith.cmpf ogt, %420, %556 : vector<2x1x8xf32>
    %cst_128 = arith.constant -1.000000e+09 : f32
    %558 = vector.broadcast %cst_128 : f32 to vector<2x1x8xf32>
    %559 = arith.select %557, %555, %558 : vector<2x1x8xi1>, vector<2x1x8xf32>
    %cst_129 = arith.constant dense<0xFF800000> : vector<2x1xf32>
    %560 = vector.multi_reduction <maximumf>, %559, %cst_129 [2] : vector<2x1x8xf32> to vector<2x1xf32>
    %561 = vector.shape_cast %560 : vector<2x1xf32> to vector<2x1x1xf32>
    %562 = vector.broadcast %561 : vector<2x1x1xf32> to vector<2x1x8xf32>
    %563 = arith.subf %559, %562 : vector<2x1x8xf32>
    %564 = math.exp %563 : vector<2x1x8xf32>
    %cst_130 = arith.constant dense<0.000000e+00> : vector<2x1xf32>
    %565 = vector.multi_reduction <add>, %564, %cst_130 [2] : vector<2x1x8xf32> to vector<2x1xf32>
    %566 = vector.shape_cast %565 : vector<2x1xf32> to vector<2x1x1xf32>
    %567 = tpu.reciprocal %566 {approx = true} : vector<2x1x1xf32> -> vector<2x1x1xf32>
    %568 = vector.broadcast %567 : vector<2x1x1xf32> to vector<2x1x8xf32>
    %569 = arith.mulf %564, %568 : vector<2x1x8xf32>
    "tpu.trace_start"() <{level = 10 : i32, message = "bqs,bsh->bqh"}> : () -> ()
    %cst_131 = arith.constant dense<0.000000e+00> : vector<2x1x32xf32>
    %570 = tpu.matmul %569, %388, %cst_131 {dimension_numbers = #tpu.dot_dimension_numbers<[2], [1], [1], [2], [0, 0, 0, 1, 1, 2], [0], [0]>} : vector<2x1x8xf32>, vector<2x8x32xf32>, vector<2x1x32xf32> -> vector<2x1x32xf32>
    "tpu.trace_stop"() : () -> ()
    %571 = vector.shape_cast %570 : vector<2x1x32xf32> to vector<2x32xf32>
    %572 = tpu.concatenate %553, %571 in 1 : vector<2x32xf32>, vector<2x32xf32> -> vector<2x64xf32>
    %cst_132 = arith.constant dense<0.000000e+00> : vector<2x32xf32>
    %573 = tpu.matmul %572, %2, %cst_132 {dimension_numbers = #tpu.dot_dimension_numbers<[1], [0], [0], [1], [0, 0, 1, 1], [], []>} : vector<2x64xf32>, vector<64x32xf32>, vector<2x32xf32> -> vector<2x32xf32>
    %574 = vector.broadcast %3 : vector<1x32xf32> to vector<2x32xf32>
    %575 = arith.addf %573, %574 : vector<2x32xf32>
    %576 = math.tanh %575 : vector<2x32xf32>
    %577 = vector.extract_strided_slice %41 {offsets = [0, 3, 0], sizes = [2, 1, 128], strides = [1, 1, 1]} : vector<2x8x128xf32> to vector<2x1x128xf32>
    %578 = vector.shape_cast %577 : vector<2x1x128xf32> to vector<2x128xf32>
    %cst_133 = arith.constant dense<0.000000e+00> : vector<2x128xf32>
    %579 = tpu.matmul %553, %1, %cst_133 {dimension_numbers = #tpu.dot_dimension_numbers<[1], [0], [0], [1], [0, 0, 1, 1], [], []>} : vector<2x32xf32>, vector<32x128xf32>, vector<2x128xf32> -> vector<2x128xf32>
    %580 = arith.addf %578, %579 : vector<2x128xf32>
    %581 = vector.extract_strided_slice %580 {offsets = [0, 0], sizes = [2, 32], strides = [1, 1]} : vector<2x128xf32> to vector<2x32xf32>
    %582 = arith.negf %581 : vector<2x32xf32>
    %583 = math.exp %582 : vector<2x32xf32>
    %cst_134 = arith.constant 1.000000e+00 : f32
    %584 = vector.broadcast %cst_134 : f32 to vector<2x32xf32>
    %585 = arith.addf %584, %583 : vector<2x32xf32>
    %586 = arith.divf %584, %585 : vector<2x32xf32>
    %587 = vector.extract_strided_slice %580 {offsets = [0, 32], sizes = [2, 32], strides = [1, 1]} : vector<2x128xf32> to vector<2x32xf32>
    %588 = arith.negf %587 : vector<2x32xf32>
    %589 = math.exp %588 : vector<2x32xf32>
    %cst_135 = arith.constant 1.000000e+00 : f32
    %590 = vector.broadcast %cst_135 : f32 to vector<2x32xf32>
    %591 = arith.addf %590, %589 : vector<2x32xf32>
    %592 = arith.divf %590, %591 : vector<2x32xf32>
    %593 = vector.extract_strided_slice %580 {offsets = [0, 64], sizes = [2, 32], strides = [1, 1]} : vector<2x128xf32> to vector<2x32xf32>
    %594 = math.tanh %593 : vector<2x32xf32>
    %595 = vector.extract_strided_slice %580 {offsets = [0, 96], sizes = [2, 32], strides = [1, 1]} : vector<2x128xf32> to vector<2x32xf32>
    %596 = arith.negf %595 : vector<2x32xf32>
    %597 = math.exp %596 : vector<2x32xf32>
    %cst_136 = arith.constant 1.000000e+00 : f32
    %598 = vector.broadcast %cst_136 : f32 to vector<2x32xf32>
    %599 = arith.addf %598, %597 : vector<2x32xf32>
    %600 = arith.divf %598, %599 : vector<2x32xf32>
    %601 = arith.mulf %592, %551 : vector<2x32xf32>
    %602 = arith.mulf %586, %594 : vector<2x32xf32>
    %603 = arith.addf %601, %602 : vector<2x32xf32>
    %604 = math.tanh %603 : vector<2x32xf32>
    %605 = arith.mulf %600, %604 : vector<2x32xf32>
    %606 = vector.shape_cast %605 : vector<2x32xf32> to vector<2x1x32xf32>
    "tpu.trace_start"() <{level = 10 : i32, message = "bqh,bsh->bqs"}> : () -> ()
    %cst_137 = arith.constant dense<0.000000e+00> : vector<2x1x8xf32>
    %607 = tpu.matmul %606, %388, %cst_137 {dimension_numbers = #tpu.dot_dimension_numbers<[2], [2], [1], [1], [0, 0, 0, 1, 1, 1], [0], [0]>} : vector<2x1x32xf32>, vector<2x8x32xf32>, vector<2x1x8xf32> -> vector<2x1x8xf32>
    %cst_138 = arith.constant 5.000000e-01 : f32
    "tpu.trace_stop"() : () -> ()
    %608 = vector.broadcast %cst_138 : f32 to vector<2x1x8xf32>
    %609 = arith.cmpf ogt, %420, %608 : vector<2x1x8xf32>
    %cst_139 = arith.constant -1.000000e+09 : f32
    %610 = vector.broadcast %cst_139 : f32 to vector<2x1x8xf32>
    %611 = arith.select %609, %607, %610 : vector<2x1x8xi1>, vector<2x1x8xf32>
    %cst_140 = arith.constant dense<0xFF800000> : vector<2x1xf32>
    %612 = vector.multi_reduction <maximumf>, %611, %cst_140 [2] : vector<2x1x8xf32> to vector<2x1xf32>
    %613 = vector.shape_cast %612 : vector<2x1xf32> to vector<2x1x1xf32>
    %614 = vector.broadcast %613 : vector<2x1x1xf32> to vector<2x1x8xf32>
    %615 = arith.subf %611, %614 : vector<2x1x8xf32>
    %616 = math.exp %615 : vector<2x1x8xf32>
    %cst_141 = arith.constant dense<0.000000e+00> : vector<2x1xf32>
    %617 = vector.multi_reduction <add>, %616, %cst_141 [2] : vector<2x1x8xf32> to vector<2x1xf32>
    %618 = vector.shape_cast %617 : vector<2x1xf32> to vector<2x1x1xf32>
    %619 = tpu.reciprocal %618 {approx = true} : vector<2x1x1xf32> -> vector<2x1x1xf32>
    %620 = vector.broadcast %619 : vector<2x1x1xf32> to vector<2x1x8xf32>
    %621 = arith.mulf %616, %620 : vector<2x1x8xf32>
    "tpu.trace_start"() <{level = 10 : i32, message = "bqs,bsh->bqh"}> : () -> ()
    %cst_142 = arith.constant dense<0.000000e+00> : vector<2x1x32xf32>
    %622 = tpu.matmul %621, %388, %cst_142 {dimension_numbers = #tpu.dot_dimension_numbers<[2], [1], [1], [2], [0, 0, 0, 1, 1, 2], [0], [0]>} : vector<2x1x8xf32>, vector<2x8x32xf32>, vector<2x1x32xf32> -> vector<2x1x32xf32>
    "tpu.trace_stop"() : () -> ()
    %623 = vector.shape_cast %622 : vector<2x1x32xf32> to vector<2x32xf32>
    %624 = tpu.concatenate %605, %623 in 1 : vector<2x32xf32>, vector<2x32xf32> -> vector<2x64xf32>
    %cst_143 = arith.constant dense<0.000000e+00> : vector<2x32xf32>
    %625 = tpu.matmul %624, %2, %cst_143 {dimension_numbers = #tpu.dot_dimension_numbers<[1], [0], [0], [1], [0, 0, 1, 1], [], []>} : vector<2x64xf32>, vector<64x32xf32>, vector<2x32xf32> -> vector<2x32xf32>
    %626 = vector.broadcast %3 : vector<1x32xf32> to vector<2x32xf32>
    %627 = arith.addf %625, %626 : vector<2x32xf32>
    %628 = math.tanh %627 : vector<2x32xf32>
    %629 = vector.extract_strided_slice %41 {offsets = [0, 4, 0], sizes = [2, 1, 128], strides = [1, 1, 1]} : vector<2x8x128xf32> to vector<2x1x128xf32>
    %630 = vector.shape_cast %629 : vector<2x1x128xf32> to vector<2x128xf32>
    %cst_144 = arith.constant dense<0.000000e+00> : vector<2x128xf32>
    %631 = tpu.matmul %605, %1, %cst_144 {dimension_numbers = #tpu.dot_dimension_numbers<[1], [0], [0], [1], [0, 0, 1, 1], [], []>} : vector<2x32xf32>, vector<32x128xf32>, vector<2x128xf32> -> vector<2x128xf32>
    %632 = arith.addf %630, %631 : vector<2x128xf32>
    %633 = vector.extract_strided_slice %632 {offsets = [0, 0], sizes = [2, 32], strides = [1, 1]} : vector<2x128xf32> to vector<2x32xf32>
    %634 = arith.negf %633 : vector<2x32xf32>
    %635 = math.exp %634 : vector<2x32xf32>
    %cst_145 = arith.constant 1.000000e+00 : f32
    %636 = vector.broadcast %cst_145 : f32 to vector<2x32xf32>
    %637 = arith.addf %636, %635 : vector<2x32xf32>
    %638 = arith.divf %636, %637 : vector<2x32xf32>
    %639 = vector.extract_strided_slice %632 {offsets = [0, 32], sizes = [2, 32], strides = [1, 1]} : vector<2x128xf32> to vector<2x32xf32>
    %640 = arith.negf %639 : vector<2x32xf32>
    %641 = math.exp %640 : vector<2x32xf32>
    %cst_146 = arith.constant 1.000000e+00 : f32
    %642 = vector.broadcast %cst_146 : f32 to vector<2x32xf32>
    %643 = arith.addf %642, %641 : vector<2x32xf32>
    %644 = arith.divf %642, %643 : vector<2x32xf32>
    %645 = vector.extract_strided_slice %632 {offsets = [0, 64], sizes = [2, 32], strides = [1, 1]} : vector<2x128xf32> to vector<2x32xf32>
    %646 = math.tanh %645 : vector<2x32xf32>
    %647 = vector.extract_strided_slice %632 {offsets = [0, 96], sizes = [2, 32], strides = [1, 1]} : vector<2x128xf32> to vector<2x32xf32>
    %648 = arith.negf %647 : vector<2x32xf32>
    %649 = math.exp %648 : vector<2x32xf32>
    %cst_147 = arith.constant 1.000000e+00 : f32
    %650 = vector.broadcast %cst_147 : f32 to vector<2x32xf32>
    %651 = arith.addf %650, %649 : vector<2x32xf32>
    %652 = arith.divf %650, %651 : vector<2x32xf32>
    %653 = arith.mulf %644, %603 : vector<2x32xf32>
    %654 = arith.mulf %638, %646 : vector<2x32xf32>
    %655 = arith.addf %653, %654 : vector<2x32xf32>
    %656 = math.tanh %655 : vector<2x32xf32>
    %657 = arith.mulf %652, %656 : vector<2x32xf32>
    %658 = vector.shape_cast %657 : vector<2x32xf32> to vector<2x1x32xf32>
    "tpu.trace_start"() <{level = 10 : i32, message = "bqh,bsh->bqs"}> : () -> ()
    %cst_148 = arith.constant dense<0.000000e+00> : vector<2x1x8xf32>
    %659 = tpu.matmul %658, %388, %cst_148 {dimension_numbers = #tpu.dot_dimension_numbers<[2], [2], [1], [1], [0, 0, 0, 1, 1, 1], [0], [0]>} : vector<2x1x32xf32>, vector<2x8x32xf32>, vector<2x1x8xf32> -> vector<2x1x8xf32>
    %cst_149 = arith.constant 5.000000e-01 : f32
    "tpu.trace_stop"() : () -> ()
    %660 = vector.broadcast %cst_149 : f32 to vector<2x1x8xf32>
    %661 = arith.cmpf ogt, %420, %660 : vector<2x1x8xf32>
    %cst_150 = arith.constant -1.000000e+09 : f32
    %662 = vector.broadcast %cst_150 : f32 to vector<2x1x8xf32>
    %663 = arith.select %661, %659, %662 : vector<2x1x8xi1>, vector<2x1x8xf32>
    %cst_151 = arith.constant dense<0xFF800000> : vector<2x1xf32>
    %664 = vector.multi_reduction <maximumf>, %663, %cst_151 [2] : vector<2x1x8xf32> to vector<2x1xf32>
    %665 = vector.shape_cast %664 : vector<2x1xf32> to vector<2x1x1xf32>
    %666 = vector.broadcast %665 : vector<2x1x1xf32> to vector<2x1x8xf32>
    %667 = arith.subf %663, %666 : vector<2x1x8xf32>
    %668 = math.exp %667 : vector<2x1x8xf32>
    %cst_152 = arith.constant dense<0.000000e+00> : vector<2x1xf32>
    %669 = vector.multi_reduction <add>, %668, %cst_152 [2] : vector<2x1x8xf32> to vector<2x1xf32>
    %670 = vector.shape_cast %669 : vector<2x1xf32> to vector<2x1x1xf32>
    %671 = tpu.reciprocal %670 {approx = true} : vector<2x1x1xf32> -> vector<2x1x1xf32>
    %672 = vector.broadcast %671 : vector<2x1x1xf32> to vector<2x1x8xf32>
    %673 = arith.mulf %668, %672 : vector<2x1x8xf32>
    "tpu.trace_start"() <{level = 10 : i32, message = "bqs,bsh->bqh"}> : () -> ()
    %cst_153 = arith.constant dense<0.000000e+00> : vector<2x1x32xf32>
    %674 = tpu.matmul %673, %388, %cst_153 {dimension_numbers = #tpu.dot_dimension_numbers<[2], [1], [1], [2], [0, 0, 0, 1, 1, 2], [0], [0]>} : vector<2x1x8xf32>, vector<2x8x32xf32>, vector<2x1x32xf32> -> vector<2x1x32xf32>
    "tpu.trace_stop"() : () -> ()
    %675 = vector.shape_cast %674 : vector<2x1x32xf32> to vector<2x32xf32>
    %676 = tpu.concatenate %657, %675 in 1 : vector<2x32xf32>, vector<2x32xf32> -> vector<2x64xf32>
    %cst_154 = arith.constant dense<0.000000e+00> : vector<2x32xf32>
    %677 = tpu.matmul %676, %2, %cst_154 {dimension_numbers = #tpu.dot_dimension_numbers<[1], [0], [0], [1], [0, 0, 1, 1], [], []>} : vector<2x64xf32>, vector<64x32xf32>, vector<2x32xf32> -> vector<2x32xf32>
    %678 = vector.broadcast %3 : vector<1x32xf32> to vector<2x32xf32>
    %679 = arith.addf %677, %678 : vector<2x32xf32>
    %680 = math.tanh %679 : vector<2x32xf32>
    %681 = vector.extract_strided_slice %41 {offsets = [0, 5, 0], sizes = [2, 1, 128], strides = [1, 1, 1]} : vector<2x8x128xf32> to vector<2x1x128xf32>
    %682 = vector.shape_cast %681 : vector<2x1x128xf32> to vector<2x128xf32>
    %cst_155 = arith.constant dense<0.000000e+00> : vector<2x128xf32>
    %683 = tpu.matmul %657, %1, %cst_155 {dimension_numbers = #tpu.dot_dimension_numbers<[1], [0], [0], [1], [0, 0, 1, 1], [], []>} : vector<2x32xf32>, vector<32x128xf32>, vector<2x128xf32> -> vector<2x128xf32>
    %684 = arith.addf %682, %683 : vector<2x128xf32>
    %685 = vector.extract_strided_slice %684 {offsets = [0, 0], sizes = [2, 32], strides = [1, 1]} : vector<2x128xf32> to vector<2x32xf32>
    %686 = arith.negf %685 : vector<2x32xf32>
    %687 = math.exp %686 : vector<2x32xf32>
    %cst_156 = arith.constant 1.000000e+00 : f32
    %688 = vector.broadcast %cst_156 : f32 to vector<2x32xf32>
    %689 = arith.addf %688, %687 : vector<2x32xf32>
    %690 = arith.divf %688, %689 : vector<2x32xf32>
    %691 = vector.extract_strided_slice %684 {offsets = [0, 32], sizes = [2, 32], strides = [1, 1]} : vector<2x128xf32> to vector<2x32xf32>
    %692 = arith.negf %691 : vector<2x32xf32>
    %693 = math.exp %692 : vector<2x32xf32>
    %cst_157 = arith.constant 1.000000e+00 : f32
    %694 = vector.broadcast %cst_157 : f32 to vector<2x32xf32>
    %695 = arith.addf %694, %693 : vector<2x32xf32>
    %696 = arith.divf %694, %695 : vector<2x32xf32>
    %697 = vector.extract_strided_slice %684 {offsets = [0, 64], sizes = [2, 32], strides = [1, 1]} : vector<2x128xf32> to vector<2x32xf32>
    %698 = math.tanh %697 : vector<2x32xf32>
    %699 = vector.extract_strided_slice %684 {offsets = [0, 96], sizes = [2, 32], strides = [1, 1]} : vector<2x128xf32> to vector<2x32xf32>
    %700 = arith.negf %699 : vector<2x32xf32>
    %701 = math.exp %700 : vector<2x32xf32>
    %cst_158 = arith.constant 1.000000e+00 : f32
    %702 = vector.broadcast %cst_158 : f32 to vector<2x32xf32>
    %703 = arith.addf %702, %701 : vector<2x32xf32>
    %704 = arith.divf %702, %703 : vector<2x32xf32>
    %705 = arith.mulf %696, %655 : vector<2x32xf32>
    %706 = arith.mulf %690, %698 : vector<2x32xf32>
    %707 = arith.addf %705, %706 : vector<2x32xf32>
    %708 = math.tanh %707 : vector<2x32xf32>
    %709 = arith.mulf %704, %708 : vector<2x32xf32>
    %710 = vector.shape_cast %709 : vector<2x32xf32> to vector<2x1x32xf32>
    "tpu.trace_start"() <{level = 10 : i32, message = "bqh,bsh->bqs"}> : () -> ()
    %cst_159 = arith.constant dense<0.000000e+00> : vector<2x1x8xf32>
    %711 = tpu.matmul %710, %388, %cst_159 {dimension_numbers = #tpu.dot_dimension_numbers<[2], [2], [1], [1], [0, 0, 0, 1, 1, 1], [0], [0]>} : vector<2x1x32xf32>, vector<2x8x32xf32>, vector<2x1x8xf32> -> vector<2x1x8xf32>
    %cst_160 = arith.constant 5.000000e-01 : f32
    "tpu.trace_stop"() : () -> ()
    %712 = vector.broadcast %cst_160 : f32 to vector<2x1x8xf32>
    %713 = arith.cmpf ogt, %420, %712 : vector<2x1x8xf32>
    %cst_161 = arith.constant -1.000000e+09 : f32
    %714 = vector.broadcast %cst_161 : f32 to vector<2x1x8xf32>
    %715 = arith.select %713, %711, %714 : vector<2x1x8xi1>, vector<2x1x8xf32>
    %cst_162 = arith.constant dense<0xFF800000> : vector<2x1xf32>
    %716 = vector.multi_reduction <maximumf>, %715, %cst_162 [2] : vector<2x1x8xf32> to vector<2x1xf32>
    %717 = vector.shape_cast %716 : vector<2x1xf32> to vector<2x1x1xf32>
    %718 = vector.broadcast %717 : vector<2x1x1xf32> to vector<2x1x8xf32>
    %719 = arith.subf %715, %718 : vector<2x1x8xf32>
    %720 = math.exp %719 : vector<2x1x8xf32>
    %cst_163 = arith.constant dense<0.000000e+00> : vector<2x1xf32>
    %721 = vector.multi_reduction <add>, %720, %cst_163 [2] : vector<2x1x8xf32> to vector<2x1xf32>
    %722 = vector.shape_cast %721 : vector<2x1xf32> to vector<2x1x1xf32>
    %723 = tpu.reciprocal %722 {approx = true} : vector<2x1x1xf32> -> vector<2x1x1xf32>
    %724 = vector.broadcast %723 : vector<2x1x1xf32> to vector<2x1x8xf32>
    %725 = arith.mulf %720, %724 : vector<2x1x8xf32>
    "tpu.trace_start"() <{level = 10 : i32, message = "bqs,bsh->bqh"}> : () -> ()
    %cst_164 = arith.constant dense<0.000000e+00> : vector<2x1x32xf32>
    %726 = tpu.matmul %725, %388, %cst_164 {dimension_numbers = #tpu.dot_dimension_numbers<[2], [1], [1], [2], [0, 0, 0, 1, 1, 2], [0], [0]>} : vector<2x1x8xf32>, vector<2x8x32xf32>, vector<2x1x32xf32> -> vector<2x1x32xf32>
    "tpu.trace_stop"() : () -> ()
    %727 = vector.shape_cast %726 : vector<2x1x32xf32> to vector<2x32xf32>
    %728 = tpu.concatenate %709, %727 in 1 : vector<2x32xf32>, vector<2x32xf32> -> vector<2x64xf32>
    %cst_165 = arith.constant dense<0.000000e+00> : vector<2x32xf32>
    %729 = tpu.matmul %728, %2, %cst_165 {dimension_numbers = #tpu.dot_dimension_numbers<[1], [0], [0], [1], [0, 0, 1, 1], [], []>} : vector<2x64xf32>, vector<64x32xf32>, vector<2x32xf32> -> vector<2x32xf32>
    %730 = vector.broadcast %3 : vector<1x32xf32> to vector<2x32xf32>
    %731 = arith.addf %729, %730 : vector<2x32xf32>
    %732 = math.tanh %731 : vector<2x32xf32>
    %733 = vector.extract_strided_slice %41 {offsets = [0, 6, 0], sizes = [2, 1, 128], strides = [1, 1, 1]} : vector<2x8x128xf32> to vector<2x1x128xf32>
    %734 = vector.shape_cast %733 : vector<2x1x128xf32> to vector<2x128xf32>
    %cst_166 = arith.constant dense<0.000000e+00> : vector<2x128xf32>
    %735 = tpu.matmul %709, %1, %cst_166 {dimension_numbers = #tpu.dot_dimension_numbers<[1], [0], [0], [1], [0, 0, 1, 1], [], []>} : vector<2x32xf32>, vector<32x128xf32>, vector<2x128xf32> -> vector<2x128xf32>
    %736 = arith.addf %734, %735 : vector<2x128xf32>
    %737 = vector.extract_strided_slice %736 {offsets = [0, 0], sizes = [2, 32], strides = [1, 1]} : vector<2x128xf32> to vector<2x32xf32>
    %738 = arith.negf %737 : vector<2x32xf32>
    %739 = math.exp %738 : vector<2x32xf32>
    %cst_167 = arith.constant 1.000000e+00 : f32
    %740 = vector.broadcast %cst_167 : f32 to vector<2x32xf32>
    %741 = arith.addf %740, %739 : vector<2x32xf32>
    %742 = arith.divf %740, %741 : vector<2x32xf32>
    %743 = vector.extract_strided_slice %736 {offsets = [0, 32], sizes = [2, 32], strides = [1, 1]} : vector<2x128xf32> to vector<2x32xf32>
    %744 = arith.negf %743 : vector<2x32xf32>
    %745 = math.exp %744 : vector<2x32xf32>
    %cst_168 = arith.constant 1.000000e+00 : f32
    %746 = vector.broadcast %cst_168 : f32 to vector<2x32xf32>
    %747 = arith.addf %746, %745 : vector<2x32xf32>
    %748 = arith.divf %746, %747 : vector<2x32xf32>
    %749 = vector.extract_strided_slice %736 {offsets = [0, 64], sizes = [2, 32], strides = [1, 1]} : vector<2x128xf32> to vector<2x32xf32>
    %750 = math.tanh %749 : vector<2x32xf32>
    %751 = vector.extract_strided_slice %736 {offsets = [0, 96], sizes = [2, 32], strides = [1, 1]} : vector<2x128xf32> to vector<2x32xf32>
    %752 = arith.negf %751 : vector<2x32xf32>
    %753 = math.exp %752 : vector<2x32xf32>
    %cst_169 = arith.constant 1.000000e+00 : f32
    %754 = vector.broadcast %cst_169 : f32 to vector<2x32xf32>
    %755 = arith.addf %754, %753 : vector<2x32xf32>
    %756 = arith.divf %754, %755 : vector<2x32xf32>
    %757 = arith.mulf %748, %707 : vector<2x32xf32>
    %758 = arith.mulf %742, %750 : vector<2x32xf32>
    %759 = arith.addf %757, %758 : vector<2x32xf32>
    %760 = math.tanh %759 : vector<2x32xf32>
    %761 = arith.mulf %756, %760 : vector<2x32xf32>
    %762 = vector.shape_cast %761 : vector<2x32xf32> to vector<2x1x32xf32>
    "tpu.trace_start"() <{level = 10 : i32, message = "bqh,bsh->bqs"}> : () -> ()
    %cst_170 = arith.constant dense<0.000000e+00> : vector<2x1x8xf32>
    %763 = tpu.matmul %762, %388, %cst_170 {dimension_numbers = #tpu.dot_dimension_numbers<[2], [2], [1], [1], [0, 0, 0, 1, 1, 1], [0], [0]>} : vector<2x1x32xf32>, vector<2x8x32xf32>, vector<2x1x8xf32> -> vector<2x1x8xf32>
    %cst_171 = arith.constant 5.000000e-01 : f32
    "tpu.trace_stop"() : () -> ()
    %764 = vector.broadcast %cst_171 : f32 to vector<2x1x8xf32>
    %765 = arith.cmpf ogt, %420, %764 : vector<2x1x8xf32>
    %cst_172 = arith.constant -1.000000e+09 : f32
    %766 = vector.broadcast %cst_172 : f32 to vector<2x1x8xf32>
    %767 = arith.select %765, %763, %766 : vector<2x1x8xi1>, vector<2x1x8xf32>
    %cst_173 = arith.constant dense<0xFF800000> : vector<2x1xf32>
    %768 = vector.multi_reduction <maximumf>, %767, %cst_173 [2] : vector<2x1x8xf32> to vector<2x1xf32>
    %769 = vector.shape_cast %768 : vector<2x1xf32> to vector<2x1x1xf32>
    %770 = vector.broadcast %769 : vector<2x1x1xf32> to vector<2x1x8xf32>
    %771 = arith.subf %767, %770 : vector<2x1x8xf32>
    %772 = math.exp %771 : vector<2x1x8xf32>
    %cst_174 = arith.constant dense<0.000000e+00> : vector<2x1xf32>
    %773 = vector.multi_reduction <add>, %772, %cst_174 [2] : vector<2x1x8xf32> to vector<2x1xf32>
    %774 = vector.shape_cast %773 : vector<2x1xf32> to vector<2x1x1xf32>
    %775 = tpu.reciprocal %774 {approx = true} : vector<2x1x1xf32> -> vector<2x1x1xf32>
    %776 = vector.broadcast %775 : vector<2x1x1xf32> to vector<2x1x8xf32>
    %777 = arith.mulf %772, %776 : vector<2x1x8xf32>
    "tpu.trace_start"() <{level = 10 : i32, message = "bqs,bsh->bqh"}> : () -> ()
    %cst_175 = arith.constant dense<0.000000e+00> : vector<2x1x32xf32>
    %778 = tpu.matmul %777, %388, %cst_175 {dimension_numbers = #tpu.dot_dimension_numbers<[2], [1], [1], [2], [0, 0, 0, 1, 1, 2], [0], [0]>} : vector<2x1x8xf32>, vector<2x8x32xf32>, vector<2x1x32xf32> -> vector<2x1x32xf32>
    "tpu.trace_stop"() : () -> ()
    %779 = vector.shape_cast %778 : vector<2x1x32xf32> to vector<2x32xf32>
    %780 = tpu.concatenate %761, %779 in 1 : vector<2x32xf32>, vector<2x32xf32> -> vector<2x64xf32>
    %cst_176 = arith.constant dense<0.000000e+00> : vector<2x32xf32>
    %781 = tpu.matmul %780, %2, %cst_176 {dimension_numbers = #tpu.dot_dimension_numbers<[1], [0], [0], [1], [0, 0, 1, 1], [], []>} : vector<2x64xf32>, vector<64x32xf32>, vector<2x32xf32> -> vector<2x32xf32>
    %782 = vector.broadcast %3 : vector<1x32xf32> to vector<2x32xf32>
    %783 = arith.addf %781, %782 : vector<2x32xf32>
    %784 = math.tanh %783 : vector<2x32xf32>
    %785 = vector.extract_strided_slice %41 {offsets = [0, 7, 0], sizes = [2, 1, 128], strides = [1, 1, 1]} : vector<2x8x128xf32> to vector<2x1x128xf32>
    %786 = vector.shape_cast %785 : vector<2x1x128xf32> to vector<2x128xf32>
    %cst_177 = arith.constant dense<0.000000e+00> : vector<2x128xf32>
    %787 = tpu.matmul %761, %1, %cst_177 {dimension_numbers = #tpu.dot_dimension_numbers<[1], [0], [0], [1], [0, 0, 1, 1], [], []>} : vector<2x32xf32>, vector<32x128xf32>, vector<2x128xf32> -> vector<2x128xf32>
    %788 = arith.addf %786, %787 : vector<2x128xf32>
    %789 = vector.extract_strided_slice %788 {offsets = [0, 0], sizes = [2, 32], strides = [1, 1]} : vector<2x128xf32> to vector<2x32xf32>
    %790 = arith.negf %789 : vector<2x32xf32>
    %791 = math.exp %790 : vector<2x32xf32>
    %cst_178 = arith.constant 1.000000e+00 : f32
    %792 = vector.broadcast %cst_178 : f32 to vector<2x32xf32>
    %793 = arith.addf %792, %791 : vector<2x32xf32>
    %794 = arith.divf %792, %793 : vector<2x32xf32>
    %795 = vector.extract_strided_slice %788 {offsets = [0, 32], sizes = [2, 32], strides = [1, 1]} : vector<2x128xf32> to vector<2x32xf32>
    %796 = arith.negf %795 : vector<2x32xf32>
    %797 = math.exp %796 : vector<2x32xf32>
    %cst_179 = arith.constant 1.000000e+00 : f32
    %798 = vector.broadcast %cst_179 : f32 to vector<2x32xf32>
    %799 = arith.addf %798, %797 : vector<2x32xf32>
    %800 = arith.divf %798, %799 : vector<2x32xf32>
    %801 = vector.extract_strided_slice %788 {offsets = [0, 64], sizes = [2, 32], strides = [1, 1]} : vector<2x128xf32> to vector<2x32xf32>
    %802 = math.tanh %801 : vector<2x32xf32>
    %803 = vector.extract_strided_slice %788 {offsets = [0, 96], sizes = [2, 32], strides = [1, 1]} : vector<2x128xf32> to vector<2x32xf32>
    %804 = arith.negf %803 : vector<2x32xf32>
    %805 = math.exp %804 : vector<2x32xf32>
    %cst_180 = arith.constant 1.000000e+00 : f32
    %806 = vector.broadcast %cst_180 : f32 to vector<2x32xf32>
    %807 = arith.addf %806, %805 : vector<2x32xf32>
    %808 = arith.divf %806, %807 : vector<2x32xf32>
    %809 = arith.mulf %800, %759 : vector<2x32xf32>
    %810 = arith.mulf %794, %802 : vector<2x32xf32>
    %811 = arith.addf %809, %810 : vector<2x32xf32>
    %812 = math.tanh %811 : vector<2x32xf32>
    %813 = arith.mulf %808, %812 : vector<2x32xf32>
    %814 = vector.shape_cast %813 : vector<2x32xf32> to vector<2x1x32xf32>
    "tpu.trace_start"() <{level = 10 : i32, message = "bqh,bsh->bqs"}> : () -> ()
    %cst_181 = arith.constant dense<0.000000e+00> : vector<2x1x8xf32>
    %815 = tpu.matmul %814, %388, %cst_181 {dimension_numbers = #tpu.dot_dimension_numbers<[2], [2], [1], [1], [0, 0, 0, 1, 1, 1], [0], [0]>} : vector<2x1x32xf32>, vector<2x8x32xf32>, vector<2x1x8xf32> -> vector<2x1x8xf32>
    %cst_182 = arith.constant 5.000000e-01 : f32
    "tpu.trace_stop"() : () -> ()
    %816 = vector.broadcast %cst_182 : f32 to vector<2x1x8xf32>
    %817 = arith.cmpf ogt, %420, %816 : vector<2x1x8xf32>
    %cst_183 = arith.constant -1.000000e+09 : f32
    %818 = vector.broadcast %cst_183 : f32 to vector<2x1x8xf32>
    %819 = arith.select %817, %815, %818 : vector<2x1x8xi1>, vector<2x1x8xf32>
    %cst_184 = arith.constant dense<0xFF800000> : vector<2x1xf32>
    %820 = vector.multi_reduction <maximumf>, %819, %cst_184 [2] : vector<2x1x8xf32> to vector<2x1xf32>
    %821 = vector.shape_cast %820 : vector<2x1xf32> to vector<2x1x1xf32>
    %822 = vector.broadcast %821 : vector<2x1x1xf32> to vector<2x1x8xf32>
    %823 = arith.subf %819, %822 : vector<2x1x8xf32>
    %824 = math.exp %823 : vector<2x1x8xf32>
    %cst_185 = arith.constant dense<0.000000e+00> : vector<2x1xf32>
    %825 = vector.multi_reduction <add>, %824, %cst_185 [2] : vector<2x1x8xf32> to vector<2x1xf32>
    %826 = vector.shape_cast %825 : vector<2x1xf32> to vector<2x1x1xf32>
    %827 = tpu.reciprocal %826 {approx = true} : vector<2x1x1xf32> -> vector<2x1x1xf32>
    %828 = vector.broadcast %827 : vector<2x1x1xf32> to vector<2x1x8xf32>
    %829 = arith.mulf %824, %828 : vector<2x1x8xf32>
    "tpu.trace_start"() <{level = 10 : i32, message = "bqs,bsh->bqh"}> : () -> ()
    %cst_186 = arith.constant dense<0.000000e+00> : vector<2x1x32xf32>
    %830 = tpu.matmul %829, %388, %cst_186 {dimension_numbers = #tpu.dot_dimension_numbers<[2], [1], [1], [2], [0, 0, 0, 1, 1, 2], [0], [0]>} : vector<2x1x8xf32>, vector<2x8x32xf32>, vector<2x1x32xf32> -> vector<2x1x32xf32>
    "tpu.trace_stop"() : () -> ()
    %831 = vector.shape_cast %830 : vector<2x1x32xf32> to vector<2x32xf32>
    %832 = tpu.concatenate %813, %831 in 1 : vector<2x32xf32>, vector<2x32xf32> -> vector<2x64xf32>
    %cst_187 = arith.constant dense<0.000000e+00> : vector<2x32xf32>
    %833 = tpu.matmul %832, %2, %cst_187 {dimension_numbers = #tpu.dot_dimension_numbers<[1], [0], [0], [1], [0, 0, 1, 1], [], []>} : vector<2x64xf32>, vector<64x32xf32>, vector<2x32xf32> -> vector<2x32xf32>
    %834 = vector.broadcast %3 : vector<1x32xf32> to vector<2x32xf32>
    %835 = arith.addf %833, %834 : vector<2x32xf32>
    %836 = math.tanh %835 : vector<2x32xf32>
    %837 = vector.shape_cast %472 : vector<2x32xf32> to vector<2x1x32xf32>
    %838 = vector.shape_cast %524 : vector<2x32xf32> to vector<2x1x32xf32>
    %839 = vector.shape_cast %576 : vector<2x32xf32> to vector<2x1x32xf32>
    %840 = vector.shape_cast %628 : vector<2x32xf32> to vector<2x1x32xf32>
    %841 = vector.shape_cast %680 : vector<2x32xf32> to vector<2x1x32xf32>
    %842 = vector.shape_cast %732 : vector<2x32xf32> to vector<2x1x32xf32>
    %843 = vector.shape_cast %784 : vector<2x32xf32> to vector<2x1x32xf32>
    %844 = vector.shape_cast %836 : vector<2x32xf32> to vector<2x1x32xf32>
    %845 = tpu.concatenate %837, %838, %839, %840, %841, %842, %843, %844 in 1 : vector<2x1x32xf32>, vector<2x1x32xf32>, vector<2x1x32xf32>, vector<2x1x32xf32>, vector<2x1x32xf32>, vector<2x1x32xf32>, vector<2x1x32xf32>, vector<2x1x32xf32> -> vector<2x8x32xf32>
    %846 = vector.shape_cast %845 : vector<2x8x32xf32> to vector<16x32xf32>
    %cst_188 = arith.constant dense<0.000000e+00> : vector<16x16xf32>
    %847 = tpu.matmul %846, %4, %cst_188 {dimension_numbers = #tpu.dot_dimension_numbers<[1], [0], [0], [1], [0, 0, 1, 1], [], []>} : vector<16x32xf32>, vector<32x16xf32>, vector<16x16xf32> -> vector<16x16xf32>
    %848 = vector.broadcast %5 : vector<1x16xf32> to vector<16x16xf32>
    %849 = arith.addf %847, %848 : vector<16x16xf32>
    %cst_189 = arith.constant dense<0xFF800000> : vector<16xf32>
    %850 = vector.multi_reduction <maximumf>, %849, %cst_189 [1] : vector<16x16xf32> to vector<16xf32>
    %851 = vector.shape_cast %850 : vector<16xf32> to vector<16x1xf32>
    %852 = vector.broadcast %851 : vector<16x1xf32> to vector<16x16xf32>
    %853 = arith.subf %849, %852 : vector<16x16xf32>
    %854 = math.exp %853 : vector<16x16xf32>
    %cst_190 = arith.constant dense<0.000000e+00> : vector<16xf32>
    %855 = vector.multi_reduction <add>, %854, %cst_190 [1] : vector<16x16xf32> to vector<16xf32>
    %856 = vector.shape_cast %855 : vector<16xf32> to vector<16x1xf32>
    %857 = math.log %856 : vector<16x1xf32>
    %858 = arith.addf %857, %851 : vector<16x1xf32>
    %859 = vector.broadcast %858 : vector<16x1xf32> to vector<16x16xf32>
    %860 = arith.subf %849, %859 : vector<16x16xf32>
    %861 = vector.shape_cast %860 : vector<16x16xf32> to vector<2x8x16xf32>
    %c0_191 = arith.constant 0 : index
    %c0_192 = arith.constant 0 : index
    %c0_193 = arith.constant 0 : index
    %862 = vector.load %arg20[%c0_191, %c0_192, %c0_193] : memref<2x8x16xf32, #tpu.memory_space<vmem>>, vector<2x8x16xf32>
    tpu.vector_store %arg20[%c0_191, %c0_192, %c0_193], %861 {strides = array<i32>} : memref<2x8x16xf32, #tpu.memory_space<vmem>>, vector<2x8x16xf32>,
    return
  }
}

</mosaic_0001>

<bundles_post_ra>
// kernel: tpu_custom_call.1
= control target key start
LH: loop header
LB: loop body
LE: loop exit
PB: predicated region body
PF: predicated region fallthrough
CT: control target
= control target key end

     0   :  { %s10413_s0 = inlined_call_operand.hbm [shape: s32[2,8], index: 0, kind: input, shape index: {}]   ;;  %s10414_s1 = inlined_call_operand.hbm [shape: f32[16,32], index: 1, kind: input, shape index: {}]   ;;  %s10415_s2 = inlined_call_operand.hbm [shape: f32[16,32], index: 2, kind: input, shape index: {}]   ;;  %s10416_s3 = inlined_call_operand.vmem [shape: f32[32,128], index: 3, kind: input, shape index: {}]   ;;  %s10417_s4 = inlined_call_operand.vmem [shape: f32[32,128], index: 4, kind: input, shape index: {}]   ;;  %s10418_s5 = inlined_call_operand.vmem [shape: f32[1,128], index: 5, kind: input, shape index: {}]   ;;  %s10419_s6 = inlined_call_operand.vmem [shape: f32[32,32], index: 6, kind: input, shape index: {}]   ;;  %s10420_s7 = inlined_call_operand.hbm [shape: f32[1,32], index: 7, kind: input, shape index: {}]   ;;  %s10421_s8 = inlined_call_operand.vmem [shape: f32[32,32], index: 8, kind: input, shape index: {}]   ;;  %s10422_s9 = inlined_call_operand.hbm [shape: f32[1,32], index: 9, kind: input, shape index: {}]   ;;  %s10423_s10 = inlined_call_operand.vmem [shape: f32[32,1], index: 10, kind: input, shape index: {}]   ;;  %s10424_s11 = inlined_call_operand.<no memory space> [shape: f32[1,1], index: 11, kind: input, shape index: {}]   ;;  %s10425_s12 = inlined_call_operand.vmem [shape: f32[32,128], index: 12, kind: input, shape index: {}]   ;;  %s10426_s13 = inlined_call_operand.vmem [shape: f32[32,128], index: 13, kind: input, shape index: {}]   ;;  %s10427_s14 = inlined_call_operand.hbm [shape: f32[1,128], index: 14, kind: input, shape index: {}]   ;;  %s10428_s15 = inlined_call_operand.vmem [shape: f32[64,32], index: 15, kind: input, shape index: {}]   ;;  %s10429_s16 = inlined_call_operand.hbm [shape: f32[1,32], index: 16, kind: input, shape index: {}]   ;;  %s10430_s17 = inlined_call_operand.vmem [shape: f32[32,16], index: 17, kind: input, shape index: {}]   ;;  %s10431_s18 = inlined_call_operand.vmem [shape: f32[1,16], index: 18, kind: input, shape index: {}]   ;;  %s10432_s19 = inlined_call_operand.vmem [shape: f32[2,1], index: 19, kind: output, shape index: {0}]   ;;  %s10433_s20 = inlined_call_operand.hbm [shape: f32[2,8,16], index: 20, kind: output, shape index: {1}]  }
   0x1   :  { %10445 = sst [smem:[#allocation21_spill]] %s10413_s0  ;;  %v26_v0 = vstv %s10424_s11 }
   0x2   :  { %10446 = sst [smem:[#allocation22_spill]] %s10414_s1  ;;  %27 = vst [vmem:[#allocation2] sm:$0x1] %v26_v0 }
   0x3   :  { %10447 = sst [smem:[#allocation23_spill]] %s10415_s2 }
   0x4   :  { %10448 = sst [smem:[#allocation24_spill]] %s10416_s3 }
   0x5   :  { %10449 = sst [smem:[#allocation25_spill]] %s10417_s4 }
   0x6   :  { %10450 = sst [smem:[#allocation26_spill]] %s10433_s20 }
   0x7   :  { %28 = vsyncpa [#allocation4], 0 }
   0x8   :  { %29 = vsyncpa [#allocation7], 0 }
   0x9   :  { %30 = vsyncpa [#allocation10], 0 }
   0xa   :  { %31 = vsyncpa [#allocation13], 0 }
   0xb   :  { %32 = vsyncpa [#allocation5], 0  ;;  %s8821_s23 = smov [#allocation6]   ;;  %s10451_s3 = sld [smem:[#allocation22_spill]] }
   0xc   :  { %s48_s24 = sshll.u32 %s8821_s23, 4  ;;  %s49_s24 = int_to_ptr.vmem [resolvable:$true] %s48_s24 }
  0x11   :  { %s8635_s26 = scalar_lea.hbm %s10451_s3, 256 }
  0x12   :  { %p8636_p0 = scmp.ne.s32.totalorder %s10451_s3, %s8635_s26  ;;  %p8639_p1 = scmp.lt.u32.totalorder %s8635_s26, %s10451_s3 }
  0x14   :  { %p8641_p2 = pnand %p8639_p1, %p8636_p0 }
  0x16   :  { %8644 = shalt.err (!%p8641_p2)
}
  0x17   :  { %s8645_s11 = scalar_lea.vmem %s49_s24, 256  ;;  %p8650_p4 = scmp.lt.s32.totalorder %s49_s24, %s49_s24 }
  0x18   :  { %p8646_p3 = scmp.ne.s32.totalorder %s49_s24, %s8645_s11  ;;  %p8651_p5 = scmp.lt.s32.totalorder %s8645_s11, %s8645_s11 }
  0x1a   :  { %p8652_p6 = por %p8651_p5, %p8650_p4 }
  0x1c   :  { %p8653_p7 = pnand %p8652_p6, %p8646_p3 }
  0x1e   :  { %8656 = shalt.err (!%p8653_p7)
}
  0x1f   :  { %s8822_s30 = smov 128   ;;  %s8823_s0 = smov 8  }
  0x20   :  { %54 = dma.hbm_to_vmem [thread:$0]  %s10451_s3, 256, %s49_s24, [#allocation7], %s8822_s30, %s8822_s30, %s8823_s0  }
  0x21   :  { %s8824_s22 = smov [#allocation9]   ;;  %s8825_s2 = smov [#allocation12]  }
  0x22   :  { %s81_s23 = sshll.u32 %s8824_s22, 4  ;;  %s111_s25 = sshll.u32 %s8825_s2, 4  ;;  %s82_s23 = int_to_ptr.vmem [resolvable:$true] %s81_s23  ;;  %s112_s25 = int_to_ptr.vmem [resolvable:$true] %s111_s25 }
  0x23   :  { %s8657_s28 = scalar_lea.hbm %s10420_s7, 16 }
  0x24   :  { %p8658_p8 = scmp.ne.s32.totalorder %s10420_s7, %s8657_s28  ;;  %p8661_p9 = scmp.lt.u32.totalorder %s8657_s28, %s10420_s7 }
  0x26   :  { %p8663_p10 = pnand %p8661_p9, %p8658_p8 }
  0x28   :  { %8666 = shalt.err (!%p8663_p10)
}
  0x29   :  { %s8667_s24 = scalar_lea.vmem %s82_s23, 16  ;;  %s8671_s3 = scalar_lea.vmem %s82_s23, 32 }
  0x2a   :  { %p8668_p11 = scmp.ne.s32.totalorder %s82_s23, %s8667_s24  ;;  %p8672_p12 = scmp.lt.s32.totalorder %s82_s23, %s82_s23 }
  0x2b   :  { %p8673_p13 = scmp.lt.s32.totalorder %s8671_s3, %s8667_s24 }
  0x2d   :  { %p8674_p0 = por %p8673_p13, %p8672_p12 }
  0x2f   :  { %p8675_p1 = pnand %p8674_p0, %p8668_p11 }
  0x31   :  { %8678 = shalt.err (!%p8675_p1)
}
  0x32   :  { %84 = dma.hbm_to_vmem [thread:$0]  %s10420_s7, 16, %s82_s23, [#allocation10]  }
  0x33   :  { %s8679_s20 = scalar_lea.hbm %s10427_s14, 16 }
  0x34   :  { %p8680_p2 = scmp.ne.s32.totalorder %s10427_s14, %s8679_s20  ;;  %p8683_p3 = scmp.lt.u32.totalorder %s8679_s20, %s10427_s14 }
  0x36   :  { %p8685_p4 = pnand %p8683_p3, %p8680_p2 }
  0x38   :  { %8688 = shalt.err (!%p8685_p4)
}
  0x39   :  { %s8689_s29 = scalar_lea.vmem %s112_s25, 16  ;;  %s8693_s11 = scalar_lea.vmem %s112_s25, 32 }
  0x3a   :  { %p8690_p5 = scmp.ne.s32.totalorder %s112_s25, %s8689_s29  ;;  %p8694_p6 = scmp.lt.s32.totalorder %s112_s25, %s112_s25 }
  0x3b   :  { %p8695_p7 = scmp.lt.s32.totalorder %s8693_s11, %s8689_s29 }
  0x3d   :  { %p8696_p8 = por %p8695_p7, %p8694_p6 }
  0x3f   :  { %p8697_p9 = pnand %p8696_p8, %p8690_p5 }
  0x41   :  { %8700 = shalt.err (!%p8697_p9)
}
  0x42   :  { %114 = dma.hbm_to_vmem [thread:$0]  %s10427_s14, 16, %s112_s25, [#allocation13]  }
  0x43   :  { %s8826_s24 = smov [#allocation3]   ;;  %s8827_s21 = smov [#allocation8]  }
  0x44   :  { %s39_s3 = sshll.u32 %s8826_s24, 4  ;;  %s60_s1 = sshll.u32 %s8827_s21, 4  ;;  %s40_s3 = int_to_ptr.vmem [resolvable:$true] %s39_s3  ;;  %s61_s1 = int_to_ptr.vmem [resolvable:$true] %s60_s1 }
  0x45   :  { %s10452_s20 = sld [smem:[#allocation21_spill]] }
  0x4b   :  { %s8701_s26 = scalar_lea.hbm %s10452_s20, 32 }
  0x4c   :  { %p8702_p10 = scmp.ne.s32.totalorder %s10452_s20, %s8701_s26  ;;  %p8705_p11 = scmp.lt.u32.totalorder %s8701_s26, %s10452_s20 }
  0x4e   :  { %p8707_p12 = pnand %p8705_p11, %p8702_p10 }
  0x50   :  { %8710 = shalt.err (!%p8707_p12)
}
  0x51   :  { %s8711_s14 = scalar_lea.vmem %s40_s3, 32  ;;  %p8716_p0 = scmp.lt.s32.totalorder %s40_s3, %s40_s3 }
  0x52   :  { %p8712_p13 = scmp.ne.s32.totalorder %s40_s3, %s8711_s14  ;;  %p8717_p1 = scmp.lt.s32.totalorder %s8711_s14, %s8711_s14 }
  0x54   :  { %p8718_p2 = por %p8717_p1, %p8716_p0 }
  0x56   :  { %p8719_p3 = pnand %p8718_p2, %p8712_p13 }
  0x58   :  { %8722 = shalt.err (!%p8719_p3)
}
  0x59   :  { %42 = dma.hbm_to_vmem [thread:$0]  %s10452_s20, 32, %s40_s3, [#allocation4]  }
  0x5a   :  { %s10453_s24 = sld [smem:[#allocation23_spill]] }
  0x60   :  { %s8723_s21 = scalar_lea.hbm %s10453_s24, 256 }
  0x61   :  { %p8724_p4 = scmp.ne.s32.totalorder %s10453_s24, %s8723_s21  ;;  %p8727_p5 = scmp.lt.u32.totalorder %s8723_s21, %s10453_s24 }
  0x63   :  { %p8729_p6 = pnand %p8727_p5, %p8724_p4 }
  0x65   :  { %8732 = shalt.err (!%p8729_p6)
}
  0x66   :  { %s8733_s28 = scalar_lea.vmem %s61_s1, 256  ;;  %p8738_p8 = scmp.lt.s32.totalorder %s61_s1, %s61_s1 }
  0x67   :  { %p8734_p7 = scmp.ne.s32.totalorder %s61_s1, %s8733_s28  ;;  %p8739_p9 = scmp.lt.s32.totalorder %s8733_s28, %s8733_s28 }
  0x69   :  { %p8740_p10 = por %p8739_p9, %p8738_p8 }
  0x6b   :  { %p8741_p11 = pnand %p8740_p10, %p8734_p7 }
  0x6d   :  { %8744 = shalt.err (!%p8741_p11)
}
  0x6e   :  { %66 = dma.hbm_to_vmem [thread:$0]  %s10453_s24, 256, %s61_s1, [#allocation7], %s8822_s30, %s8822_s30, %s8823_s0  }
  0x6f   :  { %s8828_s4 = smov [#allocation11]   ;;  %s8829_s14 = smov [#allocation14]  }
  0x70   :  { %s93_s29 = sshll.u32 %s8828_s4, 4  ;;  %s123_s25 = sshll.u32 %s8829_s14, 4  ;;  %s94_s29 = int_to_ptr.vmem [resolvable:$true] %s93_s29  ;;  %s124_s25 = int_to_ptr.vmem [resolvable:$true] %s123_s25 }
  0x71   :  { %s8745_s23 = scalar_lea.hbm %s10422_s9, 16 }
  0x72   :  { %p8746_p12 = scmp.ne.s32.totalorder %s10422_s9, %s8745_s23  ;;  %p8749_p13 = scmp.lt.u32.totalorder %s8745_s23, %s10422_s9 }
  0x74   :  { %p8751_p0 = pnand %p8749_p13, %p8746_p12 }
  0x76   :  { %8754 = shalt.err (!%p8751_p0)
}
  0x77   :  { %s8755_s1 = scalar_lea.vmem %s94_s29, 16  ;;  %s8759_s24 = scalar_lea.vmem %s94_s29, 32 }
  0x78   :  { %p8756_p1 = scmp.ne.s32.totalorder %s94_s29, %s8755_s1  ;;  %p8760_p2 = scmp.lt.s32.totalorder %s94_s29, %s94_s29 }
  0x79   :  { %p8761_p3 = scmp.lt.s32.totalorder %s8759_s24, %s8755_s1 }
  0x7b   :  { %p8762_p4 = por %p8761_p3, %p8760_p2 }
  0x7d   :  { %p8763_p5 = pnand %p8762_p4, %p8756_p1 }
  0x7f   :  { %8766 = shalt.err (!%p8763_p5)
}
  0x80   :  { %96 = dma.hbm_to_vmem [thread:$0]  %s10422_s9, 16, %s94_s29, [#allocation10]  }
  0x81   :  { %s8767_s4 = scalar_lea.hbm %s10429_s16, 16 }
  0x82   :  { %p8768_p6 = scmp.ne.s32.totalorder %s10429_s16, %s8767_s4  ;;  %p8771_p7 = scmp.lt.u32.totalorder %s8767_s4, %s10429_s16 }
  0x84   :  { %p8773_p8 = pnand %p8771_p7, %p8768_p6 }
  0x86   :  { %8776 = shalt.err (!%p8773_p8)
}
  0x87   :  { %s8777_s21 = scalar_lea.vmem %s124_s25, 16  ;;  %s8781_s22 = scalar_lea.vmem %s124_s25, 32 }
  0x88   :  { %p8778_p9 = scmp.ne.s32.totalorder %s124_s25, %s8777_s21  ;;  %p8782_p10 = scmp.lt.s32.totalorder %s124_s25, %s124_s25 }
  0x89   :  { %p8783_p11 = scmp.lt.s32.totalorder %s8781_s22, %s8777_s21 }
  0x8b   :  { %p8784_p12 = por %p8783_p11, %p8782_p10 }
  0x8d   :  { %p8785_p13 = pnand %p8784_p12, %p8778_p9 }
  0x8f   :  { %8788 = shalt.err (!%p8785_p13)
}
  0x90   :  { %126 = dma.hbm_to_vmem [thread:$0]  %s10429_s16, 16, %s124_s25, [#allocation13]  }
  0x91   :  { %8811 = dma.done.wait [#allocation4], 32  }
  0x92   :  { %8812 = vsyncadd [#allocation4], 4294967264 }
  0x93   :  { %8813 = dma.done.wait [#allocation7], 512  }
  0x94   :  { %8814 = vsyncadd [#allocation7], 4294966784 }
  0x95   :  { %8815 = dma.done.wait [#allocation10], 32  }
  0x96   :  { %8816 = vsyncadd [#allocation10], 4294967264 }
  0x97   :  { %8817 = dma.done.wait [#allocation13], 32  }
  0x98   :  { %8818 = vsyncadd [#allocation13], 4294967264  ;;  %v178_v1 = vlaneseq  ;;  %v9050_v5 = vld [vmem:[#allocation3] sm:$0x3]  ;;  %v212_v6 = vld [vmem:[#allocation6] sm:$0xff]  ;;  %s10454_s2 = sld [smem:[#allocation24_spill]] }
  0x99   :  { %v213_v7 = vld [vmem:[#allocation6 + $0x8] sm:$0xff]  ;;  %v294_v10 = vld [vmem:[#allocation8] sm:$0xff]  ;;  %v295_v11 = vld [vmem:[#allocation8 + $0x8] sm:$0xff]  ;;  %vm10440_vm0 = vcmask 130048   ;;  %v8830_v22 = vmov 0.0   ;;  %vm209_vm3 = vcmask 1040384  }
  0x9a   :  { %v9044_v2 = vshrl.u32 %v178_v1, 7  ;;  %v7998_v9 = vpack.c.bf16 %v213_v7, %v212_v6  ;;  %v8002_v13 = vpack.c.bf16 %v295_v11, %v294_v10  ;;  %v179_v20 = vand.u32 127, %v178_v1  ;;  %v470_v24 = vld [vmem:[%s10425_s12] sm:$0xff]  ;;  %v471_v25 = vld [vmem:[%s10425_s12 + $0x8] sm:$0xff]  ;;  %v472_v34 = vld [vmem:[%s10425_s12 + $0x10] sm:$0xff]  ;;  %s10455_s16 = sld [smem:[#allocation25_spill]] }
  0x9b   :  { %v8014_v29 = vpack.c.bf16 %v471_v25, %v470_v24  ;;  %v473_v35 = vld [vmem:[%s10425_s12 + $0x18] sm:$0xff]  ;;  %v8831_v37 = vmov 0.0|0.0   ;;  %vm388_vm5 = vcmask 261120   ;;  %vm8832_vm6 = vmmov 0   ;;  %v7056_v50 = vld [vmem:[#allocation12] ss:$0 sm:$0xff] }
  0x9c   :  { %v9047_v3 = vsub.s32 0, %v9044_v2  ;;  %v189_v4 = vsub.s32 1, %v9044_v2  ;;  %7999 = vmatprep.subr.bf16.mxu1 %v7998_v9  ;;  %vm200_vm2 = vcmp.eq.s32.totalorder %v179_v20, 1  ;;  %v8018_v36 = vpack.c.bf16 %v473_v35, %v472_v34  ;;  %v7053_v53 = vld [vmem:[%s10418_s5] ss:$0 sm:$0xff]  ;;  %s8833_s3 = smov 64  }
  0x9d   :  { %8001 = vmatpush3.bf16.msra.mxu1 %v7998_v9  ;;  %v7048_v28 = vsel %vm200_vm2, 1.0, %v8830_v22  ;;  %s8834_s5 = smov 32   ;;  %vm698_vm7 = vcmask 1041409   ;;  %vm175_vm8 = vcmp.ne.s32.totalorder %v9050_v5, 0  ;;  %s8836_s20 = smov 96   ;;  %vm1912_vm2 = vcmask 58368  }
  0x9e   :  { %v183_v8 = vrot.slane %v9050_v5, %v9047_v3  ;;  %v377_v12 = vld [vmem:[%s10454_s2] sm:$0xff]  ;;  %v378_v14 = vld [vmem:[%s10454_s2 + $0x8] sm:$0xff]  ;;  %v379_v15 = vld [vmem:[%s10454_s2 + $0x10] sm:$0xff]  ;;  %v190_v17 = vrot.slane %v9050_v5, %v189_v4  ;;  %8003 = vmatprep.subr.bf16.mxu1 %v8002_v13  ;;  %v9150_v25 = vsel %vm175_vm8, 1.0, %v8830_v22  ;;  %vm1897_vm8 = vcmask 1042432  }
  0x9f   :  { %v380_v16 = vld [vmem:[%s10454_s2 + $0x18] sm:$0xff]  ;;  %v8006_v18 = vpack.c.bf16 %v378_v14, %v377_v12  ;;  %vm689_vm9 = vcmp.gt.f32.partialorder %v9150_v25, 0.5 }
  0xa0   :  { %185 = vbcast.lane.b32.xlu0 %v183_v8, 256  ;;  %v8010_v19 = vpack.c.bf16 %v380_v16, %v379_v15  ;;  %v152_v38 = vld [vmem:[%s10455_s16] sm:$0xff]  ;;  %v153_v39 = vld [vmem:[%s10455_s16 + $0x8] sm:$0xff]  ;;  %v154_v43 = vld [vmem:[%s10455_s16 + $0x10] sm:$0xff]  ;;  %v8835_v15 = vmov 0  }
  0xa1   :  { %8007 = vmatprep.subr.bf16.mxu0 %v8006_v18  ;;  %v9096_v41 = vpack.c.bf16 %v153_v39, %v152_v38  ;;  %v155_v44 = vld [vmem:[%s10455_s16 + $0x18] sm:$0xff]  ;;  %8265 = vset.pattern.permute.xlu0 %v8835_v15 }
  0xa2   :  { %8009 = vmatpush3.bf16.msra.mxu0 %v8006_v18  ;;  %v9107_v46 = vpack.c.bf16 %v155_v44, %v154_v43 }
  0xa3   :  { %8011 = vmatprep.subr.bf16.mxu0 %v8010_v19 }
  0xa4   :  { %192 = vbcast.lane.b32.xlu0 %v190_v17, 256 }
  0xa6   :  { %8013 = vmatpush3.bf16.msra.mxu0 %v8010_v19 }
  0xa7   :  { %8022 = vmatprep.subr.bf16.mxu0 %v8831_v37 }
 0x112   :  { %v186_v21 = vpop.permute.xlu0 %185 }
 0x113   :  { %vm194_vm1 = vcmp.eq.s32.totalorder %v186_v21, %v179_v20 }
 0x114   :  { %v7046_v23 = vsel %vm194_vm1, 1.0, %v8830_v22 }
 0x115   :  { %v205_v26 = vrot.slane %v7046_v23, 7  ;;  %7434 = vmatprep.mubr.msk.f32.mxu1 %vm10440_vm0, %v7046_v23 }
 0x116   :  { %v193_v27 = vpop.permute.xlu0 %192 }
 0x117   :  { %vm195_vm4 = vcmp.eq.s32.totalorder %v193_v27, %v179_v20  ;;  %v210_v32 = vsel %vm209_vm3, %v7048_v28, %v205_v26  ;;  %v9155_v27 = vsel %vm689_vm9, 1, %v8835_v15  ;;  %vm10444_vm9 = vcmask 1043456  }
 0x118   :  { %v7047_v30 = vsel %vm195_vm4, 1.0, %v8830_v22  ;;  %vm1894_vm4 = vcmask 1041408  }
 0x119   :  { %v206_v31 = vrot.slane %v7047_v30, 7  ;;  %7435 = vmatmul.mubr.msk.f32.vlgmr.msra.gmra.mrb[0].mxu1 %vm10440_vm0, %v7047_v30 }
 0x11a   :  { %8005 = vmatpush3.bf16.msra.mxu1 %v8002_v13  ;;  %7441 = vmatprep.mubr.msk.f32.mxu1 %vm10440_vm0, %v210_v32 }
 0x11b   :  { %v211_v33 = vsel %vm209_vm3, %v7048_v28, %v206_v31  ;;  %8015 = vmatprep.subr.bf16.mxu1 %v8014_v29 }
 0x11d   :  { %7442 = vmatmul.mubr.msk.f32.vlgmr.msra.gmra.mrb[2].mxu1 %vm10440_vm0, %v211_v33  ;;  %vm4348_vm0 = vcmask 1044484  }
 0x11e   :  { %8017 = vmatpush3.bf16.msra.mxu1 %v8014_v29 }
 0x11f   :  { %8019 = vmatprep.subr.bf16.mxu1 %v8018_v36 }
 0x122   :  { %8021 = vmatpush3.bf16.msra.mxu1 %v8018_v36 }
 0x123   :  { %8028 = vmatprep.subr.bf16.mxu1 %v8831_v37 }
 0x1ec   :  { %v7436_v40 = vpop.f32.mrb[0].mxu1 }
 0x1ed   :  { %v285_v42 = vpop.f32.mrb[1].mxu1 }
 0x1ee   :  { %7452 = vmatprep.mubr.msk.f32.mxu0 %vm388_vm5, %v285_v42 }
 0x1ef   :  { %7453 = vmatmul.mubr.msk.f32.vlgmr.msra.gmra.mrb[0].mxu0 %vm388_vm5, %v7436_v40 }
 0x1f0   :  { %8024 = vmatpush3.bf16.msra.mxu0 %v9096_v41  ;;  %v7443_v45 = vpop.f32.mrb[2].mxu1  ;;  %7474 = vmatprep.mubr.msk.f32.mxu0 %vm8832_vm6, %v8830_v22 }
 0x1f1   :  { %v368_v47 = vpop.f32.mrb[3].mxu1  ;;  %8025 = vmatprep.subr.bf16.mxu0 %v8831_v37 }
 0x1f2   :  { %7463 = vmatprep.mubr.msk.f32.mxu1 %vm388_vm5, %v368_v47 }
 0x1f3   :  { %7464 = vmatmul.mubr.msk.f32.vlgmr.msra.gmra.mrb[4].mxu1 %vm388_vm5, %v7443_v45 }
 0x1f4   :  { %8027 = vmatpush3.bf16.msra.mxu0 %v9107_v46  ;;  %8030 = vmatpush3.bf16.msra.mxu1 %v9096_v41 }
 0x1f5   :  { %8031 = vmatprep.subr.bf16.mxu1 %v8831_v37  ;;  %7485 = vmatprep.mubr.msk.f32.mxu1 %vm8832_vm6, %v8830_v22 }
 0x1f6   :  { %8034 = vmatprep.subr.bf16.mxu0 %v8831_v37 }
 0x1f7   :  { %7475 = vmatmul.mubr.f32.vlgmr.msra.gmra.mrb[2].mxu0 %v8830_v22 }
 0x1f8   :  { %8033 = vmatpush3.bf16.msra.mxu1 %v9107_v46  ;;  %8036 = vmatpush3.bf16.msra.mxu0 %v9096_v41 }
 0x1f9   :  { %8037 = vmatprep.subr.bf16.mxu0 %v8831_v37  ;;  %7496 = vmatprep.mubr.msk.f32.mxu0 %vm8832_vm6, %v8830_v22 }
 0x1fa   :  { %8040 = vmatprep.subr.bf16.mxu1 %v8831_v37 }
 0x1fc   :  { %8039 = vmatpush3.bf16.msra.mxu0 %v9107_v46 }
 0x1fd   :  { %8046 = vmatprep.subr.bf16.mxu0 %v8831_v37 }
 0x2c2   :  { %v7454_v48 = vpop.f32.mrb[0].mxu0 }
 0x2c3   :  { %v461_v49 = vpop.f32.mrb[1].mxu0  ;;  %v9136_v56 = vadd.f32 %v7454_v48, %v7053_v53 }
 0x2c4   :  { %v9139_v60 = vadd.f32 %v7053_v53, %v461_v49 }
 0x2c6   :  { %v9129_v51 = vpop.f32.mrb[4].mxu1 }
 0x2c7   :  { %v553_v52 = vpop.f32.mrb[5].mxu1 }
 0x2c8   :  { %v9134_v54 = vadd.f32 %v7056_v50, %v553_v52 }
 0x2ca   :  { %v631_v55 = vpop.f32.mrb[2].mxu0 }
 0x2cb   :  { %v636_v57 = vrot.slane %v631_v55, 1  ;;  %v7476_v58 = vpop.f32.mrb[3].mxu0  ;;  %v639_v61 = vadd.f32 %v631_v55, %v9139_v60 }
 0x2cd   :  { %v640_v59 = vadd.f32 %v636_v57, %v9136_v56  ;;  %v7059_v1 = vmul.f32 -1.442695, %v639_v61 }
 0x2cf   :  { %8280 = vtanh.f32 %v640_v59  ;;  %v7060_v0 = vmul.f32 -1.442695, %v640_v59 }
 0x2d0   :  { %8282 = vtanh.f32 %v639_v61 }
 0x2d1   :  { %8284 = vpow2.f32 %v7060_v0 }
 0x2d2   :  { %8286 = vpow2.f32 %v7059_v1 }
 0x2d9   :  { %v8281_v62 = vpop.eup %8280 }
 0x2da   :  { %661 = vrot.lane.b32.xlu1 %v8281_v62, %s8833_s3  ;;  %v8283_v63 = vpop.eup %8282 }
 0x2db   :  { %v8285_v4 = vpop.eup %8284 }
 0x2dc   :  { %v648_v6 = vadd.f32 1.0, %v8285_v4  ;;  %v8287_v7 = vpop.eup %8286  ;;  %v8837_v4 = vmov 1  }
 0x2dd   :  { %v647_v8 = vadd.f32 1.0, %v8287_v7 }
 0x2de   :  { %659 = vrot.lane.b32.xlu1 %v8283_v63, %s8833_s3  ;;  %8288 = vrcp.f32 %v648_v6 }
 0x2df   :  { %8290 = vrcp.f32 %v647_v8 }
 0x2e8   :  { %v8289_v9 = vpop.eup %8288 }
 0x2e9   :  { %v8291_v12 = vpop.eup %8290  ;;  %v656_v16 = vmul.f32 0.0, %v8289_v9 }
 0x2ea   :  { %v655_v19 = vmul.f32 0.0, %v8291_v12 }
 0x34c   :  { %v662_v10 = vpop.permute.xlu1 %661 }
 0x34d   :  { %v666_v11 = vmul.f32 %v8289_v9, %v662_v10 }
 0x34f   :  { %671 = vrot.lane.b32.xlu0 %v666_v11, %s8834_s5 }
 0x350   :  { %v660_v13 = vpop.permute.xlu1 %659 }
 0x351   :  { %v665_v14 = vmul.f32 %v8291_v12, %v660_v13 }
 0x353   :  { %669 = vrot.lane.b32.xlu1 %v665_v14, %s8834_s5 }
 0x3c1   :  { %v672_v17 = vpop.permute.xlu0 %671 }
 0x3c2   :  { %v676_v18 = vadd.f32 %v672_v17, %v656_v16 }
 0x3c4   :  { %8292 = vtanh.f32 %v676_v18  ;;  %v706_v21 = vrot.slane %v676_v18, 7 }
 0x3c5   :  { %v670_v20 = vpop.permute.xlu1 %669 }
 0x3c6   :  { %v675_v23 = vadd.f32 %v670_v20, %v655_v19 }
 0x3c8   :  { %8294 = vtanh.f32 %v675_v23  ;;  %v707_v24 = vsel %vm698_vm7, %v706_v21, %v675_v23 }
 0x3ce   :  { %v8293_v26 = vpop.eup %8292 }
 0x3cf   :  { %683 = vrot.lane.b32.xlu0 %v8293_v26, %s8833_s3 }
 0x3d2   :  { %v8295_v28 = vpop.eup %8294 }
 0x3d3   :  { %681 = vrot.lane.b32.xlu1 %v8295_v28, %s8833_s3  ;;  %692 = vperm.xlu0 %8265, %v9155_v27  }
 0x3d7   :  { %8266 = vset.pattern.permute.xlu0 %v8837_v4 }
 0x441   :  { %v684_v5 = vpop.permute.xlu0 %683 }
 0x442   :  { %v9159_v29 = vmul.f32 %v8289_v9, %v684_v5 }
 0x444   :  { %v697_v31 = vrot.slane %v9159_v29, 7 }
 0x445   :  { %v682_v30 = vpop.permute.xlu1 %681 }
 0x446   :  { %v9162_v32 = vmul.f32 %v8291_v12, %v682_v30 }
 0x448   :  { %v699_v33 = vsel %vm698_vm7, %v697_v31, %v9162_v32 }
 0x449   :  { %700 = vrot.lane.b32.xlu1 %v699_v33, %s8834_s5 }
 0x44d   :  { %708 = vrot.lane.b32.xlu1 %v707_v24, %s8836_s20 }
 0x452   :  { %v693_v34 = vpop.permute.xlu0 %692 }
 0x453   :  { %vm694_vm10 = vcmp.eq.s32.totalorder %v693_v34, 1 }
 0x4bb   :  { %v701_v35 = vpop.permute.xlu1 %700 }
 0x4bc   :  { %v9169_v36 = vsel %vm694_vm10, %v701_v35, 0.0 }
 0x4bd   :  { %7486 = vmatmul.mubr.msk.f32.vlgmr.msra.gmra.mrb[6].mxu1 %vm388_vm5, %v9169_v36 }
 0x4be   :  { %8042 = vmatpush3.bf16.msra.mxu1 %v9096_v41  ;;  %7507 = vmatprep.mubr.msk.f32.mxu1 %vm8832_vm6, %v8830_v22 }
 0x4bf   :  { %8043 = vmatprep.subr.bf16.mxu1 %v8831_v37  ;;  %v709_v45 = vpop.permute.xlu1 %708 }
 0x4c0   :  { %v9183_v48 = vsel %vm694_vm10, %v709_v45, 0.0  ;;  %vm10443_vm10 = vcmask 1044480  }
 0x4c1   :  { %v815_v49 = vrot.slane %v9183_v48, 7 }
 0x4c2   :  { %8045 = vmatpush3.bf16.msra.mxu1 %v9107_v46 }
 0x4c3   :  { %8052 = vmatprep.subr.bf16.mxu1 %v8831_v37 }
 0x590   :  { %v790_v38 = vpop.f32.mrb[6].mxu1 }
 0x591   :  { %v795_v39 = vrot.slane %v790_v38, 7  ;;  %v799_v40 = vadd.f32 %v790_v38, %v9136_v56  ;;  %v7487_v42 = vpop.f32.mrb[7].mxu1 }
 0x593   :  { %v798_v43 = vadd.f32 %v795_v39, %v9139_v60  ;;  %8296 = vtanh.f32 %v799_v40  ;;  %v7063_v50 = vmul.f32 -1.442695, %v799_v40 }
 0x595   :  { %8298 = vtanh.f32 %v798_v43  ;;  %v7062_v52 = vmul.f32 -1.442695, %v798_v43 }
 0x596   :  { %8300 = vpow2.f32 %v7063_v50 }
 0x597   :  { %8302 = vpow2.f32 %v7062_v52 }
 0x59d   :  { %v8297_v44 = vpop.eup %8296 }
 0x59e   :  { %828 = vrot.lane.b32.xlu1 %v8297_v44, %s8833_s3 }
 0x59f   :  { %v8299_v47 = vpop.eup %8298 }
 0x5a0   :  { %826 = vrot.lane.b32.xlu0 %v8299_v47, %s8833_s3  ;;  %v8301_v53 = vpop.eup %8300 }
 0x5a1   :  { %v8303_v55 = vpop.eup %8302  ;;  %v807_v57 = vadd.f32 1.0, %v8301_v53 }
 0x5a2   :  { %818 = vrot.lane.b32.xlu1 %v9183_v48, %s8834_s5  ;;  %v806_v58 = vadd.f32 1.0, %v8303_v55 }
 0x5a3   :  { %8304 = vrcp.f32 %v807_v57 }
 0x5a4   :  { %816 = vrot.lane.b32.xlu0 %v815_v49, %s8834_s5  ;;  %8306 = vrcp.f32 %v806_v58 }
 0x5ad   :  { %v8305_v59 = vpop.eup %8304 }
 0x5ae   :  { %v8307_v63 = vpop.eup %8306 }
 0x610   :  { %v829_v61 = vpop.permute.xlu1 %828 }
 0x611   :  { %v833_v62 = vmul.f32 %v8305_v59, %v829_v61 }
 0x612   :  { %v827_v0 = vpop.permute.xlu0 %826 }
 0x613   :  { %838 = vrot.lane.b32.xlu1 %v833_v62, %s8834_s5  ;;  %v832_v1 = vmul.f32 %v8307_v63, %v827_v0 }
 0x614   :  { %v819_v6 = vpop.permute.xlu1 %818 }
 0x615   :  { %836 = vrot.lane.b32.xlu0 %v832_v1, %s8834_s5  ;;  %v823_v7 = vmul.f32 %v8305_v59, %v819_v6 }
 0x616   :  { %v817_v8 = vpop.permute.xlu0 %816 }
 0x617   :  { %v822_v11 = vmul.f32 %v8307_v63, %v817_v8 }
 0x685   :  { %v839_v9 = vpop.permute.xlu1 %838 }
 0x686   :  { %v843_v10 = vadd.f32 %v839_v9, %v823_v7 }
 0x687   :  { %v837_v12 = vpop.permute.xlu0 %836 }
 0x688   :  { %8308 = vtanh.f32 %v843_v10  ;;  %v842_v13 = vadd.f32 %v837_v12, %v822_v11 }
 0x68a   :  { %8310 = vtanh.f32 %v842_v13  ;;  %v870_v14 = vrot.slane %v842_v13, 1 }
 0x68c   :  { %v871_v16 = vsel %vm698_vm7, %v843_v10, %v870_v14 }
 0x692   :  { %v8309_v17 = vpop.eup %8308 }
 0x693   :  { %850 = vrot.lane.b32.xlu1 %v8309_v17, %s8833_s3 }
 0x694   :  { %v8311_v18 = vpop.eup %8310 }
 0x695   :  { %848 = vrot.lane.b32.xlu0 %v8311_v18, %s8833_s3 }
 0x699   :  { %857 = vperm.xlu0 %8266, %v9155_v27  }
 0x705   :  { %v851_v19 = vpop.permute.xlu1 %850 }
 0x706   :  { %v9199_v23 = vmul.f32 %v8305_v59, %v851_v19 }
 0x707   :  { %v849_v20 = vpop.permute.xlu0 %848 }
 0x708   :  { %v9197_v21 = vmul.f32 %v8307_v63, %v849_v20  ;;  %v8838_v63 = vmov 2  }
 0x709   :  { %8267 = vset.pattern.permute.xlu0 %v8838_v63  ;;  %8273 = vset.pattern.permute.xlu1 %v8838_v63 }
 0x70a   :  { %v862_v24 = vrot.slane %v9197_v21, 1 }
 0x70c   :  { %v863_v26 = vsel %vm698_vm7, %v9199_v23, %v862_v24 }
 0x70d   :  { %864 = vrot.lane.b32.xlu1 %v863_v26, %s8834_s5 }
 0x711   :  { %872 = vrot.lane.b32.xlu1 %v871_v16, %s8836_s20 }
 0x718   :  { %v858_v28 = vpop.permute.xlu0 %857 }
 0x719   :  { %vm859_vm11 = vcmp.eq.s32.totalorder %v858_v28, 1 }
 0x77f   :  { %v865_v5 = vpop.permute.xlu1 %864 }
 0x780   :  { %v9208_v30 = vsel %vm859_vm11, %v865_v5, %v9169_v36 }
 0x781   :  { %7497 = vmatmul.mubr.msk.f32.vlgmr.msra.gmra.mrb[4].mxu0 %vm388_vm5, %v9208_v30 }
 0x782   :  { %8048 = vmatpush3.bf16.msra.mxu0 %v9096_v41  ;;  %7518 = vmatprep.mubr.msk.f32.mxu0 %vm8832_vm6, %v8830_v22 }
 0x783   :  { %8049 = vmatprep.subr.bf16.mxu0 %v8831_v37  ;;  %v873_v39 = vpop.permute.xlu1 %872 }
 0x784   :  { %v9222_v42 = vsel %vm859_vm11, %v873_v39, %v9183_v48  ;;  %vm10442_vm11 = vcmask 1045504  }
 0x785   :  { %v979_v44 = vrot.slane %v9222_v42, 6  ;;  %v980_v45 = vrot.slane %v9222_v42, 7 }
 0x786   :  { %8051 = vmatpush3.bf16.msra.mxu0 %v9107_v46 }
 0x787   :  { %8058 = vmatprep.subr.bf16.mxu0 %v8831_v37 }
 0x854   :  { %v953_v31 = vpop.f32.mrb[4].mxu0 }
 0x855   :  { %v958_v33 = vrot.slane %v953_v31, 6  ;;  %v959_v34 = vrot.slane %v953_v31, 7  ;;  %v7498_v35 = vpop.f32.mrb[5].mxu0 }
 0x857   :  { %v962_v36 = vadd.f32 %v958_v33, %v9139_v60  ;;  %v963_v38 = vadd.f32 %v959_v34, %v9136_v56 }
 0x859   :  { %8312 = vtanh.f32 %v962_v36  ;;  %v7065_v47 = vmul.f32 -1.442695, %v962_v36  ;;  %v7066_v49 = vmul.f32 -1.442695, %v963_v38 }
 0x85a   :  { %8314 = vtanh.f32 %v963_v38 }
 0x85b   :  { %8316 = vpow2.f32 %v7065_v47 }
 0x85c   :  { %8318 = vpow2.f32 %v7066_v49 }
 0x863   :  { %v8313_v40 = vpop.eup %8312 }
 0x864   :  { %v8315_v43 = vpop.eup %8314  ;;  %991 = vrot.lane.b32.xlu0 %v8313_v40, %s8833_s3 }
 0x865   :  { %993 = vrot.lane.b32.xlu1 %v8315_v43, %s8833_s3  ;;  %v8317_v50 = vpop.eup %8316 }
 0x866   :  { %v8319_v48 = vpop.eup %8318  ;;  %v970_v52 = vadd.f32 1.0, %v8317_v50 }
 0x867   :  { %v971_v53 = vadd.f32 1.0, %v8319_v48 }
 0x868   :  { %981 = vrot.lane.b32.xlu0 %v979_v44, %s8834_s5  ;;  %8320 = vrcp.f32 %v970_v52 }
 0x869   :  { %983 = vrot.lane.b32.xlu1 %v980_v45, %s8834_s5  ;;  %8322 = vrcp.f32 %v971_v53 }
 0x872   :  { %v8321_v55 = vpop.eup %8320 }
 0x873   :  { %v8323_v58 = vpop.eup %8322 }
 0x8d6   :  { %v992_v57 = vpop.permute.xlu0 %991 }
 0x8d7   :  { %v994_v59 = vpop.permute.xlu1 %993  ;;  %v997_v61 = vmul.f32 %v8321_v55, %v992_v57 }
 0x8d8   :  { %v998_v62 = vmul.f32 %v8323_v58, %v994_v59 }
 0x8d9   :  { %1001 = vrot.lane.b32.xlu0 %v997_v61, %s8834_s5 }
 0x8da   :  { %1003 = vrot.lane.b32.xlu1 %v998_v62, %s8834_s5  ;;  %v982_v0 = vpop.permute.xlu0 %981 }
 0x8db   :  { %v984_v1 = vpop.permute.xlu1 %983  ;;  %v987_v6 = vmul.f32 %v8321_v55, %v982_v0 }
 0x8dc   :  { %v988_v7 = vmul.f32 %v8323_v58, %v984_v1  ;;  %v8839_v1 = vmov 3  }
 0x94b   :  { %v1002_v8 = vpop.permute.xlu0 %1001 }
 0x94c   :  { %v1004_v9 = vpop.permute.xlu1 %1003  ;;  %v1007_v10 = vadd.f32 %v1002_v8, %v987_v6 }
 0x94d   :  { %v1008_v11 = vadd.f32 %v1004_v9, %v988_v7 }
 0x94e   :  { %8324 = vtanh.f32 %v1007_v10  ;;  %v1036_v12 = vrot.slane %v1007_v10, 2 }
 0x94f   :  { %8326 = vtanh.f32 %v1008_v11  ;;  %v1037_v13 = vrot.slane %v1008_v11, 1 }
 0x951   :  { %v1038_v14 = vsel %vm698_vm7, %v1037_v13, %v1036_v12 }
 0x958   :  { %v8325_v16 = vpop.eup %8324 }
 0x959   :  { %v8327_v17 = vpop.eup %8326  ;;  %1013 = vrot.lane.b32.xlu0 %v8325_v16, %s8833_s3 }
 0x95a   :  { %1015 = vrot.lane.b32.xlu1 %v8327_v17, %s8833_s3 }
 0x95d   :  { %1022 = vperm.xlu0 %8267, %v9155_v27  }
 0x961   :  { %8268 = vset.pattern.permute.xlu0 %v8839_v1 }
 0x9cb   :  { %v1014_v18 = vpop.permute.xlu0 %1013 }
 0x9cc   :  { %v1016_v19 = vpop.permute.xlu1 %1015  ;;  %v9236_v20 = vmul.f32 %v8321_v55, %v1014_v18 }
 0x9cd   :  { %v9238_v24 = vmul.f32 %v8323_v58, %v1016_v19 }
 0x9ce   :  { %v1027_v26 = vrot.slane %v9236_v20, 2 }
 0x9cf   :  { %v1028_v28 = vrot.slane %v9238_v24, 1 }
 0x9d1   :  { %v1029_v5 = vsel %vm698_vm7, %v1028_v28, %v1027_v26 }
 0x9d2   :  { %1030 = vrot.lane.b32.xlu1 %v1029_v5, %s8834_s5 }
 0x9d6   :  { %1039 = vrot.lane.b32.xlu1 %v1038_v14, %s8836_s20 }
 0x9dc   :  { %v1023_v31 = vpop.permute.xlu0 %1022 }
 0x9dd   :  { %vm1024_vm12 = vcmp.eq.s32.totalorder %v1023_v31, 1 }
 0xa44   :  { %v1031_v33 = vpop.permute.xlu1 %1030 }
 0xa45   :  { %v9247_v34 = vsel %vm1024_vm12, %v1031_v33, %v9208_v30 }
 0xa46   :  { %7508 = vmatmul.mubr.msk.f32.vlgmr.msra.gmra.mrb[8].mxu1 %vm388_vm5, %v9247_v34 }
 0xa47   :  { %8054 = vmatpush3.bf16.msra.mxu1 %v9096_v41  ;;  %7529 = vmatprep.mubr.msk.f32.mxu1 %vm8832_vm6, %v8830_v22 }
 0xa48   :  { %8055 = vmatprep.subr.bf16.mxu1 %v8831_v37  ;;  %v1040_v43 = vpop.permute.xlu1 %1039 }
 0xa49   :  { %v9261_v45 = vsel %vm1024_vm12, %v1040_v43, %v9222_v42  ;;  %vm10441_vm12 = vcmask 1046528  }
 0xa4a   :  { %v1147_v49 = vrot.slane %v9261_v45, 5  ;;  %v1148_v50 = vrot.slane %v9261_v45, 6 }
 0xa4b   :  { %8057 = vmatpush3.bf16.msra.mxu1 %v9107_v46 }
 0xa4c   :  { %8064 = vmatprep.subr.bf16.mxu1 %v8831_v37 }
 0xb19   :  { %v1121_v35 = vpop.f32.mrb[8].mxu1 }
 0xb1a   :  { %v1126_v36 = vrot.slane %v1121_v35, 5  ;;  %v1127_v38 = vrot.slane %v1121_v35, 6  ;;  %v7509_v39 = vpop.f32.mrb[9].mxu1 }
 0xb1c   :  { %v1130_v30 = vadd.f32 %v1126_v36, %v9139_v60  ;;  %v1131_v40 = vadd.f32 %v1127_v38, %v9136_v56 }
 0xb1e   :  { %8328 = vtanh.f32 %v1130_v30  ;;  %v7068_v48 = vmul.f32 -1.442695, %v1130_v30  ;;  %v7069_v52 = vmul.f32 -1.442695, %v1131_v40 }
 0xb1f   :  { %8330 = vtanh.f32 %v1131_v40 }
 0xb20   :  { %8332 = vpow2.f32 %v7068_v48 }
 0xb21   :  { %8334 = vpow2.f32 %v7069_v52 }
 0xb28   :  { %v8329_v44 = vpop.eup %8328 }
 0xb29   :  { %v8331_v47 = vpop.eup %8330  ;;  %1159 = vrot.lane.b32.xlu0 %v8329_v44, %s8833_s3 }
 0xb2a   :  { %1161 = vrot.lane.b32.xlu1 %v8331_v47, %s8833_s3  ;;  %v8333_v53 = vpop.eup %8332 }
 0xb2b   :  { %v8335_v42 = vpop.eup %8334  ;;  %v1138_v55 = vadd.f32 1.0, %v8333_v53 }
 0xb2c   :  { %v1139_v57 = vadd.f32 1.0, %v8335_v42 }
 0xb2d   :  { %1149 = vrot.lane.b32.xlu0 %v1147_v49, %s8834_s5  ;;  %8336 = vrcp.f32 %v1138_v55 }
 0xb2e   :  { %1151 = vrot.lane.b32.xlu1 %v1148_v50, %s8834_s5  ;;  %8338 = vrcp.f32 %v1139_v57 }
 0xb37   :  { %v8337_v58 = vpop.eup %8336 }
 0xb38   :  { %v8339_v61 = vpop.eup %8338 }
 0xb9b   :  { %v1160_v59 = vpop.permute.xlu0 %1159 }
 0xb9c   :  { %v1162_v62 = vpop.permute.xlu1 %1161  ;;  %v1165_v63 = vmul.f32 %v8337_v58, %v1160_v59 }
 0xb9d   :  { %v1166_v0 = vmul.f32 %v8339_v61, %v1162_v62 }
 0xb9e   :  { %1169 = vrot.lane.b32.xlu0 %v1165_v63, %s8834_s5 }
 0xb9f   :  { %1171 = vrot.lane.b32.xlu1 %v1166_v0, %s8834_s5  ;;  %v1150_v6 = vpop.permute.xlu0 %1149 }
 0xba0   :  { %v1152_v7 = vpop.permute.xlu1 %1151  ;;  %v1155_v8 = vmul.f32 %v8337_v58, %v1150_v6 }
 0xba1   :  { %v1156_v9 = vmul.f32 %v8339_v61, %v1152_v7 }
 0xc10   :  { %v1170_v10 = vpop.permute.xlu0 %1169 }
 0xc11   :  { %v1172_v11 = vpop.permute.xlu1 %1171  ;;  %v1175_v12 = vadd.f32 %v1170_v10, %v1155_v8  ;;  %v8840_v10 = vmov 4  }
 0xc12   :  { %v1176_v13 = vadd.f32 %v1172_v11, %v1156_v9 }
 0xc13   :  { %8340 = vtanh.f32 %v1175_v12  ;;  %v1204_v14 = vrot.slane %v1175_v12, 3 }
 0xc14   :  { %8342 = vtanh.f32 %v1176_v13  ;;  %v1205_v16 = vrot.slane %v1176_v13, 2 }
 0xc16   :  { %v1206_v17 = vsel %vm698_vm7, %v1205_v16, %v1204_v14 }
 0xc1d   :  { %v8341_v18 = vpop.eup %8340 }
 0xc1e   :  { %v8343_v19 = vpop.eup %8342  ;;  %1181 = vrot.lane.b32.xlu0 %v8341_v18, %s8833_s3 }
 0xc1f   :  { %1183 = vrot.lane.b32.xlu1 %v8343_v19, %s8833_s3 }
 0xc22   :  { %1190 = vperm.xlu0 %8268, %v9155_v27  }
 0xc26   :  { %8269 = vset.pattern.permute.xlu0 %v8840_v10 }
 0xc90   :  { %v1182_v26 = vpop.permute.xlu0 %1181 }
 0xc91   :  { %v1184_v28 = vpop.permute.xlu1 %1183  ;;  %v9276_v5 = vmul.f32 %v8337_v58, %v1182_v26 }
 0xc92   :  { %v9278_v31 = vmul.f32 %v8339_v61, %v1184_v28 }
 0xc93   :  { %v1195_v33 = vrot.slane %v9276_v5, 3 }
 0xc94   :  { %v1196_v35 = vrot.slane %v9278_v31, 2 }
 0xc96   :  { %v1197_v36 = vsel %vm698_vm7, %v1196_v35, %v1195_v33 }
 0xc97   :  { %1198 = vrot.lane.b32.xlu1 %v1197_v36, %s8834_s5 }
 0xc9b   :  { %1207 = vrot.lane.b32.xlu1 %v1206_v17, %s8836_s20 }
 0xca1   :  { %v1191_v38 = vpop.permute.xlu0 %1190 }
 0xca2   :  { %vm1192_vm13 = vcmp.eq.s32.totalorder %v1191_v38, 1 }
 0xd09   :  { %v1199_v39 = vpop.permute.xlu1 %1198 }
 0xd0a   :  { %v9287_v30 = vsel %vm1192_vm13, %v1199_v39, %v9247_v34 }
 0xd0b   :  { %7519 = vmatmul.mubr.msk.f32.vlgmr.msra.gmra.mrb[6].mxu0 %vm388_vm5, %v9287_v30 }
 0xd0c   :  { %8060 = vmatpush3.bf16.msra.mxu0 %v9096_v41  ;;  %7540 = vmatprep.mubr.msk.f32.mxu0 %vm8832_vm6, %v8830_v22 }
 0xd0d   :  { %8061 = vmatprep.subr.bf16.mxu0 %v8831_v37  ;;  %v1208_v50 = vpop.permute.xlu1 %1207 }
 0xd0e   :  { %v9301_v52 = vsel %vm1192_vm13, %v1208_v50, %v9261_v45  ;;  %vm1917_vm13 = vcmask 1048320  }
 0xd0f   :  { %v1315_v42 = vrot.slane %v9301_v52, 4  ;;  %v1316_v55 = vrot.slane %v9301_v52, 5 }
 0xd10   :  { %8063 = vmatpush3.bf16.msra.mxu0 %v9107_v46 }
 0xd11   :  { %8070 = vmatprep.subr.bf16.mxu0 %v8831_v37 }
 0xdde   :  { %v1289_v40 = vpop.f32.mrb[6].mxu0 }
 0xddf   :  { %v1294_v43 = vrot.slane %v1289_v40, 4  ;;  %v1295_v44 = vrot.slane %v1289_v40, 5  ;;  %v7520_v47 = vpop.f32.mrb[7].mxu0 }
 0xde1   :  { %v1298_v34 = vadd.f32 %v1294_v43, %v9139_v60  ;;  %v1299_v49 = vadd.f32 %v1295_v44, %v9136_v56 }
 0xde3   :  { %8344 = vtanh.f32 %v1298_v34  ;;  %v7071_v57 = vmul.f32 -1.442695, %v1298_v34  ;;  %v7072_v58 = vmul.f32 -1.442695, %v1299_v49 }
 0xde4   :  { %8346 = vtanh.f32 %v1299_v49 }
 0xde5   :  { %8348 = vpow2.f32 %v7071_v57 }
 0xde6   :  { %8350 = vpow2.f32 %v7072_v58 }
 0xded   :  { %v8345_v48 = vpop.eup %8344 }
 0xdee   :  { %v8347_v53 = vpop.eup %8346  ;;  %1327 = vrot.lane.b32.xlu0 %v8345_v48, %s8833_s3 }
 0xdef   :  { %1329 = vrot.lane.b32.xlu1 %v8347_v53, %s8833_s3  ;;  %v8349_v59 = vpop.eup %8348 }
 0xdf0   :  { %v8351_v45 = vpop.eup %8350  ;;  %v1306_v61 = vadd.f32 1.0, %v8349_v59 }
 0xdf1   :  { %v1307_v62 = vadd.f32 1.0, %v8351_v45 }
 0xdf2   :  { %1317 = vrot.lane.b32.xlu0 %v1315_v42, %s8834_s5  ;;  %8352 = vrcp.f32 %v1306_v61 }
 0xdf3   :  { %1319 = vrot.lane.b32.xlu1 %v1316_v55, %s8834_s5  ;;  %8354 = vrcp.f32 %v1307_v62 }
 0xdfc   :  { %v8353_v63 = vpop.eup %8352 }
 0xdfd   :  { %v8355_v6 = vpop.eup %8354 }
 0xe60   :  { %v1328_v0 = vpop.permute.xlu0 %1327 }
 0xe61   :  { %v1330_v7 = vpop.permute.xlu1 %1329  ;;  %v1333_v8 = vmul.f32 %v8353_v63, %v1328_v0 }
 0xe62   :  { %v1334_v9 = vmul.f32 %v8355_v6, %v1330_v7 }
 0xe63   :  { %1337 = vrot.lane.b32.xlu0 %v1333_v8, %s8834_s5 }
 0xe64   :  { %1339 = vrot.lane.b32.xlu1 %v1334_v9, %s8834_s5  ;;  %v1318_v11 = vpop.permute.xlu0 %1317 }
 0xe65   :  { %v1320_v12 = vpop.permute.xlu1 %1319  ;;  %v1323_v13 = vmul.f32 %v8353_v63, %v1318_v11 }
 0xe66   :  { %v1324_v14 = vmul.f32 %v8355_v6, %v1320_v12 }
 0xed5   :  { %v1338_v16 = vpop.permute.xlu0 %1337 }
 0xed6   :  { %v1340_v17 = vpop.permute.xlu1 %1339  ;;  %v1343_v18 = vadd.f32 %v1338_v16, %v1323_v13 }
 0xed7   :  { %v1344_v19 = vadd.f32 %v1340_v17, %v1324_v14  ;;  %v8841_v17 = vmov 5  }
 0xed8   :  { %8356 = vtanh.f32 %v1343_v18  ;;  %v1372_v26 = vrot.slane %v1343_v18, 4 }
 0xed9   :  { %8358 = vtanh.f32 %v1344_v19  ;;  %v1373_v28 = vrot.slane %v1344_v19, 3 }
 0xedb   :  { %v1374_v33 = vsel %vm698_vm7, %v1373_v28, %v1372_v26 }
 0xee2   :  { %v8357_v35 = vpop.eup %8356 }
 0xee3   :  { %v8359_v36 = vpop.eup %8358  ;;  %1349 = vrot.lane.b32.xlu0 %v8357_v35, %s8833_s3 }
 0xee4   :  { %1351 = vrot.lane.b32.xlu1 %v8359_v36, %s8833_s3 }
 0xee7   :  { %1358 = vperm.xlu0 %8269, %v9155_v27  }
 0xeeb   :  { %8270 = vset.pattern.permute.xlu0 %v8841_v17 }
 0xf55   :  { %v1350_v38 = vpop.permute.xlu0 %1349 }
 0xf56   :  { %v1352_v39 = vpop.permute.xlu1 %1351  ;;  %v9316_v40 = vmul.f32 %v8353_v63, %v1350_v38 }
 0xf57   :  { %v9318_v43 = vmul.f32 %v8355_v6, %v1352_v39 }
 0xf58   :  { %v1363_v44 = vrot.slane %v9316_v40, 4 }
 0xf59   :  { %v1364_v47 = vrot.slane %v9318_v43, 3 }
 0xf5b   :  { %v1365_v34 = vsel %vm698_vm7, %v1364_v47, %v1363_v44 }
 0xf5c   :  { %1366 = vrot.lane.b32.xlu1 %v1365_v34, %s8834_s5 }
 0xf60   :  { %1375 = vrot.lane.b32.xlu1 %v1374_v33, %s8836_s20 }
 0xf66   :  { %v1359_v49 = vpop.permute.xlu0 %1358 }
 0xf67   :  { %vm1360_vm14 = vcmp.eq.s32.totalorder %v1359_v49, 1 }
 0xfce   :  { %v1367_v50 = vpop.permute.xlu1 %1366 }
 0xfcf   :  { %v9327_v48 = vsel %vm1360_vm14, %v1367_v50, %v9287_v30 }
 0xfd0   :  { %7530 = vmatmul.mubr.msk.f32.vlgmr.msra.gmra.mrb[10].mxu1 %vm388_vm5, %v9327_v48 }
 0xfd1   :  { %8066 = vmatpush3.bf16.msra.mxu1 %v9096_v41  ;;  %7551 = vmatprep.mubr.msk.f32.mxu1 %vm8832_vm6, %v8830_v22 }
 0xfd2   :  { %8067 = vmatprep.subr.bf16.mxu1 %v8831_v37  ;;  %v1376_v41 = vpop.permute.xlu1 %1375 }
 0xfd3   :  { %v9341_v45 = vsel %vm1360_vm14, %v1376_v41, %v9301_v52 }
 0xfd4   :  { %v1484_v62 = vrot.slane %v9341_v45, 4 }
 0xfd5   :  { %8069 = vmatpush3.bf16.msra.mxu1 %v9107_v46  ;;  %v1483_v46 = vrot.slane %v9341_v45, 3 }
 0xfd6   :  { %8076 = vmatprep.subr.bf16.mxu1 %v8831_v37 }
0x10a3   :  { %v1457_v53 = vpop.f32.mrb[10].mxu1 }
0x10a4   :  { %v1462_v42 = vrot.slane %v1457_v53, 3  ;;  %v1463_v55 = vrot.slane %v1457_v53, 4  ;;  %v7531_v57 = vpop.f32.mrb[11].mxu1 }
0x10a6   :  { %v1466_v30 = vadd.f32 %v1462_v42, %v9139_v60  ;;  %v1467_v58 = vadd.f32 %v1463_v55, %v9136_v56 }
0x10a8   :  { %8360 = vtanh.f32 %v1466_v30  ;;  %v7074_v63 = vmul.f32 -1.442695, %v1466_v30  ;;  %v7075_v0 = vmul.f32 -1.442695, %v1467_v58 }
0x10a9   :  { %8362 = vtanh.f32 %v1467_v58 }
0x10aa   :  { %8364 = vpow2.f32 %v7074_v63 }
0x10ab   :  { %8366 = vpow2.f32 %v7075_v0 }
0x10b2   :  { %v8361_v59 = vpop.eup %8360 }
0x10b3   :  { %v8363_v61 = vpop.eup %8362  ;;  %1495 = vrot.lane.b32.xlu0 %v8361_v59, %s8833_s3 }
0x10b4   :  { %1497 = vrot.lane.b32.xlu1 %v8363_v61, %s8833_s3  ;;  %v8365_v6 = vpop.eup %8364 }
0x10b5   :  { %v8367_v52 = vpop.eup %8366  ;;  %v1474_v7 = vadd.f32 1.0, %v8365_v6 }
0x10b6   :  { %v1475_v8 = vadd.f32 1.0, %v8367_v52 }
0x10b7   :  { %1485 = vrot.lane.b32.xlu0 %v1483_v46, %s8834_s5  ;;  %8368 = vrcp.f32 %v1474_v7 }
0x10b8   :  { %1487 = vrot.lane.b32.xlu1 %v1484_v62, %s8834_s5  ;;  %8370 = vrcp.f32 %v1475_v8 }
0x10c1   :  { %v8369_v9 = vpop.eup %8368 }
0x10c2   :  { %v8371_v12 = vpop.eup %8370 }
0x1125   :  { %v1496_v11 = vpop.permute.xlu0 %1495 }
0x1126   :  { %v1498_v13 = vpop.permute.xlu1 %1497  ;;  %v1501_v14 = vmul.f32 %v8369_v9, %v1496_v11 }
0x1127   :  { %v1502_v16 = vmul.f32 %v8371_v12, %v1498_v13 }
0x1128   :  { %1505 = vrot.lane.b32.xlu0 %v1501_v14, %s8834_s5 }
0x1129   :  { %1507 = vrot.lane.b32.xlu1 %v1502_v16, %s8834_s5  ;;  %v1486_v18 = vpop.permute.xlu0 %1485 }
0x112a   :  { %v1488_v19 = vpop.permute.xlu1 %1487  ;;  %v1491_v26 = vmul.f32 %v8369_v9, %v1486_v18 }
0x112b   :  { %v1492_v28 = vmul.f32 %v8371_v12, %v1488_v19 }
0x119a   :  { %v1506_v33 = vpop.permute.xlu0 %1505 }
0x119b   :  { %v1508_v35 = vpop.permute.xlu1 %1507  ;;  %v1511_v36 = vadd.f32 %v1506_v33, %v1491_v26 }
0x119c   :  { %v1512_v38 = vadd.f32 %v1508_v35, %v1492_v28 }
0x119d   :  { %8372 = vtanh.f32 %v1511_v36  ;;  %v1540_v39 = vrot.slane %v1511_v36, 5 }
0x119e   :  { %8374 = vtanh.f32 %v1512_v38  ;;  %v1541_v44 = vrot.slane %v1512_v38, 4 }
0x11a0   :  { %v1542_v47 = vsel %vm698_vm7, %v1541_v44, %v1540_v39  ;;  %v8842_v39 = vmov 6  }
0x11a7   :  { %v8373_v34 = vpop.eup %8372 }
0x11a8   :  { %v8375_v49 = vpop.eup %8374  ;;  %1517 = vrot.lane.b32.xlu0 %v8373_v34, %s8833_s3 }
0x11a9   :  { %1519 = vrot.lane.b32.xlu1 %v8375_v49, %s8833_s3 }
0x11ac   :  { %1526 = vperm.xlu0 %8270, %v9155_v27  }
0x11b0   :  { %8271 = vset.pattern.permute.xlu0 %v8842_v39 }
0x121a   :  { %v1518_v50 = vpop.permute.xlu0 %1517 }
0x121b   :  { %v1520_v53 = vpop.permute.xlu1 %1519  ;;  %v9356_v42 = vmul.f32 %v8369_v9, %v1518_v50 }
0x121c   :  { %v9358_v55 = vmul.f32 %v8371_v12, %v1520_v53 }
0x121d   :  { %v1531_v57 = vrot.slane %v9356_v42, 5 }
0x121e   :  { %v1532_v30 = vrot.slane %v9358_v55, 4 }
0x1220   :  { %v1533_v58 = vsel %vm698_vm7, %v1532_v30, %v1531_v57 }
0x1221   :  { %1534 = vrot.lane.b32.xlu1 %v1533_v58, %s8834_s5 }
0x1225   :  { %1543 = vrot.lane.b32.xlu1 %v1542_v47, %s8836_s20 }
0x122b   :  { %v1527_v41 = vpop.permute.xlu0 %1526 }
0x122c   :  { %vm1528_vm15 = vcmp.eq.s32.totalorder %v1527_v41, 1 }
0x1293   :  { %v1535_v59 = vpop.permute.xlu1 %1534 }
0x1294   :  { %v9366_v61 = vsel %vm1528_vm15, %v1535_v59, %v9327_v48 }
0x1295   :  { %7541 = vmatmul.mubr.msk.f32.vlgmr.msra.gmra.mrb[8].mxu0 %vm388_vm5, %v9366_v61 }
0x1296   :  { %7562 = vmatprep.mubr.msk.f32.mxu0 %vm8832_vm6, %v8830_v22 }
0x1297   :  { %v1544_v7 = vpop.permute.xlu1 %1543 }
0x1298   :  { %v9375_v48 = vsel %vm1528_vm15, %v1544_v7, %v9341_v45  ;;  %vm2205_vm15 = vcmask 1024  }
0x1299   :  { %v1651_v11 = vrot.slane %v9375_v48, 2  ;;  %v1652_v12 = vrot.slane %v9375_v48, 3 }
0x1368   :  { %v1625_v46 = vpop.f32.mrb[8].mxu0 }
0x1369   :  { %v1630_v62 = vrot.slane %v1625_v46, 2  ;;  %v1631_v63 = vrot.slane %v1625_v46, 3  ;;  %v7542_v0 = vpop.f32.mrb[9].mxu0 }
0x136b   :  { %v1634_v6 = vadd.f32 %v1630_v62, %v9139_v60  ;;  %v1635_v52 = vadd.f32 %v1631_v63, %v9136_v56 }
0x136d   :  { %8376 = vtanh.f32 %v1634_v6  ;;  %v7077_v13 = vmul.f32 -1.442695, %v1634_v6  ;;  %v7078_v14 = vmul.f32 -1.442695, %v1635_v52 }
0x136e   :  { %8378 = vtanh.f32 %v1635_v52 }
0x136f   :  { %8380 = vpow2.f32 %v7077_v13 }
0x1370   :  { %8382 = vpow2.f32 %v7078_v14 }
0x1377   :  { %v8377_v8 = vpop.eup %8376 }
0x1378   :  { %v8379_v9 = vpop.eup %8378  ;;  %1663 = vrot.lane.b32.xlu0 %v8377_v8, %s8833_s3 }
0x1379   :  { %1665 = vrot.lane.b32.xlu1 %v8379_v9, %s8833_s3  ;;  %v8381_v16 = vpop.eup %8380 }
0x137a   :  { %v8383_v45 = vpop.eup %8382  ;;  %v1642_v18 = vadd.f32 1.0, %v8381_v16 }
0x137b   :  { %v1643_v19 = vadd.f32 1.0, %v8383_v45 }
0x137c   :  { %1653 = vrot.lane.b32.xlu0 %v1651_v11, %s8834_s5  ;;  %8384 = vrcp.f32 %v1642_v18 }
0x137d   :  { %1655 = vrot.lane.b32.xlu1 %v1652_v12, %s8834_s5  ;;  %8386 = vrcp.f32 %v1643_v19 }
0x1386   :  { %v8385_v26 = vpop.eup %8384 }
0x1387   :  { %v8387_v33 = vpop.eup %8386 }
0x13ea   :  { %v1664_v28 = vpop.permute.xlu0 %1663 }
0x13eb   :  { %v1666_v35 = vpop.permute.xlu1 %1665  ;;  %v1669_v36 = vmul.f32 %v8385_v26, %v1664_v28 }
0x13ec   :  { %v1670_v38 = vmul.f32 %v8387_v33, %v1666_v35 }
0x13ed   :  { %1673 = vrot.lane.b32.xlu0 %v1669_v36, %s8834_s5 }
0x13ee   :  { %1675 = vrot.lane.b32.xlu1 %v1670_v38, %s8834_s5  ;;  %v1654_v44 = vpop.permute.xlu0 %1653 }
0x13ef   :  { %v1656_v47 = vpop.permute.xlu1 %1655  ;;  %v1659_v34 = vmul.f32 %v8385_v26, %v1654_v44 }
0x13f0   :  { %v1660_v49 = vmul.f32 %v8387_v33, %v1656_v47 }
0x145f   :  { %v1674_v50 = vpop.permute.xlu0 %1673 }
0x1460   :  { %v1676_v53 = vpop.permute.xlu1 %1675  ;;  %v1679_v57 = vadd.f32 %v1674_v50, %v1659_v34 }
0x1461   :  { %v1680_v30 = vadd.f32 %v1676_v53, %v1660_v49 }
0x1462   :  { %8388 = vtanh.f32 %v1679_v57  ;;  %v1708_v58 = vrot.slane %v1679_v57, 6 }
0x1463   :  { %8390 = vtanh.f32 %v1680_v30  ;;  %v1709_v41 = vrot.slane %v1680_v30, 5 }
0x1465   :  { %v1710_v59 = vsel %vm698_vm7, %v1709_v41, %v1708_v58  ;;  %v8843_v58 = vmov 7  }
0x146c   :  { %v8389_v46 = vpop.eup %8388 }
0x146d   :  { %v8391_v62 = vpop.eup %8390  ;;  %1685 = vrot.lane.b32.xlu0 %v8389_v46, %s8833_s3 }
0x146e   :  { %1687 = vrot.lane.b32.xlu1 %v8391_v62, %s8833_s3 }
0x1471   :  { %1694 = vperm.xlu0 %8271, %v9155_v27  }
0x1475   :  { %8272 = vset.pattern.permute.xlu0 %v8835_v15 }
0x14df   :  { %v1686_v63 = vpop.permute.xlu0 %1685 }
0x14e0   :  { %v1688_v0 = vpop.permute.xlu1 %1687  ;;  %v9391_v6 = vmul.f32 %v8385_v26, %v1686_v63 }
0x14e1   :  { %v9393_v52 = vmul.f32 %v8387_v33, %v1688_v0 }
0x14e2   :  { %v1699_v7 = vrot.slane %v9391_v6, 6 }
0x14e3   :  { %v1700_v8 = vrot.slane %v9393_v52, 5 }
0x14e5   :  { %v1701_v9 = vsel %vm698_vm7, %v1700_v8, %v1699_v7 }
0x14e6   :  { %1702 = vrot.lane.b32.xlu1 %v1701_v9, %s8834_s5 }
0x14ea   :  { %1711 = vrot.lane.b32.xlu1 %v1710_v59, %s8836_s20 }
0x14f0   :  { %v1695_v11 = vpop.permute.xlu0 %1694 }
0x14f1   :  { %vm1696_vm1 = vcmp.eq.s32.totalorder %v1695_v11, 1  ;;  %v1940_v11 = vld [vmem:[%s10419_s6] sm:$0xff] }
0x1558   :  { %v1703_v12 = vpop.permute.xlu1 %1702 }
0x1559   :  { %v9401_v15 = vsel %vm1696_vm1, %v1703_v12, %v9366_v61  ;;  %v1941_v12 = vld [vmem:[%s10419_s6 + $0x8] sm:$0xff] }
0x155a   :  { %7552 = vmatmul.mubr.msk.f32.vlgmr.msra.gmra.mrb[12].mxu1 %vm388_vm5, %v9401_v15 }
0x155b   :  { %7573 = vmatprep.mubr.msk.f32.mxu1 %vm8832_vm6, %v8830_v22 }
0x155c   :  { %v1712_v26 = vpop.permute.xlu1 %1711 }
0x155d   :  { %v9410_v61 = vsel %vm1696_vm1, %v1712_v26, %v9375_v48 }
0x155e   :  { %v1819_v35 = vrot.slane %v9410_v61, 1  ;;  %v1820_v36 = vrot.slane %v9410_v61, 2 }
0x162d   :  { %v1793_v13 = vpop.f32.mrb[12].mxu1 }
0x162e   :  { %v1798_v14 = vrot.slane %v1793_v13, 1  ;;  %v1799_v16 = vrot.slane %v1793_v13, 2  ;;  %v7553_v45 = vpop.f32.mrb[13].mxu1  ;;  %v1942_v13 = vld [vmem:[%s10419_s6 + $0x10] sm:$0xff] }
0x1630   :  { %v1802_v18 = vadd.f32 %v1798_v14, %v9139_v60  ;;  %v1803_v19 = vadd.f32 %v1799_v16, %v9136_v56  ;;  %v8071_v14 = vpack.c.bf16 %v1941_v12, %v1940_v11  ;;  %v1943_v16 = vld [vmem:[%s10419_s6 + $0x18] sm:$0xff] }
0x1631   :  { %v8074_v45 = vpack.c.bf16 %v1943_v16, %v1942_v13 }
0x1632   :  { %8392 = vtanh.f32 %v1802_v18  ;;  %v7080_v56 = vmul.f32 -1.442695, %v1802_v18  ;;  %v7081_v60 = vmul.f32 -1.442695, %v1803_v19  ;;  %8072 = vmatpush3.bf16.msra.mxu0 %v8071_v14 }
0x1633   :  { %8394 = vtanh.f32 %v1803_v19  ;;  %8073 = vmatprep.subr.bf16.mxu0 %v8831_v37 }
0x1634   :  { %8396 = vpow2.f32 %v7080_v56 }
0x1635   :  { %8398 = vpow2.f32 %v7081_v60 }
0x1636   :  { %8075 = vmatpush3.bf16.msra.mxu0 %v8074_v45 }
0x1637   :  { %8082 = vmatprep.subr.bf16.mxu0 %v8831_v37 }
0x163c   :  { %v8393_v28 = vpop.eup %8392 }
0x163d   :  { %v8395_v33 = vpop.eup %8394  ;;  %1831 = vrot.lane.b32.xlu1 %v8393_v28, %s8833_s3 }
0x163e   :  { %1833 = vrot.lane.b32.xlu0 %v8395_v33, %s8833_s3  ;;  %v8397_v38 = vpop.eup %8396 }
0x163f   :  { %v8399_v48 = vpop.eup %8398  ;;  %v1810_v44 = vadd.f32 1.0, %v8397_v38 }
0x1640   :  { %v1811_v47 = vadd.f32 1.0, %v8399_v48 }
0x1641   :  { %1821 = vrot.lane.b32.xlu1 %v1819_v35, %s8834_s5  ;;  %8400 = vrcp.f32 %v1810_v44 }
0x1642   :  { %1823 = vrot.lane.b32.xlu0 %v1820_v36, %s8834_s5  ;;  %8402 = vrcp.f32 %v1811_v47 }
0x164b   :  { %v9418_v34 = vpop.eup %8400 }
0x164c   :  { %v9420_v50 = vpop.eup %8402 }
0x16af   :  { %v1832_v49 = vpop.permute.xlu1 %1831 }
0x16b0   :  { %v1834_v53 = vpop.permute.xlu0 %1833  ;;  %v1837_v57 = vmul.f32 %v9418_v34, %v1832_v49 }
0x16b1   :  { %v1838_v30 = vmul.f32 %v9420_v50, %v1834_v53 }
0x16b2   :  { %1841 = vrot.lane.b32.xlu1 %v1837_v57, %s8834_s5 }
0x16b3   :  { %1843 = vrot.lane.b32.xlu0 %v1838_v30, %s8834_s5 }
0x16b6   :  { %1044 = vperm.xlu1 %8273, %v9150_v25  }
0x16b7   :  { %714 = vperm.xlu0 %8272, %v9150_v25  }
0x16ba   :  { %8274 = vset.pattern.permute.xlu1 %v8837_v4  ;;  %v1913_v4 = vsel %vm1912_vm2, %v9150_v25, 0.0  ;;  %vm2530_vm2 = vcmask 57344  }
0x16bb   :  { %8275 = vset.pattern.permute.xlu0 %v8839_v1  ;;  %877 = vperm.xlu1 %8274, %v9150_v25   ;;  %v1822_v1 = vpop.permute.xlu1 %1821 }
0x16bc   :  { %1212 = vperm.xlu0 %8275, %v9150_v25   ;;  %v1827_v41 = vmul.f32 %v9418_v34, %v1822_v1 }
0x16c0   :  { %8276 = vset.pattern.permute.xlu0 %v8840_v10  ;;  %v1824_v10 = vpop.permute.xlu0 %1823 }
0x16c1   :  { %1380 = vperm.xlu0 %8276, %v9150_v25  }
0x16c5   :  { %8277 = vset.pattern.permute.xlu0 %v8841_v17  ;;  %v1828_v17 = vmul.f32 %v9420_v50, %v1824_v10 }
0x16c6   :  { %1548 = vperm.xlu0 %8277, %v9150_v25  }
0x16ca   :  { %8278 = vset.pattern.permute.xlu0 %v8842_v39 }
0x16cb   :  { %1716 = vperm.xlu0 %8278, %v9150_v25  }
0x16cf   :  { %8279 = vset.pattern.permute.xlu0 %v8843_v58 }
0x16d0   :  { %1884 = vperm.xlu0 %8279, %v9150_v25  }
0x16df   :  { %1914 = vadd.xlane.f32.xlu1 %v1913_v4 }
0x1724   :  { %v1842_v59 = vpop.permute.xlu1 %1841 }
0x1725   :  { %v1844_v46 = vpop.permute.xlu0 %1843  ;;  %v1847_v62 = vadd.f32 %v1842_v59, %v1827_v41 }
0x1726   :  { %v1848_v39 = vadd.f32 %v1844_v46, %v1828_v17 }
0x1727   :  { %8404 = vtanh.f32 %v1847_v62  ;;  %v1876_v8 = vrot.slane %v1847_v62, 7 }
0x1728   :  { %8406 = vtanh.f32 %v1848_v39  ;;  %v1877_v7 = vrot.slane %v1848_v39, 6 }
0x172a   :  { %v1878_v9 = vsel %vm698_vm7, %v1877_v7, %v1876_v8 }
0x1731   :  { %v8405_v63 = vpop.eup %8404 }
0x1732   :  { %v8407_v0 = vpop.eup %8406  ;;  %1853 = vrot.lane.b32.xlu0 %v8405_v63, %s8833_s3 }
0x1733   :  { %1855 = vrot.lane.b32.xlu1 %v8407_v0, %s8833_s3 }
0x1735   :  { %v1045_v26 = vpop.permute.xlu1 %1044 }
0x1736   :  { %v715_v18 = vpop.permute.xlu0 %714  ;;  %v1046_v48 = vrot.slane %v1045_v26, 6  ;;  %v1047_v53 = vrot.slane %v1045_v26, 7 }
0x1737   :  { %1879 = vrot.lane.b32.xlu1 %v1878_v9, %s8836_s20  ;;  %v716_v56 = vrot.slane %v715_v18, 1  ;;  %v719_v44 = vmul.f32 %v715_v18, %v9162_v32 }
0x1738   :  { %v1050_v10 = vmul.f32 %v1046_v48, %v9236_v20 }
0x1739   :  { %v720_v49 = vmul.f32 %v716_v56, %v9159_v29  ;;  %v1051_v29 = vmul.f32 %v1047_v53, %v9238_v24 }
0x173a   :  { %v878_v33 = vpop.permute.xlu1 %877 }
0x173b   :  { %v1213_v19 = vpop.permute.xlu0 %1212  ;;  %v879_v36 = vrot.slane %v878_v33, 7  ;;  %v883_v47 = vmul.f32 %v878_v33, %v9199_v23 }
0x173c   :  { %v1214_v57 = vrot.slane %v1213_v19, 5  ;;  %v1215_v30 = vrot.slane %v1213_v19, 6 }
0x173d   :  { %v882_v60 = vmul.f32 %v879_v36, %v9197_v21  ;;  %v1893_v59 = vsel %vm209_vm3, %v720_v49, %v883_v47 }
0x173e   :  { %v1218_v39 = vmul.f32 %v1214_v57, %v9276_v5  ;;  %v1219_v63 = vmul.f32 %v1215_v30, %v9278_v31  ;;  %v1896_v0 = vsel %vm1894_vm4, %v1893_v59, %v1051_v29 }
0x173f   :  { %v1892_v58 = vsel %vm209_vm3, %v719_v44, %v882_v60 }
0x1740   :  { %v1381_v28 = vpop.permute.xlu0 %1380  ;;  %v1895_v46 = vsel %vm1894_vm4, %v1892_v58, %v1050_v10 }
0x1741   :  { %v1382_v4 = vrot.slane %v1381_v28, 4  ;;  %v1383_v41 = vrot.slane %v1381_v28, 5  ;;  %v1898_v24 = vsel %vm1897_vm8, %v1895_v46, %v1218_v39 }
0x1743   :  { %v1386_v20 = vmul.f32 %v1382_v4, %v9316_v40  ;;  %v1387_v7 = vmul.f32 %v1383_v41, %v9318_v43  ;;  %v1899_v43 = vsel %vm1897_vm8, %v1896_v0, %v1219_v63  ;;  %v2031_v0 = vld [vmem:[%s10421_s8 + $0x8] sm:$0xff] }
0x1745   :  { %v1549_v35 = vpop.permute.xlu0 %1548 }
0x1746   :  { %v1550_v21 = vrot.slane %v1549_v35, 3  ;;  %v1551_v32 = vrot.slane %v1549_v35, 4 }
0x1748   :  { %v1554_v8 = vmul.f32 %v1550_v21, %v9356_v42  ;;  %v1555_v9 = vmul.f32 %v1551_v32, %v9358_v55  ;;  %v1901_v42 = vsel %vm10444_vm9, %v1898_v24, %v1386_v20  ;;  %v1902_v55 = vsel %vm10444_vm9, %v1899_v43, %v1387_v7  ;;  %v2032_v7 = vld [vmem:[%s10421_s8 + $0x10] sm:$0xff]  ;;  %v157_v43 = vld [vmem:[%s10426_s13 + $0x8] sm:$0xff] }
0x1749   :  { %vm2721_vm9 = vcmask 523264  }
0x174a   :  { %v1717_v38 = vpop.permute.xlu0 %1716 }
0x174b   :  { %v1718_v23 = vrot.slane %v1717_v38, 2  ;;  %v1719_v62 = vrot.slane %v1717_v38, 3 }
0x174d   :  { %v1722_v11 = vmul.f32 %v1718_v23, %v9391_v6  ;;  %v1723_v31 = vmul.f32 %v1719_v62, %v9393_v52  ;;  %v1904_v6 = vsel %vm10443_vm10, %v1901_v42, %v1554_v8  ;;  %v1905_v52 = vsel %vm10443_vm10, %v1902_v55, %v1555_v9  ;;  %v2115_v9 = vld [vmem:[%s10423_s10] sm:$0xff] }
0x174f   :  { %v1885_v1 = vpop.permute.xlu0 %1884  ;;  %v1907_v19 = vsel %vm10442_vm11, %v1904_v6, %v1722_v11  ;;  %v2116_v11 = vld [vmem:[%s10423_s10 + $0x8] sm:$0xff] }
0x1750   :  { %v1886_v12 = vrot.slane %v1885_v1, 1  ;;  %v1887_v16 = vrot.slane %v1885_v1, 2 }
0x176c   :  { %v1915_v17 = vpop.xlane.xlu1 %1914 }
0x176d   :  { %v1916_v40 = vmax.f32 %v1915_v17, 1.0 }
0x176f   :  { %v1933_v28 = vrot.slane %v1916_v40, 1 }
0x1771   :  { %8408 = vrcp.f32 %v1933_v28  ;;  %v7084_v28 = vld [vmem:[#allocation11] ss:$0 sm:$0xff] }
0x1772   :  { %8410 = vrcp.f32 %v1916_v40 }
0x177b   :  { %v8409_v1 = vpop.eup %8408 }
0x177c   :  { %v8411_v41 = vpop.eup %8410 }
0x17a4   :  { %v1854_v5 = vpop.permute.xlu0 %1853 }
0x17a5   :  { %v1856_v13 = vpop.permute.xlu1 %1855  ;;  %v1859_v14 = vmul.f32 %v9418_v34, %v1854_v5  ;;  %v1908_v34 = vsel %vm10442_vm11, %v1905_v52, %v1723_v31  ;;  %v8083_v5 = vpack.c.bf16 %v2116_v11, %v2115_v9  ;;  %v7082_v31 = vld [vmem:[#allocation9] ss:$0 sm:$0xff]  ;;  %vm5446_vm11 = vcmask 1046534  }
0x17a6   :  { %v1860_v45 = vmul.f32 %v9420_v50, %v1856_v13 }
0x17a7   :  { %v1890_v18 = vmul.f32 %v1886_v12, %v1859_v14  ;;  %v1867_v23 = vrot.slane %v1859_v14, 7  ;;  %v156_v14 = vld [vmem:[%s10426_s13] sm:$0xff] }
0x17a8   :  { %v1891_v26 = vmul.f32 %v1887_v16, %v1860_v45  ;;  %v1868_v32 = vrot.slane %v1860_v45, 6  ;;  %v9537_v42 = vpack.c.bf16 %v157_v43, %v156_v14  ;;  %v158_v16 = vld [vmem:[%s10426_s13 + $0x10] sm:$0xff]  ;;  %v159_v45 = vld [vmem:[%s10426_s13 + $0x18] sm:$0xff] }
0x17a9   :  { %v9489_v33 = vsel %vm10441_vm12, %v1907_v19, %v1890_v18  ;;  %v1880_v39 = vpop.permute.xlu1 %1879  ;;  %v9547_v6 = vpack.c.bf16 %v159_v45, %v158_v16  ;;  %v2117_v19 = vld [vmem:[%s10423_s10 + $0x10] sm:$0xff] }
0x17aa   :  { %v9492_v35 = vsel %vm10441_vm12, %v1908_v34, %v1891_v26  ;;  %v1918_v50 = vsel %vm1917_vm13, %v9489_v33, 0.0  ;;  %v1869_v29 = vsel %vm698_vm7, %v1868_v32, %v1867_v23  ;;  %v2118_v26 = vld [vmem:[%s10423_s10 + $0x18] sm:$0xff]  ;;  %vm4897_vm12 = vcmask 1045509  }
0x17ab   :  { %v1925_v36 = vsel %vm1917_vm13, %v9492_v35, 0.0  ;;  %v1919_v56 = vrot.slane %v1918_v50, 4  ;;  %v8086_v34 = vpack.c.bf16 %v2118_v26, %v2117_v19  ;;  %vm2554_vm13 = vcmask 64512  }
0x17ac   :  { %v1926_v60 = vrot.slane %v1925_v36, 4 }
0x17ad   :  { %v1920_v38 = vadd.f32 %v1919_v56, %v1918_v50 }
0x17ae   :  { %v1927_v48 = vadd.f32 %v1926_v60, %v1925_v36 }
0x17af   :  { %v1921_v44 = vrot.slane %v1920_v38, 2 }
0x17b0   :  { %v1928_v47 = vrot.slane %v1927_v48, 2 }
0x17b1   :  { %v1922_v49 = vadd.f32 %v1921_v44, %v1920_v38  ;;  %v8634_v38 = vld [vmem:[#allocation12] ss:$0 sm:$0xff] }
0x17b2   :  { %v1929_v53 = vadd.f32 %v1928_v47, %v1927_v48  ;;  %v9570_v48 = vadd.f32 %v8634_v38, %v9129_v51 }
0x17b3   :  { %v1923_v57 = vrot.slane %v1922_v49, 1 }
0x17b4   :  { %v1930_v30 = vrot.slane %v1929_v53, 1 }
0x17b5   :  { %v1924_v58 = vadd.f32 %v1923_v57, %v1922_v49 }
0x17b6   :  { %v1931_v4 = vadd.f32 %v1930_v30, %v1929_v53 }
0x17b7   :  { %v1937_v21 = vmul.f32 %v8411_v41, %v1924_v58 }
0x17b8   :  { %v1939_v10 = vmul.f32 %v8409_v1, %v1931_v4 }
0x17ba   :  { %v1953_v17 = vrot.slane %v1939_v10, 7 }
0x17bc   :  { %v1954_v59 = vsel %vm698_vm7, %v1953_v17, %v1937_v21  ;;  %v7086_v21 = vld [vmem:[#allocation2] ss:$0 sm:$0xff] }
0x17bd   :  { %1955 = vrot.lane.b32.xlu0 %v1954_v59, %s8834_s5 }
0x17c1   :  { %1862 = vperm.xlu0 %8279, %v9155_v27   ;;  %v2030_v27 = vld [vmem:[%s10421_s8] sm:$0xff] }
0x17c2   :  { %v8077_v8 = vpack.c.bf16 %v2031_v0, %v2030_v27 }
0x17c4   :  { %8078 = vmatpush3.bf16.msra.mxu1 %v8077_v8 }
0x17c5   :  { %1870 = vrot.lane.b32.xlu0 %v1869_v29, %s8834_s5  ;;  %8079 = vmatprep.subr.bf16.mxu1 %v8831_v37 }
0x182f   :  { %v1956_v46 = vpop.permute.xlu0 %1955 }
0x1830   :  { %7563 = vmatmul.mubr.msk.f32.vlgmr.msra.gmra.mrb[10].mxu0 %vm388_vm5, %v1956_v46 }
0x1831   :  { %7584 = vmatprep.mubr.msk.f32.mxu0 %vm8832_vm6, %v8830_v22  ;;  %8084 = vmatpush3.bf16.msra.mxu0 %v8083_v5 }
0x1832   :  { %8085 = vmatprep.subr.bf16.mxu0 %v8831_v37 }
0x1835   :  { %8087 = vmatpush3.bf16.msra.mxu0 %v8086_v34 }
0x1836   :  { %7598 = vmatprep.subr.mxu0 %v8830_v22 }
0x1840   :  { %v1863_v62 = vpop.permute.xlu0 %1862 }
0x1841   :  { %vm1864_vm14 = vcmp.eq.s32.totalorder %v1863_v62, 1 }
0x1842   :  { %v9506_v63 = vsel %vm1864_vm14, %v1880_v39, %v9410_v61  ;;  %v2033_v61 = vld [vmem:[%s10421_s8 + $0x18] sm:$0xff] }
0x1843   :  { %v2325_v20 = vrot.slane %v9506_v63, 1  ;;  %v8080_v24 = vpack.c.bf16 %v2033_v61, %v2032_v7 }
0x1844   :  { %v1871_v18 = vpop.permute.xlu0 %1870 }
0x1845   :  { %2328 = vrot.lane.b32.xlu1 %v2325_v20, %s8834_s5  ;;  %8081 = vmatpush3.bf16.msra.mxu1 %v8080_v24  ;;  %v1873_v52 = vsel %vm1864_vm14, %v1871_v18, %v9401_v15  ;;  %vm3251_vm14 = vcmask 1042434  }
0x1846   :  { %8088 = vmatprep.subr.bf16.mxu1 %v8831_v37 }
0x18b7   :  { %v2329_v27 = vpop.permute.xlu1 %2328 }
0x1903   :  { %v2025_v12 = vpop.f32.mrb[10].mxu0 }
0x1904   :  { %v2026_v40 = vadd.f32 %v7082_v31, %v2025_v12  ;;  %v7564_v13 = vpop.f32.mrb[11].mxu0 }
0x1906   :  { %8412 = vtanh.f32 %v2026_v40 }
0x1910   :  { %v8413_v55 = vpop.eup %8412 }
0x1911   :  { %7574 = vmatmul.mubr.msk.f32.vlgmr.msra.gmra.mrb[14].mxu1 %vm388_vm5, %v8413_v55 }
0x1912   :  { %8090 = vmatpush3.bf16.msra.mxu1 %v9537_v42  ;;  %7595 = vmatprep.mubr.msk.f32.mxu1 %vm8832_vm6, %v8830_v22 }
0x1913   :  { %8091 = vmatprep.subr.bf16.mxu1 %v8831_v37 }
0x1916   :  { %8093 = vmatpush3.bf16.msra.mxu1 %v9547_v6 }
0x1917   :  { %7603 = vmatprep.subr.mxu1 %v8830_v22 }
0x1919   :  { %7596 = vmatmul.mubr.msk.f32.vlgmr.msra.gmra.mrb[16].mxu1 %vm388_vm5, %v1873_v52 }
0x191a   :  { %7605 = vmatprep.mubr.msk.f32.mxu1 %vm8832_vm6, %v8830_v22 }
0x19e4   :  { %v2110_v50 = vpop.f32.mrb[14].mxu1 }
0x19e5   :  { %v2111_v15 = vadd.f32 %v7084_v28, %v2110_v50  ;;  %v7575_v36 = vpop.f32.mrb[15].mxu1 }
0x19e7   :  { %v2114_v56 = vmax.f32 %v2111_v15, 0.0 }
0x19e9   :  { %7585 = vmatmul.mubr.msk.f32.vlgmr.msra.gmra.mrb[12].mxu0 %vm388_vm5, %v2114_v56 }
0x19ea   :  { %7600 = vmatprep.mubr.msk.f32.mxu0 %vm8832_vm6, %v8830_v22 }
0x19ec   :  { %v2300_v60 = vpop.f32.mrb[16].mxu1 }
0x19ed   :  { %v2305_v44 = vrot.slane %v2300_v60, 1  ;;  %v7597_v47 = vpop.f32.mrb[17].mxu1  ;;  %v2308_v4 = vadd.f32 %v2300_v60, %v9134_v54 }
0x19ef   :  { %v2309_v49 = vadd.f32 %v2305_v44, %v9570_v48  ;;  %v7090_v62 = vmul.f32 -1.442695, %v2308_v4 }
0x19f1   :  { %8414 = vtanh.f32 %v2309_v49  ;;  %v7091_v57 = vmul.f32 -1.442695, %v2309_v49 }
0x19f3   :  { %8416 = vpow2.f32 %v7091_v57 }
0x19fb   :  { %v8415_v53 = vpop.eup %8414 }
0x19fc   :  { %2338 = vrot.lane.b32.xlu0 %v8415_v53, %s8833_s3 }
0x19fd   :  { %v8417_v30 = vpop.eup %8416 }
0x19fe   :  { %v2317_v58 = vadd.f32 1.0, %v8417_v30 }
0x1a00   :  { %8418 = vrcp.f32 %v2317_v58 }
0x1a01   :  { %8420 = vtanh.f32 %v2308_v4 }
0x1a0a   :  { %v8419_v1 = vpop.eup %8418 }
0x1a0b   :  { %v8421_v41 = vpop.eup %8420  ;;  %v2333_v0 = vmul.f32 %v8419_v1, %v2329_v27 }
0x1a6e   :  { %v2339_v10 = vpop.permute.xlu0 %2338 }
0x1a6f   :  { %v2343_v51 = vmul.f32 %v8419_v1, %v2339_v10 }
0x1a71   :  { %2348 = vrot.lane.b32.xlu0 %v2343_v51, %s8834_s5 }
0x1a75   :  { %2450 = vrot.lane.b32.xlu0 %v9492_v35, %s8834_s5 }
0x1a79   :  { %2336 = vrot.lane.b32.xlu0 %v8421_v41, %s8833_s3 }
0x1abc   :  { %v2195_v17 = vpop.f32.mrb[12].mxu0 }
0x1abd   :  { %v2196_v59 = vadd.f32 %v7086_v21, %v2195_v17  ;;  %v7586_v32 = vpop.f32.mrb[13].mxu0 }
0x1abf   :  { %v7088_v23 = vmul.f32 -1.442695, %v2196_v59 }
0x1ac1   :  { %8422 = vpow2.f32 %v7088_v23 }
0x1acb   :  { %v8423_v29 = vpop.eup %8422 }
0x1acc   :  { %v2202_v46 = vadd.f32 1.0, %v8423_v29 }
0x1ace   :  { %8424 = vrcp.f32 %v2202_v46 }
0x1acf   :  { %8426 = vpow2.f32 %v7090_v62 }
0x1ad8   :  { %v8425_v39 = vpop.eup %8424 }
0x1ad9   :  { %2206 = vst.msk [vmem:[%s10432_s19] sm:$0x3] %vm2205_vm15, %v8425_v39  ;;  %v8427_v35 = vpop.eup %8426  ;;  %vm3799_vm15 = vcmask 1043459  }
0x1ada   :  { %v2316_v20 = vadd.f32 1.0, %v8427_v35 }
0x1adc   :  { %8428 = vrcp.f32 %v2316_v20 }
0x1ae3   :  { %v2349_v7 = vpop.permute.xlu0 %2348 }
0x1ae4   :  { %v9582_v8 = vadd.f32 %v2349_v7, %v2333_v0 }
0x1ae6   :  { %8430 = vtanh.f32 %v9582_v8  ;;  %v8429_v24 = vpop.eup %8428 }
0x1ae7   :  { %v9585_v61 = vpop.permute.xlu0 %2450 }
0x1ae8   :  { %7604 = vmatpush3.xpose.msk.msra.mxu1 %vm388_vm5, %v9585_v61 }
0x1ae9   :  { %7613 = vmatprep.subr.mxu1 %v8830_v22 }
0x1aeb   :  { %v2337_v9 = vpop.permute.xlu0 %2336 }
0x1aec   :  { %v2342_v11 = vmul.f32 %v8429_v24, %v2337_v9 }
0x1aee   :  { %2346 = vrot.lane.b32.xlu0 %v2342_v11, %s8834_s5 }
0x1af0   :  { %v8431_v5 = vpop.eup %8430 }
0x1af1   :  { %2360 = vrot.lane.b32.xlu1 %v8431_v5, %s8833_s3  ;;  %v2891_v5 = vrot.slane %v9582_v8, 7 }
0x1b60   :  { %v2347_v43 = vpop.permute.xlu0 %2346 }
0x1b63   :  { %v2361_v31 = vpop.permute.xlu1 %2360 }
0x1b64   :  { %v2365_v12 = vmul.f32 %v8419_v1, %v2361_v31 }
0x1b66   :  { %2447 = vrot.lane.b32.xlu1 %v2365_v12, %s8834_s5  ;;  %v2702_v56 = vrot.slane %v2365_v12, 7 }
0x1b6a   :  { %2326 = vrot.lane.b32.xlu1 %v9506_v63, %s8834_s5  ;;  %v8844_v63 = vmov 1966171168  }
0x1b6b   :  { %v2208_v55 = vunpack.c.l.s4 %v8844_v63 }
0x1b6d   :  { %v2209_v18 = vunpack.c.0.s8 %v2208_v55 }
0x1b6f   :  { %v9605_v52 = vsub.s32 %v2209_v18, %v9044_v2 }
0x1b71   :  { %v9609_v19 = vrot.slane %v9150_v25, %v9605_v52 }
0x1b73   :  { %v2214_v26 = vcombine.high %v9609_v19, %v9609_v19 }
0x1b75   :  { %v9614_v34 = vrot.slane %v2214_v26, %v9605_v52 }
0x1b77   :  { %vm2527_vm1 = vcmp.gt.f32.partialorder %v9614_v34, 0.5 }
0x1bd8   :  { %v2448_v40 = vpop.permute.xlu1 %2447 }
0x1bd9   :  { %7606 = vmatmul.mubr.msk.f32.vlgmr.msra.gmra.mrb[18].mxu1 %vm388_vm5, %v2448_v40 }
0x1bda   :  { %7614 = vmatpush3.msra.mxu1 %v9585_v61  ;;  %7615 = vmatprep.mubr.msk.f32.mxu1 %vm8832_vm6, %v8830_v22 }
0x1bdb   :  { %8106 = vmatprep.subr.bf16.mxu1 %v8831_v37 }
0x1bdc   :  { %v2327_v13 = vpop.permute.xlu1 %2326 }
0x1bdd   :  { %v2332_v14 = vmul.f32 %v8429_v24, %v2327_v13 }
0x1bdf   :  { %v9600_v16 = vadd.f32 %v2347_v43, %v2332_v14 }
0x1be1   :  { %8432 = vtanh.f32 %v9600_v16  ;;  %v2890_v40 = vrot.slane %v9600_v16, 7 }
0x1beb   :  { %v8433_v45 = vpop.eup %8432 }
0x1bec   :  { %2358 = vrot.lane.b32.xlu0 %v8433_v45, %s8833_s3 }
0x1c5e   :  { %v2359_v36 = vpop.permute.xlu0 %2358 }
0x1c5f   :  { %v9620_v25 = vmul.f32 %v8429_v24, %v2359_v36 }
0x1c61   :  { %v2703_v60 = vsel %vm698_vm7, %v2702_v56, %v9620_v25 }
0x1cac   :  { %v2522_v28 = vpop.f32.mrb[18].mxu1 }
0x1cad   :  { %v2529_v50 = vsel %vm2527_vm1, %v2522_v28, -1e+09  ;;  %v7607_v15 = vpop.f32.mrb[19].mxu1 }
0x1cae   :  { %v2534_v2 = vsel %vm2530_vm2, %v2529_v50, -inf }
0x1caf   :  { %2535 = vmax.xlane.f32.xlu1 %v2534_v2 }
0x1cc0   :  { %2704 = vrot.lane.b32.xlu1 %v2703_v60, %s8834_s5 }
0x1d3c   :  { %v2536_v38 = vpop.xlane.xlu1 %2535 }
0x1d3d   :  { %v2538_v44 = vsub.f32 %v2529_v50, %v2536_v38 }
0x1d3f   :  { %v2541_v47 = vmul.f32 1.442695, %v2538_v44 }
0x1d40   :  { %v9633_v4 = vpop.permute.xlu1 %2704 }
0x1d41   :  { %8434 = vpow2.f32 %v2541_v47 }
0x1d4b   :  { %v8435_v49 = vpop.eup %8434 }
0x1d4c   :  { %v2546_v53 = vsel %vm2530_vm2, %v8435_v49, 0.0 }
0x1d4d   :  { %2547 = vadd.xlane.f32.xlu0 %v2546_v53 }
0x1dda   :  { %v2548_v57 = vpop.xlane.xlu0 %2547 }
0x1ddb   :  { %8436 = vrcp.f32 %v2548_v57 }
0x1de5   :  { %v8437_v30 = vpop.eup %8436 }
0x1de6   :  { %v2552_v58 = vmul.f32 %v8437_v30, %v8435_v49 }
0x1de8   :  { %7616 = vmatmul.mubr.msk.f32.vlgmr.msra.gmra.mrb[20].mxu1 %vm2554_vm13, %v2552_v58 }
0x1de9   :  { %8108 = vmatpush3.bf16.msra.mxu1 %v9537_v42  ;;  %7645 = vmatprep.mubr.msk.f32.mxu1 %vm8832_vm6, %v8830_v22 }
0x1dea   :  { %8109 = vmatprep.subr.bf16.mxu1 %v8831_v37 }
0x1ded   :  { %8111 = vmatpush3.bf16.msra.mxu1 %v9547_v6 }
0x1dee   :  { %7648 = vmatprep.subr.mxu1 %v8830_v22 }
0x1df0   :  { %7646 = vmatmul.mubr.msk.f32.vlgmr.msra.gmra.mrb[22].mxu1 %vm388_vm5, %v9633_v4 }
0x1df1   :  { %7650 = vmatprep.mubr.msk.f32.mxu1 %vm8832_vm6, %v8830_v22 }
0x1ebb   :  { %v9639_v1 = vpop.f32.mrb[20].mxu1 }
0x1ebc   :  { %v7617_v10 = vpop.f32.mrb[21].mxu1 }
0x1ec3   :  { %v2864_v51 = vpop.f32.mrb[22].mxu1 }
0x1ec4   :  { %v2869_v41 = vrot.slane %v2864_v51, 7  ;;  %v2873_v21 = vadd.f32 %v2864_v51, %v9570_v48  ;;  %v7647_v17 = vpop.f32.mrb[23].mxu1 }
0x1ec6   :  { %v2872_v59 = vadd.f32 %v2869_v41, %v9134_v54  ;;  %8438 = vtanh.f32 %v2873_v21  ;;  %v7102_v29 = vmul.f32 -1.442695, %v2873_v21 }
0x1ec8   :  { %8440 = vtanh.f32 %v2872_v59  ;;  %v7101_v46 = vmul.f32 -1.442695, %v2872_v59 }
0x1ec9   :  { %8442 = vpow2.f32 %v7102_v29 }
0x1eca   :  { %8444 = vpow2.f32 %v7101_v46 }
0x1ed0   :  { %v8439_v32 = vpop.eup %8438 }
0x1ed1   :  { %2900 = vrot.lane.b32.xlu1 %v8439_v32, %s8833_s3 }
0x1ed2   :  { %v8441_v23 = vpop.eup %8440 }
0x1ed3   :  { %2898 = vrot.lane.b32.xlu0 %v8441_v23, %s8833_s3  ;;  %v8443_v62 = vpop.eup %8442 }
0x1ed4   :  { %v8445_v39 = vpop.eup %8444  ;;  %v2881_v35 = vadd.f32 1.0, %v8443_v62 }
0x1ed5   :  { %v2880_v20 = vadd.f32 1.0, %v8445_v39 }
0x1ed6   :  { %8446 = vrcp.f32 %v2881_v35 }
0x1ed7   :  { %8448 = vrcp.f32 %v2880_v20 }
0x1ee0   :  { %v8447_v27 = vpop.eup %8446 }
0x1ee1   :  { %v8449_v24 = vpop.eup %8448  ;;  %v2895_v31 = vmul.f32 %v8447_v27, %v2891_v5 }
0x1ee2   :  { %v2894_v14 = vmul.f32 %v8449_v24, %v2890_v40 }
0x1f43   :  { %v2901_v0 = vpop.permute.xlu1 %2900 }
0x1f44   :  { %v2905_v7 = vmul.f32 %v8447_v27, %v2901_v0 }
0x1f45   :  { %v2899_v9 = vpop.permute.xlu0 %2898 }
0x1f46   :  { %2910 = vrot.lane.b32.xlu0 %v2905_v7, %s8834_s5  ;;  %v2904_v11 = vmul.f32 %v8449_v24, %v2899_v9 }
0x1f48   :  { %2908 = vrot.lane.b32.xlu1 %v2904_v11, %s8834_s5 }
0x1fb8   :  { %v2911_v12 = vpop.permute.xlu0 %2910 }
0x1fb9   :  { %v9649_v13 = vadd.f32 %v2911_v12, %v2895_v31 }
0x1fba   :  { %v2909_v43 = vpop.permute.xlu1 %2908 }
0x1fbb   :  { %8450 = vtanh.f32 %v9649_v13  ;;  %v9652_v45 = vadd.f32 %v2909_v43, %v2894_v14 }
0x1fbd   :  { %8452 = vtanh.f32 %v9652_v45 }
0x1fc5   :  { %v8451_v63 = vpop.eup %8450 }
0x1fc6   :  { %2922 = vrot.lane.b32.xlu0 %v8451_v63, %s8833_s3 }
0x1fc7   :  { %v8453_v55 = vpop.eup %8452 }
0x1fc8   :  { %2920 = vrot.lane.b32.xlu1 %v8453_v55, %s8833_s3 }
0x1fcc   :  { %2370 = vrot.lane.b32.xlu1 %v9489_v33, %s8834_s5 }
0x2038   :  { %v2923_v8 = vpop.permute.xlu0 %2922 }
0x2039   :  { %v2927_v16 = vmul.f32 %v8447_v27, %v2923_v8 }
0x203a   :  { %v2921_v28 = vpop.permute.xlu1 %2920 }
0x203b   :  { %v3005_v18 = vrot.slane %v2927_v16, 1  ;;  %v3250_v26 = vrot.slane %v2927_v16, 7  ;;  %v2926_v50 = vmul.f32 %v8449_v24, %v2921_v28 }
0x203d   :  { %3006 = vrot.lane.b32.xlu1 %v3005_v18, %s8834_s5  ;;  %v2929_v15 = vrot.slane %v2926_v50, 1  ;;  %v9661_v2 = vsel %vm3251_vm14, %v3250_v26, %v2926_v50  ;;  %v3439_v18 = vrot.slane %v9649_v13, 7 }
0x203e   :  { %v9663_v36 = vpop.permute.xlu1 %2370 }
0x203f   :  { %2930 = vrot.lane.b32.xlu0 %v2929_v15, %s8834_s5  ;;  %7599 = vmatpush3.xpose.msk.msra.mxu0 %vm388_vm5, %v9663_v36  ;;  %v3340_v33 = vsel %vm698_vm7, %v2927_v16, %v2929_v15  ;;  %v3438_v16 = vrot.slane %v9652_v45, 7 }
0x2040   :  { %7649 = vmatpush3.xpose.msk.msra.mxu1 %vm388_vm5, %v9663_v36  ;;  %7608 = vmatprep.subr.mxu0 %v8830_v22 }
0x2041   :  { %7653 = vmatprep.subr.mxu1 %v8830_v22 }
0x20af   :  { %v3007_v60 = vpop.permute.xlu1 %3006 }
0x20b1   :  { %v2931_v56 = vpop.permute.xlu0 %2930 }
0x20b2   :  { %7651 = vmatmul.mubr.msk.f32.vlgmr.msra.gmra.mrb[24].mxu1 %vm388_vm5, %v2931_v56 }
0x20b3   :  { %7654 = vmatpush3.xpose.msk.msra.mxu1 %vm388_vm5, %v9585_v61  ;;  %7655 = vmatprep.mubr.msk.f32.mxu1 %vm8832_vm6, %v8830_v22 }
0x20b4   :  { %7663 = vmatprep.subr.mxu1 %v8830_v22 }
0x20b6   :  { %7656 = vmatmul.mubr.msk.f32.vlgmr.msra.gmra.mrb[26].mxu1 %vm388_vm5, %v3007_v60 }
0x20b7   :  { %7664 = vmatpush3.msra.mxu1 %v9585_v61  ;;  %7665 = vmatprep.mubr.msk.f32.mxu1 %vm8832_vm6, %v8830_v22 }
0x20b8   :  { %8124 = vmatprep.subr.bf16.mxu1 %v8831_v37 }
0x2185   :  { %v9684_v38 = vpop.f32.mrb[24].mxu1 }
0x2186   :  { %v7652_v44 = vpop.f32.mrb[25].mxu1 }
0x2189   :  { %v3076_v47 = vpop.f32.mrb[26].mxu1 }
0x218a   :  { %v3081_v49 = vsel %vm2527_vm1, %v3076_v47, -1e+09  ;;  %v7657_v53 = vpop.f32.mrb[27].mxu1 }
0x218b   :  { %v3085_v57 = vsel %vm2530_vm2, %v3081_v49, -inf }
0x218c   :  { %3086 = vmax.xlane.f32.xlu0 %v3085_v57 }
0x21a2   :  { %3341 = vrot.lane.b32.xlu0 %v3340_v33, %s8834_s5 }
0x2219   :  { %v3087_v30 = vpop.xlane.xlu0 %3086 }
0x221a   :  { %v3089_v58 = vsub.f32 %v3081_v49, %v3087_v30 }
0x221c   :  { %v3092_v10 = vmul.f32 1.442695, %v3089_v58 }
0x221d   :  { %v3342_v32 = vpop.permute.xlu0 %3341 }
0x221e   :  { %8454 = vpow2.f32 %v3092_v10 }
0x2228   :  { %v8455_v51 = vpop.eup %8454 }
0x2229   :  { %v3097_v41 = vsel %vm2530_vm2, %v8455_v51, 0.0 }
0x222a   :  { %3098 = vadd.xlane.f32.xlu1 %v3097_v41 }
0x22b7   :  { %v3099_v21 = vpop.xlane.xlu1 %3098 }
0x22b8   :  { %8456 = vrcp.f32 %v3099_v21 }
0x22c2   :  { %v8457_v17 = vpop.eup %8456 }
0x22c3   :  { %v3103_v59 = vmul.f32 %v8457_v17, %v8455_v51 }
0x22c5   :  { %7666 = vmatmul.mubr.msk.f32.vlgmr.msra.gmra.mrb[28].mxu1 %vm2554_vm13, %v3103_v59 }
0x22c6   :  { %8126 = vmatpush3.bf16.msra.mxu1 %v9537_v42  ;;  %7695 = vmatprep.mubr.msk.f32.mxu1 %vm8832_vm6, %v8830_v22 }
0x22c7   :  { %8127 = vmatprep.subr.bf16.mxu1 %v8831_v37 }
0x22ca   :  { %8129 = vmatpush3.bf16.msra.mxu1 %v9547_v6 }
0x22cb   :  { %7698 = vmatprep.subr.mxu1 %v8830_v22 }
0x22cd   :  { %7696 = vmatmul.mubr.msk.f32.vlgmr.msra.gmra.mrb[30].mxu1 %vm388_vm5, %v3342_v32 }
0x22ce   :  { %7700 = vmatprep.mubr.msk.f32.mxu1 %vm8832_vm6, %v8830_v22 }
0x22d3   :  { %7699 = vmatpush3.xpose.msk.msra.mxu1 %vm388_vm5, %v9663_v36 }
0x22d4   :  { %7703 = vmatprep.subr.mxu1 %v8830_v22 }
0x2398   :  { %v9704_v23 = vpop.f32.mrb[28].mxu1 }
0x2399   :  { %v7667_v29 = vpop.f32.mrb[29].mxu1 }
0x23a0   :  { %v3411_v46 = vpop.f32.mrb[30].mxu1 }
0x23a1   :  { %v3416_v62 = vrot.slane %v3411_v46, 6  ;;  %v3417_v39 = vrot.slane %v3411_v46, 7  ;;  %v7697_v35 = vpop.f32.mrb[31].mxu1 }
0x23a3   :  { %v3420_v20 = vadd.f32 %v3416_v62, %v9134_v54  ;;  %v3421_v27 = vadd.f32 %v3417_v39, %v9570_v48 }
0x23a5   :  { %8458 = vtanh.f32 %v3420_v20  ;;  %v7111_v24 = vmul.f32 -1.442695, %v3420_v20  ;;  %v7112_v9 = vmul.f32 -1.442695, %v3421_v27 }
0x23a6   :  { %8460 = vtanh.f32 %v3421_v27 }
0x23a7   :  { %8462 = vpow2.f32 %v7111_v24 }
0x23a8   :  { %8464 = vpow2.f32 %v7112_v9 }
0x23af   :  { %v8459_v0 = vpop.eup %8458 }
0x23b0   :  { %v8461_v7 = vpop.eup %8460  ;;  %3446 = vrot.lane.b32.xlu1 %v8459_v0, %s8833_s3 }
0x23b1   :  { %3448 = vrot.lane.b32.xlu0 %v8461_v7, %s8833_s3  ;;  %v8463_v11 = vpop.eup %8462 }
0x23b2   :  { %v8465_v5 = vpop.eup %8464  ;;  %v3428_v31 = vadd.f32 1.0, %v8463_v11 }
0x23b3   :  { %v3429_v12 = vadd.f32 1.0, %v8465_v5 }
0x23b4   :  { %8466 = vrcp.f32 %v3428_v31 }
0x23b5   :  { %8468 = vrcp.f32 %v3429_v12 }
0x23be   :  { %v8467_v40 = vpop.eup %8466 }
0x23bf   :  { %v8469_v43 = vpop.eup %8468  ;;  %v3442_v26 = vmul.f32 %v8467_v40, %v3438_v16 }
0x23c0   :  { %v3443_v28 = vmul.f32 %v8469_v43, %v3439_v18 }
0x2422   :  { %v3447_v14 = vpop.permute.xlu1 %3446 }
0x2423   :  { %v3449_v63 = vpop.permute.xlu0 %3448  ;;  %v3452_v55 = vmul.f32 %v8467_v40, %v3447_v14 }
0x2424   :  { %v3453_v8 = vmul.f32 %v8469_v43, %v3449_v63 }
0x2425   :  { %3456 = vrot.lane.b32.xlu1 %v3452_v55, %s8834_s5 }
0x2426   :  { %3458 = vrot.lane.b32.xlu0 %v3453_v8, %s8834_s5 }
0x2497   :  { %v3457_v50 = vpop.permute.xlu1 %3456 }
0x2498   :  { %v3459_v15 = vpop.permute.xlu0 %3458  ;;  %v9714_v33 = vadd.f32 %v3457_v50, %v3442_v26 }
0x2499   :  { %v9716_v56 = vadd.f32 %v3459_v15, %v3443_v28 }
0x249a   :  { %8470 = vtanh.f32 %v9714_v33 }
0x249b   :  { %8472 = vtanh.f32 %v9716_v56 }
0x24a4   :  { %v8471_v60 = vpop.eup %8470 }
0x24a5   :  { %v8473_v44 = vpop.eup %8472  ;;  %3468 = vrot.lane.b32.xlu1 %v8471_v60, %s8833_s3 }
0x24a6   :  { %3470 = vrot.lane.b32.xlu0 %v8473_v44, %s8833_s3 }
0x2517   :  { %v3469_v45 = vpop.permute.xlu1 %3468 }
0x2518   :  { %v3471_v13 = vpop.permute.xlu0 %3470  ;;  %v3474_v47 = vmul.f32 %v8467_v40, %v3469_v45 }
0x2519   :  { %v3475_v49 = vmul.f32 %v8469_v43, %v3471_v13 }
0x251a   :  { %v3477_v53 = vrot.slane %v3474_v47, 2 }
0x251b   :  { %v3553_v57 = vrot.slane %v3475_v49, 2  ;;  %v3798_v30 = vrot.slane %v3475_v49, 7  ;;  %v3888_v58 = vrot.slane %v3475_v49, 1 }
0x251c   :  { %3478 = vrot.lane.b32.xlu1 %v3477_v53, %s8834_s5 }
0x251d   :  { %3554 = vrot.lane.b32.xlu0 %v3553_v57, %s8834_s5  ;;  %v3889_v10 = vsel %vm698_vm7, %v3888_v58, %v3477_v53  ;;  %v9726_v51 = vsel %vm3799_vm15, %v3798_v30, %v3474_v47  ;;  %v3987_v57 = vrot.slane %v9714_v33, 7 }
0x258e   :  { %v3479_v41 = vpop.permute.xlu1 %3478 }
0x258f   :  { %7701 = vmatmul.mubr.msk.f32.vlgmr.msra.gmra.mrb[32].mxu1 %vm388_vm5, %v3479_v41  ;;  %v3555_v21 = vpop.permute.xlu0 %3554 }
0x2590   :  { %7704 = vmatpush3.xpose.msk.msra.mxu1 %vm388_vm5, %v9585_v61  ;;  %7705 = vmatprep.mubr.msk.f32.mxu1 %vm8832_vm6, %v8830_v22 }
0x2591   :  { %7713 = vmatprep.subr.mxu1 %v8830_v22 }
0x2593   :  { %7706 = vmatmul.mubr.msk.f32.vlgmr.msra.gmra.mrb[34].mxu1 %vm388_vm5, %v3555_v21 }
0x2594   :  { %7714 = vmatpush3.msra.mxu1 %v9585_v61  ;;  %7715 = vmatprep.mubr.msk.f32.mxu1 %vm8832_vm6, %v8830_v22 }
0x2595   :  { %8142 = vmatprep.subr.bf16.mxu1 %v8831_v37 }
0x2662   :  { %v9739_v17 = vpop.f32.mrb[32].mxu1 }
0x2663   :  { %v7702_v59 = vpop.f32.mrb[33].mxu1 }
0x2666   :  { %v3624_v32 = vpop.f32.mrb[34].mxu1 }
0x2667   :  { %v3629_v29 = vsel %vm2527_vm1, %v3624_v32, -1e+09  ;;  %v7707_v46 = vpop.f32.mrb[35].mxu1 }
0x2668   :  { %v3633_v62 = vsel %vm2530_vm2, %v3629_v29, -inf }
0x2669   :  { %3634 = vmax.xlane.f32.xlu1 %v3633_v62 }
0x26f6   :  { %v3635_v39 = vpop.xlane.xlu1 %3634 }
0x26f7   :  { %v3637_v35 = vsub.f32 %v3629_v29, %v3635_v39 }
0x26f9   :  { %v3640_v20 = vmul.f32 1.442695, %v3637_v35 }
0x26fb   :  { %8474 = vpow2.f32 %v3640_v20 }
0x2705   :  { %v8475_v27 = vpop.eup %8474 }
0x2706   :  { %v3645_v0 = vsel %vm2530_vm2, %v8475_v27, 0.0 }
0x2707   :  { %3646 = vadd.xlane.f32.xlu0 %v3645_v0 }
0x271d   :  { %3890 = vrot.lane.b32.xlu0 %v3889_v10, %s8834_s5  ;;  %v3988_v10 = vrot.slane %v9716_v56, 7 }
0x2794   :  { %v3647_v7 = vpop.xlane.xlu0 %3646 }
0x2795   :  { %8476 = vrcp.f32 %v3647_v7 }
0x2798   :  { %v3891_v11 = vpop.permute.xlu0 %3890 }
0x279f   :  { %v8477_v24 = vpop.eup %8476 }
0x27a0   :  { %v3651_v9 = vmul.f32 %v8477_v24, %v8475_v27 }
0x27a2   :  { %7716 = vmatmul.mubr.msk.f32.vlgmr.msra.gmra.mrb[36].mxu1 %vm2554_vm13, %v3651_v9 }
0x27a3   :  { %8144 = vmatpush3.bf16.msra.mxu1 %v9537_v42  ;;  %7745 = vmatprep.mubr.msk.f32.mxu1 %vm8832_vm6, %v8830_v22 }
0x27a4   :  { %8145 = vmatprep.subr.bf16.mxu1 %v8831_v37 }
0x27a7   :  { %8147 = vmatpush3.bf16.msra.mxu1 %v9547_v6 }
0x27a8   :  { %7748 = vmatprep.subr.mxu1 %v8830_v22 }
0x27aa   :  { %7746 = vmatmul.mubr.msk.f32.vlgmr.msra.gmra.mrb[38].mxu1 %vm388_vm5, %v3891_v11 }
0x27ab   :  { %7750 = vmatprep.mubr.msk.f32.mxu1 %vm8832_vm6, %v8830_v22 }
0x27b0   :  { %7749 = vmatpush3.xpose.msk.msra.mxu1 %vm388_vm5, %v9663_v36 }
0x27b1   :  { %7753 = vmatprep.subr.mxu1 %v8830_v22 }
0x2875   :  { %v9759_v5 = vpop.f32.mrb[36].mxu1 }
0x2876   :  { %v7717_v31 = vpop.f32.mrb[37].mxu1 }
0x287d   :  { %v3960_v12 = vpop.f32.mrb[38].mxu1 }
0x287e   :  { %v3965_v40 = vrot.slane %v3960_v12, 5  ;;  %v3966_v14 = vrot.slane %v3960_v12, 6  ;;  %v7747_v43 = vpop.f32.mrb[39].mxu1 }
0x2880   :  { %v3969_v63 = vadd.f32 %v3965_v40, %v9134_v54  ;;  %v3970_v55 = vadd.f32 %v3966_v14, %v9570_v48 }
0x2882   :  { %8478 = vtanh.f32 %v3969_v63  ;;  %v7121_v18 = vmul.f32 -1.442695, %v3969_v63  ;;  %v7122_v26 = vmul.f32 -1.442695, %v3970_v55 }
0x2883   :  { %8480 = vtanh.f32 %v3970_v55 }
0x2884   :  { %8482 = vpow2.f32 %v7121_v18 }
0x2885   :  { %8484 = vpow2.f32 %v7122_v26 }
0x288c   :  { %v8479_v8 = vpop.eup %8478 }
0x288d   :  { %3995 = vrot.lane.b32.xlu1 %v8479_v8, %s8833_s3  ;;  %v8481_v16 = vpop.eup %8480 }
0x288e   :  { %v8483_v28 = vpop.eup %8482 }
0x288f   :  { %v3977_v50 = vadd.f32 1.0, %v8483_v28  ;;  %v8485_v15 = vpop.eup %8484 }
0x2890   :  { %v3978_v60 = vadd.f32 1.0, %v8485_v15 }
0x2891   :  { %3997 = vrot.lane.b32.xlu1 %v8481_v16, %s8833_s3  ;;  %8486 = vrcp.f32 %v3977_v50 }
0x2892   :  { %8488 = vrcp.f32 %v3978_v60 }
0x289b   :  { %v8487_v44 = vpop.eup %8486 }
0x289c   :  { %v8489_v47 = vpop.eup %8488  ;;  %v3991_v30 = vmul.f32 %v8487_v44, %v3987_v57 }
0x289d   :  { %v3992_v21 = vmul.f32 %v8489_v47, %v3988_v10 }
0x28ff   :  { %v3996_v45 = vpop.permute.xlu1 %3995 }
0x2900   :  { %v4001_v13 = vmul.f32 %v8487_v44, %v3996_v45 }
0x2902   :  { %4005 = vrot.lane.b32.xlu0 %v4001_v13, %s8834_s5 }
0x2903   :  { %v3998_v49 = vpop.permute.xlu1 %3997 }
0x2904   :  { %v4002_v53 = vmul.f32 %v8489_v47, %v3998_v49 }
0x2906   :  { %4007 = vrot.lane.b32.xlu1 %v4002_v53, %s8834_s5 }
0x2974   :  { %v4006_v58 = vpop.permute.xlu0 %4005 }
0x2975   :  { %v9769_v41 = vadd.f32 %v4006_v58, %v3991_v30 }
0x2977   :  { %8490 = vtanh.f32 %v9769_v41 }
0x2978   :  { %v4008_v59 = vpop.permute.xlu1 %4007 }
0x2979   :  { %v9772_v32 = vadd.f32 %v4008_v59, %v3992_v21 }
0x297b   :  { %8492 = vtanh.f32 %v9772_v32 }
0x2981   :  { %v8491_v29 = vpop.eup %8490 }
0x2982   :  { %4017 = vrot.lane.b32.xlu0 %v8491_v29, %s8833_s3 }
0x2985   :  { %v8493_v46 = vpop.eup %8492 }
0x2986   :  { %4019 = vrot.lane.b32.xlu1 %v8493_v46, %s8833_s3 }
0x29f4   :  { %v4018_v33 = vpop.permute.xlu0 %4017 }
0x29f5   :  { %v4023_v62 = vmul.f32 %v8487_v44, %v4018_v33 }
0x29f7   :  { %v4026_v39 = vrot.slane %v4023_v62, 3 }
0x29f8   :  { %v4020_v56 = vpop.permute.xlu1 %4019 }
0x29f9   :  { %v4024_v35 = vmul.f32 %v8489_v47, %v4020_v56  ;;  %4027 = vrot.lane.b32.xlu0 %v4026_v39, %s8834_s5 }
0x29fb   :  { %v4102_v20 = vrot.slane %v4024_v35, 3  ;;  %v4347_v27 = vrot.slane %v4024_v35, 7  ;;  %v4437_v0 = vrot.slane %v4024_v35, 2 }
0x29fd   :  { %4103 = vrot.lane.b32.xlu1 %v4102_v20, %s8834_s5  ;;  %v4438_v7 = vsel %vm698_vm7, %v4437_v0, %v4026_v39  ;;  %v9781_v24 = vsel %vm4348_vm0, %v4347_v27, %v4023_v62 }
0x2a6b   :  { %v4028_v9 = vpop.permute.xlu0 %4027 }
0x2a6c   :  { %7751 = vmatmul.mubr.msk.f32.vlgmr.msra.gmra.mrb[40].mxu1 %vm388_vm5, %v4028_v9  ;;  %v4537_v9 = vrot.slane %v9772_v32, 7 }
0x2a6d   :  { %7754 = vmatpush3.xpose.msk.msra.mxu1 %vm388_vm5, %v9585_v61  ;;  %7755 = vmatprep.mubr.msk.f32.mxu1 %vm8832_vm6, %v8830_v22 }
0x2a6e   :  { %7763 = vmatprep.subr.mxu1 %v8830_v22 }
0x2a6f   :  { %v4104_v11 = vpop.permute.xlu1 %4103 }
0x2a70   :  { %7756 = vmatmul.mubr.msk.f32.vlgmr.msra.gmra.mrb[42].mxu1 %vm388_vm5, %v4104_v11 }
0x2a71   :  { %7764 = vmatpush3.msra.mxu1 %v9585_v61  ;;  %7765 = vmatprep.mubr.msk.f32.mxu1 %vm8832_vm6, %v8830_v22 }
0x2a72   :  { %8160 = vmatprep.subr.bf16.mxu1 %v8831_v37 }
0x2b3f   :  { %v9794_v31 = vpop.f32.mrb[40].mxu1 }
0x2b40   :  { %v7752_v12 = vpop.f32.mrb[41].mxu1 }
0x2b43   :  { %v4173_v40 = vpop.f32.mrb[42].mxu1 }
0x2b44   :  { %v4178_v14 = vsel %vm2527_vm1, %v4173_v40, -1e+09  ;;  %v7757_v43 = vpop.f32.mrb[43].mxu1 }
0x2b45   :  { %v4182_v63 = vsel %vm2530_vm2, %v4178_v14, -inf }
0x2b46   :  { %4183 = vmax.xlane.f32.xlu0 %v4182_v63 }
0x2b5c   :  { %4439 = vrot.lane.b32.xlu0 %v4438_v7, %s8834_s5  ;;  %v4536_v7 = vrot.slane %v9769_v41, 7 }
0x2bd3   :  { %v4184_v55 = vpop.xlane.xlu0 %4183 }
0x2bd4   :  { %v4186_v8 = vsub.f32 %v4178_v14, %v4184_v55 }
0x2bd6   :  { %v4189_v16 = vmul.f32 1.442695, %v4186_v8 }
0x2bd7   :  { %v4440_v60 = vpop.permute.xlu0 %4439 }
0x2bd8   :  { %8494 = vpow2.f32 %v4189_v16 }
0x2be2   :  { %v8495_v18 = vpop.eup %8494 }
0x2be3   :  { %v4194_v26 = vsel %vm2530_vm2, %v8495_v18, 0.0 }
0x2be4   :  { %4195 = vadd.xlane.f32.xlu1 %v4194_v26 }
0x2c71   :  { %v4196_v28 = vpop.xlane.xlu1 %4195 }
0x2c72   :  { %8496 = vrcp.f32 %v4196_v28 }
0x2c7c   :  { %v8497_v50 = vpop.eup %8496 }
0x2c7d   :  { %v4200_v15 = vmul.f32 %v8497_v50, %v8495_v18 }
0x2c7f   :  { %7766 = vmatmul.mubr.msk.f32.vlgmr.msra.gmra.mrb[44].mxu1 %vm2554_vm13, %v4200_v15 }
0x2c80   :  { %8162 = vmatpush3.bf16.msra.mxu1 %v9537_v42  ;;  %7795 = vmatprep.mubr.msk.f32.mxu1 %vm8832_vm6, %v8830_v22 }
0x2c81   :  { %8163 = vmatprep.subr.bf16.mxu1 %v8831_v37 }
0x2c84   :  { %8165 = vmatpush3.bf16.msra.mxu1 %v9547_v6 }
0x2c85   :  { %7798 = vmatprep.subr.mxu1 %v8830_v22 }
0x2c87   :  { %7796 = vmatmul.mubr.msk.f32.vlgmr.msra.gmra.mrb[46].mxu1 %vm388_vm5, %v4440_v60 }
0x2c88   :  { %7800 = vmatprep.mubr.msk.f32.mxu1 %vm8832_vm6, %v8830_v22 }
0x2c8d   :  { %7799 = vmatpush3.xpose.msk.msra.mxu1 %vm388_vm5, %v9663_v36 }
0x2c8e   :  { %7803 = vmatprep.subr.mxu1 %v8830_v22 }
0x2d52   :  { %v9814_v44 = vpop.f32.mrb[44].mxu1 }
0x2d53   :  { %v7767_v45 = vpop.f32.mrb[45].mxu1 }
0x2d5a   :  { %v4509_v13 = vpop.f32.mrb[46].mxu1 }
0x2d5b   :  { %v4514_v47 = vrot.slane %v4509_v13, 4  ;;  %v4515_v49 = vrot.slane %v4509_v13, 5  ;;  %v7797_v53 = vpop.f32.mrb[47].mxu1 }
0x2d5d   :  { %v4518_v57 = vadd.f32 %v4514_v47, %v9134_v54  ;;  %v4519_v30 = vadd.f32 %v4515_v49, %v9570_v48 }
0x2d5f   :  { %8498 = vtanh.f32 %v4518_v57  ;;  %v7131_v21 = vmul.f32 -1.442695, %v4518_v57  ;;  %v7132_v59 = vmul.f32 -1.442695, %v4519_v30 }
0x2d60   :  { %8500 = vtanh.f32 %v4519_v30 }
0x2d61   :  { %8502 = vpow2.f32 %v7131_v21 }
0x2d62   :  { %8504 = vpow2.f32 %v7132_v59 }
0x2d69   :  { %v8499_v58 = vpop.eup %8498 }
0x2d6a   :  { %v8501_v10 = vpop.eup %8500  ;;  %4544 = vrot.lane.b32.xlu1 %v8499_v58, %s8833_s3 }
0x2d6b   :  { %4546 = vrot.lane.b32.xlu0 %v8501_v10, %s8833_s3  ;;  %v8503_v29 = vpop.eup %8502 }
0x2d6c   :  { %v8505_v46 = vpop.eup %8504  ;;  %v4526_v33 = vadd.f32 1.0, %v8503_v29 }
0x2d6d   :  { %v4527_v62 = vadd.f32 1.0, %v8505_v46 }
0x2d6e   :  { %8506 = vrcp.f32 %v4526_v33 }
0x2d6f   :  { %8508 = vrcp.f32 %v4527_v62 }
0x2d78   :  { %v8507_v39 = vpop.eup %8506 }
0x2d79   :  { %v8509_v35 = vpop.eup %8508  ;;  %v4540_v11 = vmul.f32 %v8507_v39, %v4536_v7 }
0x2d7a   :  { %v4541_v12 = vmul.f32 %v8509_v35, %v4537_v9 }
0x2ddc   :  { %v4545_v56 = vpop.permute.xlu1 %4544 }
0x2ddd   :  { %v4547_v20 = vpop.permute.xlu0 %4546  ;;  %v4550_v27 = vmul.f32 %v8507_v39, %v4545_v56 }
0x2dde   :  { %v4551_v0 = vmul.f32 %v8509_v35, %v4547_v20 }
0x2ddf   :  { %4554 = vrot.lane.b32.xlu1 %v4550_v27, %s8834_s5 }
0x2de0   :  { %4556 = vrot.lane.b32.xlu0 %v4551_v0, %s8834_s5 }
0x2e51   :  { %v4555_v40 = vpop.permute.xlu1 %4554 }
0x2e52   :  { %v4557_v14 = vpop.permute.xlu0 %4556  ;;  %v9824_v43 = vadd.f32 %v4555_v40, %v4540_v11 }
0x2e53   :  { %v9826_v63 = vadd.f32 %v4557_v14, %v4541_v12 }
0x2e54   :  { %8510 = vtanh.f32 %v9824_v43 }
0x2e55   :  { %8512 = vtanh.f32 %v9826_v63 }
0x2e5e   :  { %v8511_v55 = vpop.eup %8510 }
0x2e5f   :  { %v8513_v8 = vpop.eup %8512  ;;  %4566 = vrot.lane.b32.xlu1 %v8511_v55, %s8833_s3 }
0x2e60   :  { %4568 = vrot.lane.b32.xlu0 %v8513_v8, %s8833_s3 }
0x2ed1   :  { %v4567_v41 = vpop.permute.xlu1 %4566 }
0x2ed2   :  { %v4569_v32 = vpop.permute.xlu0 %4568  ;;  %v4572_v16 = vmul.f32 %v8507_v39, %v4567_v41 }
0x2ed3   :  { %v4573_v18 = vmul.f32 %v8509_v35, %v4569_v32 }
0x2ed4   :  { %v4575_v26 = vrot.slane %v4572_v16, 4 }
0x2ed5   :  { %v4651_v28 = vrot.slane %v4573_v18, 4  ;;  %v4896_v50 = vrot.slane %v4573_v18, 7  ;;  %v4986_v15 = vrot.slane %v4573_v18, 3 }
0x2ed6   :  { %4576 = vrot.lane.b32.xlu1 %v4575_v26, %s8834_s5 }
0x2ed7   :  { %4652 = vrot.lane.b32.xlu0 %v4651_v28, %s8834_s5  ;;  %v4987_v60 = vsel %vm698_vm7, %v4986_v15, %v4575_v26  ;;  %v9836_v45 = vsel %vm4897_vm12, %v4896_v50, %v4572_v16 }
0x2f48   :  { %v4577_v13 = vpop.permute.xlu1 %4576 }
0x2f49   :  { %7801 = vmatmul.mubr.msk.f32.vlgmr.msra.gmra.mrb[48].mxu1 %vm388_vm5, %v4577_v13  ;;  %v4653_v47 = vpop.permute.xlu0 %4652 }
0x2f4a   :  { %7804 = vmatpush3.xpose.msk.msra.mxu1 %vm388_vm5, %v9585_v61  ;;  %7805 = vmatprep.mubr.msk.f32.mxu1 %vm8832_vm6, %v8830_v22 }
0x2f4b   :  { %7813 = vmatprep.subr.mxu1 %v8830_v22 }
0x2f4d   :  { %7806 = vmatmul.mubr.msk.f32.vlgmr.msra.gmra.mrb[50].mxu1 %vm388_vm5, %v4653_v47 }
0x2f4e   :  { %7814 = vmatpush3.msra.mxu1 %v9585_v61  ;;  %7815 = vmatprep.mubr.msk.f32.mxu1 %vm8832_vm6, %v8830_v22 }
0x2f4f   :  { %8178 = vmatprep.subr.bf16.mxu1 %v8831_v37 }
0x301c   :  { %v9849_v49 = vpop.f32.mrb[48].mxu1 }
0x301d   :  { %v7802_v53 = vpop.f32.mrb[49].mxu1 }
0x3020   :  { %v4722_v57 = vpop.f32.mrb[50].mxu1 }
0x3021   :  { %v4727_v30 = vsel %vm2527_vm1, %v4722_v57, -1e+09  ;;  %v7807_v58 = vpop.f32.mrb[51].mxu1 }
0x3022   :  { %v4731_v10 = vsel %vm2530_vm2, %v4727_v30, -inf  ;;  %v5086_v58 = vrot.slane %v9826_v63, 7 }
0x3023   :  { %4732 = vmax.xlane.f32.xlu1 %v4731_v10 }
0x3034   :  { %2367 = vrot.lane.b32.xlu1 %v9620_v25, %s8834_s5 }
0x30b0   :  { %v4733_v21 = vpop.xlane.xlu1 %4732 }
0x30b1   :  { %v4735_v59 = vsub.f32 %v4727_v30, %v4733_v21  ;;  %v5085_v30 = vrot.slane %v9824_v43, 7 }
0x30b3   :  { %v4738_v29 = vmul.f32 1.442695, %v4735_v59 }
0x30b4   :  { %v2368_v46 = vpop.permute.xlu1 %2367 }
0x30b5   :  { %8514 = vpow2.f32 %v4738_v29  ;;  %7601 = vmatmul.mubr.msk.f32.vlgmr.msra.gmra.mrb[14].mxu0 %vm388_vm5, %v2368_v46 }
0x30b6   :  { %7609 = vmatpush3.msra.mxu0 %v9663_v36  ;;  %7610 = vmatprep.mubr.msk.f32.mxu0 %vm8832_vm6, %v8830_v22 }
0x30b7   :  { %8094 = vmatprep.subr.bf16.mxu0 %v8831_v37 }
0x30bf   :  { %v8515_v33 = vpop.eup %8514 }
0x30c0   :  { %v4743_v62 = vsel %vm2530_vm2, %v8515_v33, 0.0 }
0x30c1   :  { %4744 = vadd.xlane.f32.xlu0 %v4743_v62 }
0x30d7   :  { %4988 = vrot.lane.b32.xlu0 %v4987_v60, %s8834_s5 }
0x314e   :  { %v4745_v25 = vpop.xlane.xlu0 %4744 }
0x314f   :  { %8516 = vrcp.f32 %v4745_v25 }
0x3152   :  { %v4989_v35 = vpop.permute.xlu0 %4988 }
0x3159   :  { %v8517_v39 = vpop.eup %8516 }
0x315a   :  { %v4749_v56 = vmul.f32 %v8517_v39, %v8515_v33 }
0x315c   :  { %7816 = vmatmul.mubr.msk.f32.vlgmr.msra.gmra.mrb[52].mxu1 %vm2554_vm13, %v4749_v56 }
0x315d   :  { %8180 = vmatpush3.bf16.msra.mxu1 %v9537_v42  ;;  %7845 = vmatprep.mubr.msk.f32.mxu1 %vm8832_vm6, %v8830_v22 }
0x315e   :  { %8181 = vmatprep.subr.bf16.mxu1 %v8831_v37 }
0x3161   :  { %8183 = vmatpush3.bf16.msra.mxu1 %v9547_v6 }
0x3162   :  { %7848 = vmatprep.subr.mxu1 %v8830_v22 }
0x3164   :  { %7846 = vmatmul.mubr.msk.f32.vlgmr.msra.gmra.mrb[54].mxu1 %vm388_vm5, %v4989_v35 }
0x3165   :  { %7850 = vmatprep.mubr.msk.f32.mxu1 %vm8832_vm6, %v8830_v22 }
0x316a   :  { %7849 = vmatpush3.xpose.msk.msra.mxu1 %vm388_vm5, %v9663_v36 }
0x316b   :  { %7853 = vmatprep.subr.mxu1 %v8830_v22 }
0x3188   :  { %v2442_v20 = vpop.f32.mrb[14].mxu0 }
0x3189   :  { %v7602_v27 = vpop.f32.mrb[15].mxu0 }
0x322f   :  { %v9876_v0 = vpop.f32.mrb[52].mxu1 }
0x3230   :  { %v7817_v7 = vpop.f32.mrb[53].mxu1 }
0x3237   :  { %v5058_v9 = vpop.f32.mrb[54].mxu1 }
0x3238   :  { %v5063_v11 = vrot.slane %v5058_v9, 3  ;;  %v5064_v12 = vrot.slane %v5058_v9, 4  ;;  %v7847_v40 = vpop.f32.mrb[55].mxu1 }
0x323a   :  { %v5067_v14 = vadd.f32 %v5063_v11, %v9134_v54  ;;  %v5068_v55 = vadd.f32 %v5064_v12, %v9570_v48  ;;  %v2221_v11 = vrot.slane %v9609_v19, %v9605_v52 }
0x323c   :  { %8518 = vtanh.f32 %v5067_v14  ;;  %v7141_v32 = vmul.f32 -1.442695, %v5067_v14  ;;  %v7142_v16 = vmul.f32 -1.442695, %v5068_v55  ;;  %vm9901_vm10 = vcmp.gt.f32.partialorder %v2221_v11, 0.5 }
0x323d   :  { %8520 = vtanh.f32 %v5068_v55  ;;  %v2528_v40 = vsel %vm9901_vm10, %v2442_v20, -1e+09  ;;  %v3080_v55 = vsel %vm9901_vm10, %v9684_v38, -1e+09 }
0x323e   :  { %8522 = vpow2.f32 %v7141_v32  ;;  %v2531_v14 = vsel %vm2530_vm2, %v2528_v40, -inf  ;;  %v9917_v32 = vsel %vm9901_vm10, %v9739_v17, -1e+09 }
0x323f   :  { %8524 = vpow2.f32 %v7142_v16  ;;  %v3630_v20 = vsel %vm2530_vm2, %v9917_v32, -inf }
0x3246   :  { %v8519_v8 = vpop.eup %8518 }
0x3247   :  { %v8521_v41 = vpop.eup %8520  ;;  %5093 = vrot.lane.b32.xlu1 %v8519_v8, %s8833_s3  ;;  %v3082_v8 = vsel %vm2530_vm2, %v3080_v55, -inf }
0x3248   :  { %5095 = vrot.lane.b32.xlu0 %v8521_v41, %s8833_s3  ;;  %v8523_v18 = vpop.eup %8522 }
0x3249   :  { %v8525_v26 = vpop.eup %8524  ;;  %v5075_v28 = vadd.f32 1.0, %v8523_v18 }
0x324a   :  { %v5076_v50 = vadd.f32 1.0, %v8525_v26 }
0x324b   :  { %8526 = vrcp.f32 %v5075_v28 }
0x324c   :  { %8528 = vrcp.f32 %v5076_v50 }
0x3255   :  { %v8527_v15 = vpop.eup %8526 }
0x3256   :  { %v8529_v13 = vpop.eup %8528  ;;  %v5089_v10 = vmul.f32 %v8527_v15, %v5085_v30 }
0x3257   :  { %v5090_v21 = vmul.f32 %v8529_v13, %v5086_v58 }
0x32b9   :  { %v5094_v60 = vpop.permute.xlu1 %5093 }
0x32ba   :  { %v5096_v47 = vpop.permute.xlu0 %5095  ;;  %v5099_v53 = vmul.f32 %v8527_v15, %v5094_v60 }
0x32bb   :  { %v5100_v57 = vmul.f32 %v8529_v13, %v5096_v47 }
0x32bc   :  { %5103 = vrot.lane.b32.xlu1 %v5099_v53, %s8834_s5 }
0x32bd   :  { %5105 = vrot.lane.b32.xlu0 %v5100_v57, %s8834_s5 }
0x332e   :  { %v5104_v59 = vpop.permute.xlu1 %5103 }
0x332f   :  { %v5106_v29 = vpop.permute.xlu0 %5105  ;;  %v9886_v46 = vadd.f32 %v5104_v59, %v5089_v10 }
0x3330   :  { %v9888_v33 = vadd.f32 %v5106_v29, %v5090_v21 }
0x3331   :  { %8530 = vtanh.f32 %v9886_v46 }
0x3332   :  { %8532 = vtanh.f32 %v9888_v33 }
0x333b   :  { %v8531_v62 = vpop.eup %8530 }
0x333c   :  { %v8533_v25 = vpop.eup %8532  ;;  %5115 = vrot.lane.b32.xlu1 %v8531_v62, %s8833_s3 }
0x333d   :  { %5117 = vrot.lane.b32.xlu0 %v8533_v25, %s8833_s3 }
0x33ae   :  { %v5116_v43 = vpop.permute.xlu1 %5115 }
0x33af   :  { %v5118_v63 = vpop.permute.xlu0 %5117  ;;  %v5121_v39 = vmul.f32 %v8527_v15, %v5116_v43 }
0x33b0   :  { %v5122_v56 = vmul.f32 %v8529_v13, %v5118_v63 }
0x33b1   :  { %v5124_v35 = vrot.slane %v5121_v39, 5 }
0x33b2   :  { %v5200_v27 = vrot.slane %v5122_v56, 5  ;;  %v5445_v7 = vrot.slane %v5122_v56, 7  ;;  %v5535_v41 = vrot.slane %v5122_v56, 4 }
0x33b3   :  { %5125 = vrot.lane.b32.xlu1 %v5124_v35, %s8834_s5 }
0x33b4   :  { %5201 = vrot.lane.b32.xlu0 %v5200_v27, %s8834_s5  ;;  %v9897_v9 = vsel %vm5446_vm11, %v5445_v7, %v5121_v39  ;;  %v5536_v19 = vsel %vm698_vm7, %v5535_v41, %v5124_v35  ;;  %v160_v35 = vld [vmem:[%s10428_s15] sm:$0xff]  ;;  %v161_v27 = vld [vmem:[%s10428_s15 + $0x8] sm:$0xff]  ;;  %v162_v7 = vld [vmem:[%s10428_s15 + $0x10] sm:$0xff] }
0x33b5   :  { %v9954_v11 = vpack.c.bf16 %v161_v27, %v160_v35  ;;  %v3259_v27 = vrot.slane %v9704_v23, 6 }
0x33d7   :  { %2532 = vmax.xlane.f32.xlu1 %v2531_v14 }
0x33db   :  { %3083 = vmax.xlane.f32.xlu1 %v3082_v8  ;;  %v165_v8 = vld [vmem:[%s10428_s15 + $0x28] sm:$0xff] }
0x33ec   :  { %5537 = vrot.lane.b32.xlu1 %v5536_v19, %s8834_s5  ;;  %v166_v19 = vld [vmem:[%s10428_s15 + $0x30] sm:$0xff] }
0x3410   :  { %3631 = vmax.xlane.f32.xlu1 %v3630_v20  ;;  %v167_v20 = vld [vmem:[%s10428_s15 + $0x38] sm:$0xff] }
0x3421   :  { %3253 = vrot.lane.b32.xlu1 %v9661_v2, %s8834_s5 }
0x3425   :  { %v5126_v38 = vpop.permute.xlu1 %5125 }
0x3426   :  { %7851 = vmatmul.mubr.msk.f32.vlgmr.msra.gmra.mrb[56].mxu1 %vm388_vm5, %v5126_v38  ;;  %v5202_v17 = vpop.permute.xlu0 %5201  ;;  %v9980_v38 = vpack.c.bf16 %v167_v20, %v166_v19 }
0x3427   :  { %7854 = vmatpush3.xpose.msk.msra.mxu1 %vm388_vm5, %v9585_v61  ;;  %7855 = vmatprep.mubr.msk.f32.mxu1 %vm8832_vm6, %v8830_v22 }
0x3428   :  { %7863 = vmatprep.subr.mxu1 %v8830_v22 }
0x342a   :  { %7856 = vmatmul.mubr.msk.f32.vlgmr.msra.gmra.mrb[58].mxu1 %vm388_vm5, %v5202_v17  ;;  %v2709_v17 = vrot.slane %v9639_v1, 7 }
0x342b   :  { %7864 = vmatpush3.msra.mxu1 %v9585_v61  ;;  %7865 = vmatprep.mubr.msk.f32.mxu1 %vm8832_vm6, %v8830_v22 }
0x342c   :  { %8196 = vmatprep.subr.bf16.mxu1 %v8831_v37 }
0x3464   :  { %v2533_v2 = vpop.xlane.xlu1 %2532 }
0x3465   :  { %v2537_v16 = vsub.f32 %v2528_v40, %v2533_v2  ;;  %v163_v40 = vld [vmem:[%s10428_s15 + $0x18] sm:$0xff] }
0x3466   :  { %v9960_v14 = vpack.c.bf16 %v163_v40, %v162_v7 }
0x3467   :  { %v2539_v18 = vmul.f32 1.442695, %v2537_v16 }
0x3468   :  { %v3084_v10 = vpop.xlane.xlu1 %3083 }
0x3469   :  { %8534 = vpow2.f32 %v2539_v18  ;;  %v3088_v21 = vsub.f32 %v3080_v55, %v3084_v10  ;;  %v164_v55 = vld [vmem:[%s10428_s15 + $0x20] sm:$0xff] }
0x346a   :  { %v9970_v41 = vpack.c.bf16 %v165_v8, %v164_v55 }
0x346b   :  { %v3090_v62 = vmul.f32 1.442695, %v3088_v21 }
0x346c   :  { %v5538_v1 = vpop.permute.xlu1 %5537 }
0x3473   :  { %v8535_v26 = vpop.eup %8534 }
0x3474   :  { %v2543_v28 = vsel %vm2530_vm2, %v8535_v26, 0.0 }
0x3475   :  { %2544 = vadd.xlane.f32.xlu0 %v2543_v28 }
0x34f9   :  { %v9935_v50 = vpop.f32.mrb[56].mxu1 }
0x34fa   :  { %v7852_v15 = vpop.f32.mrb[57].mxu1 }
0x34fd   :  { %v5271_v60 = vpop.f32.mrb[58].mxu1 }
0x34fe   :  { %v5276_v13 = vsel %vm2527_vm1, %v5271_v60, -1e+09  ;;  %v7857_v47 = vpop.f32.mrb[59].mxu1 }
0x34ff   :  { %v5280_v53 = vsel %vm2530_vm2, %v5276_v13, -inf }
0x3500   :  { %5281 = vmax.xlane.f32.xlu0 %v5280_v53 }
0x3502   :  { %v2545_v57 = vpop.xlane.xlu0 %2544 }
0x3503   :  { %8536 = vrcp.f32 %v2545_v57 }
0x350d   :  { %v8537_v30 = vpop.eup %8536 }
0x350e   :  { %v2551_v58 = vmul.f32 %v8537_v30, %v8535_v26 }
0x3510   :  { %7611 = vmatmul.mubr.msk.f32.vlgmr.msra.gmra.mrb[16].mxu0 %vm2554_vm13, %v2551_v58 }
0x3511   :  { %7634 = vmatprep.mubr.msk.f32.mxu0 %vm8832_vm6, %v8830_v22  ;;  %8096 = vmatpush3.bf16.msra.mxu0 %v9954_v11 }
0x3512   :  { %8097 = vmatprep.subr.bf16.mxu0 %v8831_v37 }
0x3515   :  { %8099 = vmatpush3.bf16.msra.mxu0 %v9960_v14 }
0x3516   :  { %8100 = vmatprep.subr.bf16.mxu0 %v8831_v37 }
0x3519   :  { %8102 = vmatpush3.bf16.msra.mxu0 %v9970_v41 }
0x351a   :  { %8103 = vmatprep.subr.bf16.mxu0 %v8831_v37 }
0x351d   :  { %8105 = vmatpush3.bf16.msra.mxu0 %v9980_v38 }
0x351e   :  { %7658 = vmatprep.subr.mxu0 %v8830_v22 }
0x358d   :  { %v5282_v59 = vpop.xlane.xlu0 %5281 }
0x358e   :  { %v5284_v29 = vsub.f32 %v5276_v13, %v5282_v59 }
0x3590   :  { %v5287_v25 = vmul.f32 1.442695, %v5284_v29 }
0x3592   :  { %8538 = vpow2.f32 %v5287_v25 }
0x3593   :  { %8540 = vpow2.f32 %v3090_v62 }
0x359c   :  { %v8539_v43 = vpop.eup %8538 }
0x359d   :  { %v5292_v63 = vsel %vm2530_vm2, %v8539_v43, 0.0  ;;  %v8541_v39 = vpop.eup %8540 }
0x359e   :  { %5293 = vadd.xlane.f32.xlu0 %v5292_v63  ;;  %v3094_v56 = vsel %vm2530_vm2, %v8541_v39, 0.0 }
0x35a2   :  { %3095 = vadd.xlane.f32.xlu0 %v3094_v56  ;;  %v3632_v56 = vpop.xlane.xlu1 %3631 }
0x35a3   :  { %v3636_v7 = vsub.f32 %v9917_v32, %v3632_v56 }
0x35a5   :  { %v3638_v19 = vmul.f32 1.442695, %v3636_v7 }
0x35e3   :  { %v2624_v2 = vpop.f32.mrb[16].mxu0 }
0x35e4   :  { %v2710_v16 = vsel %vm698_vm7, %v2709_v17, %v2624_v2  ;;  %v7612_v18 = vpop.f32.mrb[17].mxu0 }
0x35e5   :  { %2711 = vrot.lane.b32.xlu0 %v2710_v16, %s8834_s5 }
0x362b   :  { %v5294_v26 = vpop.xlane.xlu0 %5293 }
0x362c   :  { %8542 = vrcp.f32 %v5294_v26 }
0x362f   :  { %v3096_v60 = vpop.xlane.xlu0 %3095 }
0x3630   :  { %8544 = vrcp.f32 %v3096_v60 }
0x3636   :  { %v8543_v28 = vpop.eup %8542 }
0x3637   :  { %v5298_v15 = vmul.f32 %v8543_v28, %v8539_v43 }
0x3639   :  { %7866 = vmatmul.mubr.msk.f32.vlgmr.msra.gmra.mrb[60].mxu1 %vm2554_vm13, %v5298_v15 }
0x363a   :  { %8198 = vmatpush3.bf16.msra.mxu1 %v9537_v42  ;;  %7895 = vmatprep.mubr.msk.f32.mxu1 %vm8832_vm6, %v8830_v22  ;;  %v8545_v47 = vpop.eup %8544 }
0x363b   :  { %8199 = vmatprep.subr.bf16.mxu1 %v8831_v37  ;;  %v3102_v57 = vmul.f32 %v8545_v47, %v8541_v39 }
0x363e   :  { %8201 = vmatpush3.bf16.msra.mxu1 %v9547_v6 }
0x363f   :  { %7898 = vmatprep.subr.mxu1 %v8830_v22 }
0x3641   :  { %7896 = vmatmul.mubr.msk.f32.vlgmr.msra.gmra.mrb[62].mxu1 %vm388_vm5, %v5538_v1 }
0x3642   :  { %7900 = vmatprep.mubr.msk.f32.mxu1 %vm8832_vm6, %v8830_v22 }
0x3647   :  { %7899 = vmatpush3.xpose.msk.msra.mxu1 %vm388_vm5, %v9663_v36 }
0x3648   :  { %7903 = vmatprep.subr.mxu1 %v8830_v22 }
0x3657   :  { %v2712_v13 = vpop.permute.xlu0 %2711 }
0x3658   :  { %v2714_v53 = vsel %vm388_vm5, %v9633_v4, %v2712_v13 }
0x3659   :  { %7635 = vmatmul.mubr.msk.f32.vlgmr.msra.gmra.mrb[18].mxu0 %vm2721_vm9, %v2714_v53 }
0x365a   :  { %7659 = vmatpush3.msra.mxu0 %v9663_v36  ;;  %7660 = vmatprep.mubr.msk.f32.mxu0 %vm8832_vm6, %v8830_v22 }
0x365b   :  { %8112 = vmatprep.subr.bf16.mxu0 %v8831_v37 }
0x365d   :  { %7661 = vmatmul.mubr.msk.f32.vlgmr.msra.gmra.mrb[20].mxu0 %vm2554_vm13, %v3102_v57  ;;  %v3254_v57 = vpop.permute.xlu1 %3253 }
0x365e   :  { %8114 = vmatpush3.bf16.msra.mxu0 %v9954_v11  ;;  %7684 = vmatprep.mubr.msk.f32.mxu0 %vm8832_vm6, %v8830_v22 }
0x365f   :  { %8115 = vmatprep.subr.bf16.mxu0 %v8831_v37 }
0x3662   :  { %8117 = vmatpush3.bf16.msra.mxu0 %v9960_v14 }
0x3663   :  { %8118 = vmatprep.subr.bf16.mxu0 %v8831_v37 }
0x3666   :  { %8120 = vmatpush3.bf16.msra.mxu0 %v9970_v41 }
0x3667   :  { %8121 = vmatprep.subr.bf16.mxu0 %v8831_v37 }
0x366a   :  { %8123 = vmatpush3.bf16.msra.mxu0 %v9980_v38 }
0x366b   :  { %7708 = vmatprep.subr.mxu0 %v8830_v22 }
0x370c   :  { %v10019_v4 = vpop.f32.mrb[60].mxu1 }
0x370d   :  { %v7867_v30 = vpop.f32.mrb[61].mxu1 }
0x3714   :  { %v5607_v58 = vpop.f32.mrb[62].mxu1 }
0x3715   :  { %v5612_v10 = vrot.slane %v5607_v58, 2  ;;  %v5613_v21 = vrot.slane %v5607_v58, 3  ;;  %v7897_v59 = vpop.f32.mrb[63].mxu1 }
0x3717   :  { %v5616_v29 = vadd.f32 %v5612_v10, %v9134_v54  ;;  %v5617_v62 = vadd.f32 %v5613_v21, %v9570_v48 }
0x3719   :  { %8546 = vtanh.f32 %v5616_v29  ;;  %v7151_v2 = vmul.f32 -1.442695, %v5616_v29  ;;  %v7152_v16 = vmul.f32 -1.442695, %v5617_v62  ;;  %v5634_v29 = vrot.slane %v9886_v46, 7 }
0x371a   :  { %8548 = vtanh.f32 %v5617_v62 }
0x371b   :  { %8550 = vpow2.f32 %v3638_v19 }
0x371c   :  { %8552 = vpow2.f32 %v7151_v2 }
0x371d   :  { %8554 = vpow2.f32 %v7152_v16 }
0x3723   :  { %v8547_v25 = vpop.eup %8546 }
0x3724   :  { %5642 = vrot.lane.b32.xlu0 %v8547_v25, %s8833_s3  ;;  %v8549_v43 = vpop.eup %8548 }
0x3725   :  { %v8551_v20 = vpop.eup %8550 }
0x3726   :  { %v3642_v17 = vsel %vm2530_vm2, %v8551_v20, 0.0  ;;  %v8553_v18 = vpop.eup %8552 }
0x3727   :  { %v5624_v23 = vadd.f32 1.0, %v8553_v18  ;;  %v8555_v26 = vpop.eup %8554 }
0x3728   :  { %5644 = vrot.lane.b32.xlu0 %v8549_v43, %s8833_s3  ;;  %v5625_v32 = vadd.f32 1.0, %v8555_v26  ;;  %v5635_v43 = vrot.slane %v9888_v33, 7 }
0x3729   :  { %8556 = vrcp.f32 %v5624_v23  ;;  %v10069_v23 = vld [vmem:[#allocation14] ss:$0 sm:$0xff] }
0x372a   :  { %8558 = vrcp.f32 %v5625_v32 }
0x372c   :  { %v10025_v63 = vpop.f32.mrb[18].mxu0 }
0x372d   :  { %v7636_v39 = vpop.f32.mrb[19].mxu0  ;;  %v2792_v26 = vadd.f32 %v10069_v23, %v10025_v63 }
0x3730   :  { %v3173_v35 = vpop.f32.mrb[20].mxu0 }
0x3731   :  { %v3258_v40 = vrot.slane %v3173_v35, 7  ;;  %v7662_v55 = vpop.f32.mrb[21].mxu0 }
0x3733   :  { %v3260_v8 = vsel %vm3251_vm14, %v3259_v27, %v3258_v40  ;;  %v8557_v28 = vpop.eup %8556  ;;  %vm5995_vm14 = vcmask 1047559  }
0x3734   :  { %v8559_v60 = vpop.eup %8558  ;;  %v5638_v62 = vmul.f32 %v8557_v28, %v5634_v29 }
0x3735   :  { %v5639_v56 = vmul.f32 %v8559_v60, %v5635_v43 }
0x3747   :  { %3643 = vadd.xlane.f32.xlu0 %v3642_v17 }
0x375d   :  { %3261 = vrot.lane.b32.xlu0 %v3260_v8, %s8834_s5 }
0x3796   :  { %v5643_v15 = vpop.permute.xlu0 %5642 }
0x3797   :  { %v5648_v1 = vmul.f32 %v8557_v28, %v5643_v15 }
0x3799   :  { %5652 = vrot.lane.b32.xlu1 %v5648_v1, %s8834_s5 }
0x379a   :  { %v5645_v13 = vpop.permute.xlu0 %5644 }
0x379b   :  { %v5649_v47 = vmul.f32 %v8559_v60, %v5645_v13 }
0x379d   :  { %5654 = vrot.lane.b32.xlu1 %v5649_v47, %s8834_s5  ;;  %v3807_v47 = vrot.slane %v9759_v5, 5 }
0x37d4   :  { %v3644_v53 = vpop.xlane.xlu0 %3643 }
0x37d5   :  { %8560 = vrcp.f32 %v3644_v53 }
0x37d8   :  { %v3262_v30 = vpop.permute.xlu0 %3261 }
0x37d9   :  { %v3264_v58 = vsel %vm388_vm5, %v3254_v57, %v3262_v30 }
0x37da   :  { %v3266_v10 = vrot.slane %v3264_v58, 1 }
0x37dc   :  { %7685 = vmatmul.mubr.msk.f32.vlgmr.msra.gmra.mrb[22].mxu0 %vm2721_vm9, %v3266_v10 }
0x37dd   :  { %7709 = vmatpush3.msra.mxu0 %v9663_v36  ;;  %7710 = vmatprep.mubr.msk.f32.mxu0 %vm8832_vm6, %v8830_v22 }
0x37de   :  { %8130 = vmatprep.subr.bf16.mxu0 %v8831_v37 }
0x37df   :  { %v8561_v21 = vpop.eup %8560 }
0x37e0   :  { %v3650_v59 = vmul.f32 %v8561_v21, %v8551_v20 }
0x37e2   :  { %7711 = vmatmul.mubr.msk.f32.vlgmr.msra.gmra.mrb[24].mxu0 %vm2554_vm13, %v3650_v59 }
0x37e3   :  { %8132 = vmatpush3.bf16.msra.mxu0 %v9954_v11  ;;  %7734 = vmatprep.mubr.msk.f32.mxu0 %vm8832_vm6, %v8830_v22 }
0x37e4   :  { %8133 = vmatprep.subr.bf16.mxu0 %v8831_v37 }
0x37e7   :  { %8135 = vmatpush3.bf16.msra.mxu0 %v9960_v14 }
0x37e8   :  { %8136 = vmatprep.subr.bf16.mxu0 %v8831_v37 }
0x37eb   :  { %8138 = vmatpush3.bf16.msra.mxu0 %v9970_v41 }
0x37ec   :  { %8139 = vmatprep.subr.bf16.mxu0 %v8831_v37 }
0x37ef   :  { %8141 = vmatpush3.bf16.msra.mxu0 %v9980_v38 }
0x37f0   :  { %7758 = vmatprep.subr.mxu0 %v8830_v22 }
0x380b   :  { %v5653_v25 = vpop.permute.xlu1 %5652 }
0x380c   :  { %v10053_v39 = vadd.f32 %v5653_v25, %v5638_v62 }
0x380e   :  { %8562 = vtanh.f32 %v10053_v39 }
0x380f   :  { %v5655_v35 = vpop.permute.xlu1 %5654 }
0x3810   :  { %v10056_v27 = vadd.f32 %v5655_v35, %v5639_v56 }
0x3812   :  { %8564 = vtanh.f32 %v10056_v27 }
0x3813   :  { %8566 = vtanh.f32 %v2792_v26 }
0x3818   :  { %v8563_v7 = vpop.eup %8562 }
0x3819   :  { %5664 = vrot.lane.b32.xlu1 %v8563_v7, %s8833_s3 }
0x381c   :  { %v8565_v40 = vpop.eup %8564 }
0x381d   :  { %5666 = vrot.lane.b32.xlu1 %v8565_v40, %s8833_s3  ;;  %v8567_v30 = vpop.eup %8566 }
0x381e   :  { %v6643_v58 = vrot.slane %v8567_v30, %v9605_v52 }
0x3820   :  { %v6644_v21 = vcombine.high %v6643_v58, %v6643_v58  ;;  %v6651_v62 = vrot.slane %v6643_v58, %v9605_v52 }
0x3822   :  { %v6658_v43 = vrot.slane %v6644_v21, %v9605_v52 }
0x388b   :  { %v5665_v46 = vpop.permute.xlu1 %5664 }
0x388c   :  { %v5670_v55 = vmul.f32 %v8557_v28, %v5665_v46  ;;  %v4177_v28 = vsel %vm9901_vm10, %v9794_v31, -1e+09 }
0x388e   :  { %v5673_v8 = vrot.slane %v5670_v55, 6 }
0x388f   :  { %v5667_v33 = vpop.permute.xlu1 %5666 }
0x3890   :  { %v5671_v19 = vmul.f32 %v8559_v60, %v5667_v33  ;;  %5674 = vrot.lane.b32.xlu1 %v5673_v8, %s8834_s5  ;;  %v4179_v60 = vsel %vm2530_vm2, %v4177_v28, -inf }
0x3892   :  { %v5749_v20 = vrot.slane %v5671_v19, 6  ;;  %v5994_v17 = vrot.slane %v5671_v19, 7  ;;  %v6084_v2 = vrot.slane %v5671_v19, 5 }
0x3894   :  { %5750 = vrot.lane.b32.xlu0 %v5749_v20, %s8834_s5  ;;  %v10064_v16 = vsel %vm698_vm7, %v6084_v2, %v5673_v8  ;;  %v10067_v18 = vsel %vm5995_vm14, %v5994_v17, %v5670_v55  ;;  %v4726_v17 = vsel %vm9901_vm10, %v9849_v49, -1e+09 }
0x3895   :  { %v4728_v2 = vsel %vm2530_vm2, %v4726_v17, -inf }
0x38af   :  { %v3335_v32 = vpop.f32.mrb[22].mxu0 }
0x38b0   :  { %v3336_v15 = vadd.f32 %v10069_v23, %v3335_v32  ;;  %v7686_v1 = vpop.f32.mrb[23].mxu0 }
0x38b2   :  { %8568 = vtanh.f32 %v3336_v15 }
0x38b4   :  { %4180 = vmax.xlane.f32.xlu1 %v4179_v60 }
0x38b5   :  { %v3721_v13 = vpop.f32.mrb[24].mxu0 }
0x38b6   :  { %v3806_v53 = vrot.slane %v3721_v13, 6  ;;  %v7712_v57 = vpop.f32.mrb[25].mxu0 }
0x38b8   :  { %v3808_v63 = vsel %vm3799_vm15, %v3807_v47, %v3806_v53 }
0x38bc   :  { %v8569_v10 = vpop.eup %8568 }
0x38bd   :  { %v6668_v31 = vrot.slane %v8569_v10, %v9605_v52 }
0x38bf   :  { %v6669_v59 = vcombine.high %v6668_v31, %v6668_v31  ;;  %v6676_v29 = vrot.slane %v6668_v31, %v9605_v52 }
0x38c1   :  { %v6683_v25 = vrot.slane %v6669_v59, %v9605_v52  ;;  %v6825_v5 = vrot.slane %v6676_v29, %v9047_v3 }
0x38c3   :  { %v6829_v56 = vrot.slane %v6683_v25, %v9047_v3  ;;  %v10089_v35 = vsel %vm209_vm3, %v6651_v62, %v6825_v5 }
0x38c5   :  { %3809 = vrot.lane.b32.xlu1 %v3808_v63, %s8834_s5  ;;  %v10093_v7 = vsel %vm209_vm3, %v6658_v43, %v6829_v56  ;;  %v5275_v43 = vsel %vm9901_vm10, %v9935_v50, -1e+09 }
0x38c6   :  { %v5277_v56 = vsel %vm2530_vm2, %v5275_v43, -inf }
0x3902   :  { %v5675_v40 = vpop.permute.xlu1 %5674 }
0x3903   :  { %7901 = vmatmul.mubr.msk.f32.vlgmr.msra.gmra.mrb[64].mxu1 %vm388_vm5, %v5675_v40 }
0x3904   :  { %7904 = vmatpush3.xpose.msk.msra.mxu1 %vm388_vm5, %v9585_v61  ;;  %7905 = vmatprep.mubr.msk.f32.mxu1 %vm8832_vm6, %v8830_v22 }
0x3905   :  { %7913 = vmatprep.subr.mxu1 %v8830_v22 }
0x3906   :  { %v5751_v46 = vpop.permute.xlu0 %5750 }
0x3907   :  { %7906 = vmatmul.mubr.msk.f32.vlgmr.msra.gmra.mrb[66].mxu1 %vm388_vm5, %v5751_v46 }
0x3908   :  { %7914 = vmatpush3.msra.mxu1 %v9585_v61  ;;  %7915 = vmatprep.mubr.msk.f32.mxu1 %vm8832_vm6, %v8830_v22 }
0x3909   :  { %8214 = vmatprep.subr.bf16.mxu1 %v8831_v37 }
0x3941   :  { %v4181_v55 = vpop.xlane.xlu1 %4180 }
0x3942   :  { %v4185_v8 = vsub.f32 %v4177_v28, %v4181_v55 }
0x3944   :  { %v4187_v33 = vmul.f32 1.442695, %v4185_v8  ;;  %v4356_v8 = vrot.slane %v9814_v44, 4 }
0x3946   :  { %8570 = vpow2.f32 %v4187_v33 }
0x3950   :  { %v8571_v19 = vpop.eup %8570 }
0x3951   :  { %v4191_v20 = vsel %vm2530_vm2, %v8571_v19, 0.0 }
0x3952   :  { %4192 = vadd.xlane.f32.xlu0 %v4191_v20 }
0x3968   :  { %3801 = vrot.lane.b32.xlu0 %v9726_v51, %s8834_s5  ;;  %v3810_v51 = vpop.permute.xlu1 %3809 }
0x3987   :  { %4729 = vmax.xlane.f32.xlu0 %v4728_v2 }
0x39d6   :  { %v10113_v26 = vpop.f32.mrb[64].mxu1 }
0x39d7   :  { %v7902_v32 = vpop.f32.mrb[65].mxu1 }
0x39da   :  { %v5820_v28 = vpop.f32.mrb[66].mxu1 }
0x39db   :  { %v5825_v15 = vsel %vm2527_vm1, %v5820_v28, -1e+09  ;;  %v7907_v1 = vpop.f32.mrb[67].mxu1 }
0x39dc   :  { %v5829_v60 = vsel %vm2530_vm2, %v5825_v15, -inf }
0x39dd   :  { %5830 = vmax.xlane.f32.xlu1 %v5829_v60 }
0x39df   :  { %v4193_v13 = vpop.xlane.xlu0 %4192 }
0x39e0   :  { %8572 = vrcp.f32 %v4193_v13 }
0x39e3   :  { %v3802_v47 = vpop.permute.xlu0 %3801 }
0x39e4   :  { %v3812_v49 = vsel %vm388_vm5, %v3802_v47, %v3810_v51 }
0x39e5   :  { %v3814_v53 = vrot.slane %v3812_v49, 2 }
0x39e7   :  { %7735 = vmatmul.mubr.msk.f32.vlgmr.msra.gmra.mrb[26].mxu0 %vm2721_vm9, %v3814_v53 }
0x39e8   :  { %7759 = vmatpush3.msra.mxu0 %v9663_v36  ;;  %7760 = vmatprep.mubr.msk.f32.mxu0 %vm8832_vm6, %v8830_v22 }
0x39e9   :  { %8148 = vmatprep.subr.bf16.mxu0 %v8831_v37 }
0x39ea   :  { %v8573_v57 = vpop.eup %8572 }
0x39eb   :  { %v4199_v30 = vmul.f32 %v8573_v57, %v8571_v19 }
0x39ed   :  { %7761 = vmatmul.mubr.msk.f32.vlgmr.msra.gmra.mrb[28].mxu0 %vm2554_vm13, %v4199_v30 }
0x39ee   :  { %8150 = vmatpush3.bf16.msra.mxu0 %v9954_v11  ;;  %7784 = vmatprep.mubr.msk.f32.mxu0 %vm8832_vm6, %v8830_v22 }
0x39ef   :  { %8151 = vmatprep.subr.bf16.mxu0 %v8831_v37 }
0x39f2   :  { %8153 = vmatpush3.bf16.msra.mxu0 %v9960_v14 }
0x39f3   :  { %8154 = vmatprep.subr.bf16.mxu0 %v8831_v37 }
0x39f6   :  { %8156 = vmatpush3.bf16.msra.mxu0 %v9970_v41 }
0x39f7   :  { %8157 = vmatprep.subr.bf16.mxu0 %v8831_v37 }
0x39fa   :  { %8159 = vmatpush3.bf16.msra.mxu0 %v9980_v38 }
0x39fb   :  { %7808 = vmatprep.subr.mxu0 %v8830_v22 }
0x3a14   :  { %v4730_v63 = vpop.xlane.xlu0 %4729 }
0x3a15   :  { %v4734_v58 = vsub.f32 %v4726_v17, %v4730_v63 }
0x3a17   :  { %v4736_v10 = vmul.f32 1.442695, %v4734_v58 }
0x3a19   :  { %8574 = vpow2.f32 %v4736_v10 }
0x3a23   :  { %v8575_v31 = vpop.eup %8574 }
0x3a24   :  { %v4740_v21 = vsel %vm2530_vm2, %v8575_v31, 0.0 }
0x3a25   :  { %4741 = vadd.xlane.f32.xlu1 %v4740_v21 }
0x3a36   :  { %4350 = vrot.lane.b32.xlu1 %v9781_v24, %s8834_s5 }
0x3a6a   :  { %v5831_v59 = vpop.xlane.xlu1 %5830 }
0x3a6b   :  { %v5833_v29 = vsub.f32 %v5825_v15, %v5831_v59 }
0x3a6d   :  { %v5836_v62 = vmul.f32 1.442695, %v5833_v29 }
0x3a6f   :  { %8576 = vpow2.f32 %v5836_v62 }
0x3a79   :  { %v8577_v25 = vpop.eup %8576 }
0x3a7a   :  { %v5841_v5 = vsel %vm2530_vm2, %v8577_v25, 0.0 }
0x3a7b   :  { %5842 = vadd.xlane.f32.xlu0 %v5841_v5 }
0x3a91   :  { %6086 = vrot.lane.b32.xlu0 %v10064_v16, %s8834_s5 }
0x3ab0   :  { %5278 = vmax.xlane.f32.xlu0 %v5277_v56 }
0x3aba   :  { %v3883_v40 = vpop.f32.mrb[26].mxu0 }
0x3abb   :  { %v3884_v24 = vadd.f32 %v10069_v23, %v3883_v40  ;;  %v7736_v46 = vpop.f32.mrb[27].mxu0 }
0x3abd   :  { %8578 = vtanh.f32 %v3884_v24 }
0x3ac0   :  { %v4270_v55 = vpop.f32.mrb[28].mxu0 }
0x3ac1   :  { %v4355_v33 = vrot.slane %v4270_v55, 5  ;;  %v7762_v19 = vpop.f32.mrb[29].mxu0 }
0x3ac3   :  { %v4357_v20 = vsel %vm4348_vm0, %v4356_v8, %v4355_v33  ;;  %vm10458_vm0 = vcmask 1043456  }
0x3ac4   :  { %4358 = vrot.lane.b32.xlu1 %v4357_v20, %s8834_s5  ;;  %vm10459_vm7 = vmmov %vm10458_vm0 }
0x3ac7   :  { %v8579_v16 = vpop.eup %8578 }
0x3ac8   :  { %v6691_v50 = vrot.slane %v8579_v16, %v9605_v52 }
0x3aca   :  { %v6692_v17 = vcombine.high %v6691_v50, %v6691_v50  ;;  %v6699_v2 = vrot.slane %v6691_v50, %v9605_v52 }
0x3acc   :  { %v6706_v32 = vrot.slane %v6692_v17, %v9605_v52  ;;  %v6835_v28 = vrot.slane %v6699_v2, %v9047_v3 }
0x3ace   :  { %v6839_v15 = vrot.slane %v6706_v32, %v9047_v3  ;;  %v10156_v44 = vsel %vm1894_vm4, %v10089_v35, %v6835_v28 }
0x3ad0   :  { %v10160_v1 = vsel %vm1894_vm4, %v10093_v7, %v6839_v15  ;;  %vm10460_vm4 = vcmask 1044480  }
0x3b08   :  { %v5843_v60 = vpop.xlane.xlu0 %5842 }
0x3b09   :  { %8580 = vrcp.f32 %v5843_v60 }
0x3b0c   :  { %v6087_v35 = vpop.permute.xlu0 %6086 }
0x3b13   :  { %v8581_v13 = vpop.eup %8580 }
0x3b14   :  { %v5847_v51 = vmul.f32 %v8581_v13, %v8577_v25 }
0x3b16   :  { %7916 = vmatmul.mubr.msk.f32.vlgmr.msra.gmra.mrb[68].mxu1 %vm2554_vm13, %v5847_v51 }
0x3b17   :  { %8216 = vmatpush3.bf16.msra.mxu1 %v9537_v42  ;;  %7945 = vmatprep.mubr.msk.f32.mxu1 %vm8832_vm6, %v8830_v22  ;;  %v4742_v42 = vpop.xlane.xlu1 %4741 }
0x3b18   :  { %8217 = vmatprep.subr.bf16.mxu1 %v8831_v37  ;;  %8582 = vrcp.f32 %v4742_v42 }
0x3b1b   :  { %8219 = vmatpush3.bf16.msra.mxu1 %v9547_v6  ;;  %v4351_v7 = vpop.permute.xlu1 %4350 }
0x3b1c   :  { %7948 = vmatprep.subr.mxu1 %v8830_v22 }
0x3b1e   :  { %7946 = vmatmul.mubr.msk.f32.vlgmr.msra.gmra.mrb[70].mxu1 %vm388_vm5, %v6087_v35 }
0x3b1f   :  { %7950 = vmatprep.mubr.msk.f32.mxu1 %vm8832_vm6, %v8830_v22 }
0x3b22   :  { %v8583_v53 = vpop.eup %8582 }
0x3b23   :  { %v4748_v57 = vmul.f32 %v8583_v53, %v8575_v31 }
0x3b24   :  { %7949 = vmatpush3.xpose.msk.msra.mxu1 %vm388_vm5, %v9663_v36 }
0x3b25   :  { %7953 = vmatprep.subr.mxu1 %v8830_v22 }
0x3b36   :  { %v4359_v47 = vpop.permute.xlu1 %4358 }
0x3b37   :  { %v4361_v49 = vsel %vm388_vm5, %v4351_v7, %v4359_v47 }
0x3b38   :  { %v4363_v6 = vrot.slane %v4361_v49, 3 }
0x3b3a   :  { %7785 = vmatmul.mubr.msk.f32.vlgmr.msra.gmra.mrb[30].mxu0 %vm2721_vm9, %v4363_v6 }
0x3b3b   :  { %7809 = vmatpush3.msra.mxu0 %v9663_v36  ;;  %7810 = vmatprep.mubr.msk.f32.mxu0 %vm8832_vm6, %v8830_v22 }
0x3b3c   :  { %8166 = vmatprep.subr.bf16.mxu0 %v8831_v37 }
0x3b3d   :  { %v5279_v30 = vpop.xlane.xlu0 %5278 }
0x3b3e   :  { %v5283_v63 = vsub.f32 %v5275_v43, %v5279_v30  ;;  %7811 = vmatmul.mubr.msk.f32.vlgmr.msra.gmra.mrb[32].mxu0 %vm2554_vm13, %v4748_v57 }
0x3b3f   :  { %8168 = vmatpush3.bf16.msra.mxu0 %v9954_v11  ;;  %7834 = vmatprep.mubr.msk.f32.mxu0 %vm8832_vm6, %v8830_v22 }
0x3b40   :  { %v5285_v58 = vmul.f32 1.442695, %v5283_v63  ;;  %8169 = vmatprep.subr.bf16.mxu0 %v8831_v37 }
0x3b42   :  { %8584 = vpow2.f32 %v5285_v58 }
0x3b43   :  { %8171 = vmatpush3.bf16.msra.mxu0 %v9960_v14 }
0x3b44   :  { %8172 = vmatprep.subr.bf16.mxu0 %v8831_v37 }
0x3b47   :  { %8174 = vmatpush3.bf16.msra.mxu0 %v9970_v41 }
0x3b48   :  { %8175 = vmatprep.subr.bf16.mxu0 %v8831_v37 }
0x3b4b   :  { %8177 = vmatpush3.bf16.msra.mxu0 %v9980_v38 }
0x3b4c   :  { %v10191_v10 = vpop.eup %8584  ;;  %7858 = vmatprep.subr.mxu0 %v8830_v22 }
0x3b4d   :  { %v5289_v31 = vsel %vm2530_vm2, %v10191_v10, 0.0 }
0x3b4e   :  { %5290 = vadd.xlane.f32.xlu1 %v5289_v31 }
0x3bdb   :  { %v5291_v47 = vpop.xlane.xlu1 %5290 }
0x3be9   :  { %v10196_v21 = vpop.f32.mrb[68].mxu1 }
0x3bea   :  { %v7917_v59 = vpop.f32.mrb[69].mxu1  ;;  %v6003_v12 = vrot.slane %v10196_v21, 1 }
0x3bf1   :  { %v6156_v29 = vpop.f32.mrb[70].mxu1 }
0x3bf2   :  { %v6161_v62 = vrot.slane %v6156_v29, 1  ;;  %v6162_v25 = vrot.slane %v6156_v29, 2  ;;  %v7947_v5 = vpop.f32.mrb[71].mxu1 }
0x3bf4   :  { %v6165_v43 = vadd.f32 %v6161_v62, %v9134_v54  ;;  %v6166_v56 = vadd.f32 %v6162_v25, %v9570_v48  ;;  %v4905_v54 = vrot.slane %v9876_v0, 3  ;;  %v6184_v62 = vrot.slane %v10056_v27, 7 }
0x3bf6   :  { %8586 = vtanh.f32 %v6165_v43  ;;  %v7161_v60 = vmul.f32 -1.442695, %v6165_v43  ;;  %v7162_v13 = vmul.f32 -1.442695, %v6166_v56 }
0x3bf7   :  { %8588 = vtanh.f32 %v6166_v56 }
0x3c00   :  { %v8587_v40 = vpop.eup %8586 }
0x3c01   :  { %v8589_v24 = vpop.eup %8588  ;;  %6191 = vrot.lane.b32.xlu0 %v8587_v40, %s8833_s3 }
0x3c02   :  { %6193 = vrot.lane.b32.xlu1 %v8589_v24, %s8833_s3 }
0x3c05   :  { %4899 = vrot.lane.b32.xlu0 %v9836_v45, %s8834_s5 }
0x3c0d   :  { %v4432_v46 = vpop.f32.mrb[30].mxu0 }
0x3c0e   :  { %v4433_v55 = vadd.f32 %v10069_v23, %v4432_v46  ;;  %v7786_v8 = vpop.f32.mrb[31].mxu0 }
0x3c10   :  { %8590 = vtanh.f32 %v4433_v55 }
0x3c11   :  { %v4819_v33 = vpop.f32.mrb[32].mxu0  ;;  %8592 = vpow2.f32 %v7161_v60 }
0x3c12   :  { %v4904_v48 = vrot.slane %v4819_v33, 4  ;;  %v7812_v19 = vpop.f32.mrb[33].mxu0  ;;  %8594 = vpow2.f32 %v7162_v13 }
0x3c13   :  { %v5454_v19 = vrot.slane %v10019_v4, 2 }
0x3c14   :  { %v4906_v20 = vsel %vm4897_vm12, %v4905_v54, %v4904_v48 }
0x3c15   :  { %4907 = vrot.lane.b32.xlu1 %v4906_v20, %s8834_s5 }
0x3c1a   :  { %v8591_v16 = vpop.eup %8590 }
0x3c1b   :  { %v6714_v50 = vrot.slane %v8591_v16, %v9605_v52  ;;  %v8593_v51 = vpop.eup %8592 }
0x3c1c   :  { %v8595_v35 = vpop.eup %8594  ;;  %v6173_v42 = vadd.f32 1.0, %v8593_v51 }
0x3c1d   :  { %v6715_v17 = vcombine.high %v6714_v50, %v6714_v50  ;;  %v6722_v45 = vrot.slane %v6714_v50, %v9605_v52  ;;  %v6174_v7 = vadd.f32 1.0, %v8595_v35 }
0x3c1e   :  { %8596 = vrcp.f32 %v6173_v42 }
0x3c1f   :  { %v6729_v2 = vrot.slane %v6715_v17, %v9605_v52  ;;  %v6845_v32 = vrot.slane %v6722_v45, %v9047_v3  ;;  %8598 = vrcp.f32 %v6174_v7 }
0x3c20   :  { %8600 = vrcp.f32 %v5291_v47 }
0x3c21   :  { %v6849_v28 = vrot.slane %v6729_v2, %v9047_v3  ;;  %v10215_v0 = vsel %vm1897_vm8, %v10156_v44, %v6845_v32 }
0x3c23   :  { %v10219_v15 = vsel %vm1897_vm8, %v10160_v1, %v6849_v28  ;;  %vm10461_vm8 = vmmov %vm10460_vm4 }
0x3c28   :  { %v8597_v49 = vpop.eup %8596 }
0x3c29   :  { %v8599_v53 = vpop.eup %8598 }
0x3c2a   :  { %v8601_v59 = vpop.eup %8600  ;;  %v6188_v43 = vmul.f32 %v8599_v53, %v6184_v62 }
0x3c2b   :  { %v5297_v29 = vmul.f32 %v8601_v59, %v10191_v10  ;;  %v6183_v10 = vrot.slane %v10053_v39, 7  ;;  %v5824_v39 = vsel %vm9901_vm10, %v10113_v26, -1e+09 }
0x3c2c   :  { %v5826_v27 = vsel %vm2530_vm2, %v5824_v39, -inf }
0x3c2d   :  { %v6187_v25 = vmul.f32 %v8597_v49, %v6183_v10 }
0x3c73   :  { %v6192_v6 = vpop.permute.xlu0 %6191 }
0x3c74   :  { %v6197_v44 = vmul.f32 %v8597_v49, %v6192_v6  ;;  %v6194_v57 = vpop.permute.xlu1 %6193 }
0x3c75   :  { %v6198_v30 = vmul.f32 %v8599_v53, %v6194_v57 }
0x3c76   :  { %6201 = vrot.lane.b32.xlu0 %v6197_v44, %s8834_s5 }
0x3c77   :  { %6203 = vrot.lane.b32.xlu1 %v6198_v30, %s8834_s5  ;;  %v4900_v1 = vpop.permute.xlu0 %4899 }
0x3c87   :  { %v4908_v63 = vpop.permute.xlu1 %4907 }
0x3c88   :  { %v4910_v58 = vsel %vm388_vm5, %v4900_v1, %v4908_v63 }
0x3c89   :  { %v4912_v31 = vrot.slane %v4910_v58, 4 }
0x3c8b   :  { %7835 = vmatmul.mubr.msk.f32.vlgmr.msra.gmra.mrb[34].mxu0 %vm2721_vm9, %v4912_v31 }
0x3c8c   :  { %7859 = vmatpush3.msra.mxu0 %v9663_v36  ;;  %7860 = vmatprep.mubr.msk.f32.mxu0 %vm8832_vm6, %v8830_v22 }
0x3c8d   :  { %8184 = vmatprep.subr.bf16.mxu0 %v8831_v37 }
0x3c8f   :  { %7861 = vmatmul.mubr.msk.f32.vlgmr.msra.gmra.mrb[36].mxu0 %vm2554_vm13, %v5297_v29 }
0x3c90   :  { %8186 = vmatpush3.bf16.msra.mxu0 %v9954_v11  ;;  %7884 = vmatprep.mubr.msk.f32.mxu0 %vm8832_vm6, %v8830_v22 }
0x3c91   :  { %8187 = vmatprep.subr.bf16.mxu0 %v8831_v37 }
0x3c94   :  { %8189 = vmatpush3.bf16.msra.mxu0 %v9960_v14 }
0x3c95   :  { %8190 = vmatprep.subr.bf16.mxu0 %v8831_v37 }
0x3c98   :  { %8192 = vmatpush3.bf16.msra.mxu0 %v9970_v41 }
0x3c99   :  { %8193 = vmatprep.subr.bf16.mxu0 %v8831_v37 }
0x3c9c   :  { %8195 = vmatpush3.bf16.msra.mxu0 %v9980_v38 }
0x3c9d   :  { %7908 = vmatprep.subr.mxu0 %v8830_v22 }
0x3ce8   :  { %v6202_v5 = vpop.permute.xlu0 %6201 }
0x3ce9   :  { %v6207_v56 = vadd.f32 %v6202_v5, %v6187_v25  ;;  %v6204_v40 = vpop.permute.xlu1 %6203 }
0x3cea   :  { %v6208_v24 = vadd.f32 %v6204_v40, %v6188_v43 }
0x3ceb   :  { %8602 = vtanh.f32 %v6207_v56 }
0x3cec   :  { %8604 = vtanh.f32 %v6208_v24 }
0x3cf5   :  { %v8603_v46 = vpop.eup %8602 }
0x3cf6   :  { %v8605_v55 = vpop.eup %8604  ;;  %6213 = vrot.lane.b32.xlu0 %v8603_v46, %s8833_s3 }
0x3cf7   :  { %6215 = vrot.lane.b32.xlu1 %v8605_v55, %s8833_s3 }
0x3d15   :  { %5827 = vmax.xlane.f32.xlu0 %v5826_v27 }
0x3d2b   :  { %5448 = vrot.lane.b32.xlu0 %v9897_v9, %s8834_s5 }
0x3d5e   :  { %v4981_v8 = vpop.f32.mrb[34].mxu0 }
0x3d5f   :  { %v4982_v33 = vadd.f32 %v10069_v23, %v4981_v8  ;;  %v7836_v54 = vpop.f32.mrb[35].mxu0 }
0x3d61   :  { %8606 = vtanh.f32 %v4982_v33 }
0x3d62   :  { %v5368_v48 = vpop.f32.mrb[36].mxu0 }
0x3d63   :  { %v5453_v20 = vrot.slane %v5368_v48, 3  ;;  %v7862_v16 = vpop.f32.mrb[37].mxu0 }
0x3d65   :  { %v5455_v50 = vsel %vm5446_vm11, %v5454_v19, %v5453_v20  ;;  %vm10466_vm11 = vcmask 130048  }
0x3d66   :  { %vm10467_vm12 = vmmov %vm10466_vm11 }
0x3d68   :  { %v6214_v17 = vpop.permute.xlu0 %6213 }
0x3d69   :  { %v10254_v26 = vmul.f32 %v8597_v49, %v6214_v17  ;;  %v6216_v45 = vpop.permute.xlu1 %6215 }
0x3d6a   :  { %v6220_v9 = vmul.f32 %v8599_v53, %v6216_v45 }
0x3d6b   :  { %v8607_v2 = vpop.eup %8606  ;;  %v6222_v32 = vrot.slane %v10254_v26, 7 }
0x3d6c   :  { %v6737_v28 = vrot.slane %v8607_v2, %v9605_v52  ;;  %v6298_v4 = vrot.slane %v6220_v9, 7 }
0x3d6d   :  { %6223 = vrot.lane.b32.xlu1 %v6222_v32, %s8834_s5 }
0x3d6e   :  { %v6738_v60 = vcombine.high %v6737_v28, %v6737_v28  ;;  %v6745_v13 = vrot.slane %v6737_v28, %v9605_v52 }
0x3d70   :  { %v6752_v51 = vrot.slane %v6738_v60, %v9605_v52  ;;  %v6855_v35 = vrot.slane %v6745_v13, %v9047_v3 }
0x3d71   :  { %6299 = vrot.lane.b32.xlu1 %v6298_v4, %s8834_s5 }
0x3d72   :  { %v10265_v42 = vsel %vm10458_vm0, %v10215_v0, %v6855_v35  ;;  %v6859_v7 = vrot.slane %v6752_v51, %v9047_v3 }
0x3d74   :  { %v10270_v47 = vsel %vm10459_vm7, %v10219_v15, %v6859_v7 }
0x3da2   :  { %v5828_v49 = vpop.xlane.xlu0 %5827 }
0x3da3   :  { %v5832_v6 = vsub.f32 %v5824_v39, %v5828_v49 }
0x3da5   :  { %v5834_v53 = vmul.f32 1.442695, %v5832_v6 }
0x3da6   :  { %v5449_v1 = vpop.permute.xlu0 %5448 }
0x3da7   :  { %8608 = vpow2.f32 %v5834_v53 }
0x3db1   :  { %v8609_v44 = vpop.eup %8608 }
0x3db2   :  { %v5838_v57 = vsel %vm2530_vm2, %v8609_v44, 0.0 }
0x3db3   :  { %5839 = vadd.xlane.f32.xlu1 %v5838_v57 }
0x3dc4   :  { %5456 = vrot.lane.b32.xlu1 %v5455_v50, %s8834_s5 }
0x3ddf   :  { %v6224_v30 = vpop.permute.xlu1 %6223 }
0x3de0   :  { %7951 = vmatmul.mubr.msk.f32.vlgmr.msra.gmra.mrb[72].mxu1 %vm388_vm5, %v6224_v30 }
0x3de1   :  { %7954 = vmatpush3.xpose.msk.msra.mxu1 %vm388_vm5, %v9585_v61  ;;  %7955 = vmatprep.mubr.msk.f32.mxu1 %vm8832_vm6, %v8830_v22 }
0x3de2   :  { %7963 = vmatprep.subr.mxu1 %v8830_v22 }
0x3de3   :  { %v10280_v0 = vpop.permute.xlu1 %6299 }
0x3de4   :  { %7956 = vmatmul.mubr.msk.f32.vlgmr.msra.gmra.mrb[74].mxu1 %vm388_vm5, %v10280_v0 }
0x3de5   :  { %7964 = vmatpush3.msra.mxu1 %v9585_v61  ;;  %7965 = vmatprep.mubr.msk.f32.mxu1 %vm8832_vm6, %v8830_v22 }
0x3e40   :  { %v5840_v15 = vpop.xlane.xlu1 %5839 }
0x3e41   :  { %8610 = vrcp.f32 %v5840_v15 }
0x3e44   :  { %v5457_v63 = vpop.permute.xlu1 %5456 }
0x3e45   :  { %v5459_v58 = vsel %vm388_vm5, %v5449_v1, %v5457_v63 }
0x3e46   :  { %v5461_v31 = vrot.slane %v5459_v58, 5 }
0x3e48   :  { %7885 = vmatmul.mubr.msk.f32.vlgmr.msra.gmra.mrb[38].mxu0 %vm2721_vm9, %v5461_v31 }
0x3e49   :  { %7909 = vmatpush3.msra.mxu0 %v9663_v36  ;;  %7910 = vmatprep.mubr.msk.f32.mxu0 %vm8832_vm6, %v8830_v22 }
0x3e4a   :  { %8202 = vmatprep.subr.bf16.mxu0 %v8831_v37 }
0x3e4b   :  { %v8611_v61 = vpop.eup %8610 }
0x3e4c   :  { %v5846_v59 = vmul.f32 %v8611_v61, %v8609_v44 }
0x3e4e   :  { %7911 = vmatmul.mubr.msk.f32.vlgmr.msra.gmra.mrb[40].mxu0 %vm2554_vm13, %v5846_v59 }
0x3e4f   :  { %8204 = vmatpush3.bf16.msra.mxu0 %v9954_v11  ;;  %7934 = vmatprep.mubr.msk.f32.mxu0 %vm8832_vm6, %v8830_v22 }
0x3e50   :  { %8205 = vmatprep.subr.bf16.mxu0 %v8831_v37 }
0x3e53   :  { %8207 = vmatpush3.bf16.msra.mxu0 %v9960_v14 }
0x3e54   :  { %8208 = vmatprep.subr.bf16.mxu0 %v8831_v37 }
0x3e57   :  { %8210 = vmatpush3.bf16.msra.mxu0 %v9970_v41 }
0x3e58   :  { %8211 = vmatprep.subr.bf16.mxu0 %v8831_v37 }
0x3e5b   :  { %8213 = vmatpush3.bf16.msra.mxu0 %v9980_v38 }
0x3e5c   :  { %7958 = vmatprep.subr.mxu0 %v8830_v22 }
0x3eb3   :  { %v6293_v29 = vpop.f32.mrb[72].mxu1 }
0x3eb4   :  { %v6373_v10 = vsel %vm9901_vm10, %v6293_v29, -1e+09  ;;  %v7952_v62 = vpop.f32.mrb[73].mxu1 }
0x3eb5   :  { %v6375_v25 = vsel %vm2530_vm2, %v6373_v10, -inf }
0x3eb6   :  { %6376 = vmax.xlane.f32.xlu0 %v6375_v25 }
0x3eb7   :  { %v6369_v5 = vpop.f32.mrb[74].mxu1 }
0x3eb8   :  { %v6374_v43 = vsel %vm2527_vm1, %v6369_v5, -1e+09  ;;  %v7957_v56 = vpop.f32.mrb[75].mxu1 }
0x3eb9   :  { %v6378_v40 = vsel %vm2530_vm2, %v6374_v43, -inf }
0x3eba   :  { %6379 = vmax.xlane.f32.xlu1 %v6378_v40 }
0x3f1b   :  { %v5530_v24 = vpop.f32.mrb[38].mxu0 }
0x3f1c   :  { %v5531_v46 = vadd.f32 %v10069_v23, %v5530_v24  ;;  %v7886_v55 = vpop.f32.mrb[39].mxu0 }
0x3f1d   :  { %v169_v55 = vld [vmem:[%s10430_s17] sm:$0xff] }
0x3f1e   :  { %8612 = vtanh.f32 %v5531_v46 }
0x3f21   :  { %v5917_v39 = vpop.f32.mrb[40].mxu0 }
0x3f22   :  { %v6002_v27 = vrot.slane %v5917_v39, 2  ;;  %v7912_v8 = vpop.f32.mrb[41].mxu0  ;;  %v170_v39 = vld [vmem:[%s10430_s17 + $0x8] sm:$0xff] }
0x3f24   :  { %v6004_v33 = vsel %vm5995_vm14, %v6003_v12, %v6002_v27  ;;  %v8232_v12 = vpack.c.bf16 %v170_v39, %v169_v55  ;;  %v172_v27 = vld [vmem:[%s10430_s17 + $0x18] sm:$0xff] }
0x3f25   :  { %6005 = vrot.lane.b32.xlu1 %v6004_v33, %s8834_s5 }
0x3f26   :  { %8233 = vmatprep.subr.bf16.mxu1 %v8232_v12 }
0x3f28   :  { %v8613_v34 = vpop.eup %8612 }
0x3f29   :  { %v6760_v54 = vrot.slane %v8613_v34, %v9605_v52 }
0x3f2b   :  { %v6761_v48 = vcombine.high %v6760_v54, %v6760_v54  ;;  %v6768_v19 = vrot.slane %v6760_v54, %v9605_v52 }
0x3f2d   :  { %v6775_v20 = vrot.slane %v6761_v48, %v9605_v52  ;;  %v6865_v16 = vrot.slane %v6768_v19, %v9047_v3 }
0x3f2f   :  { %v10320_v50 = vsel %vm10460_vm4, %v10265_v42, %v6865_v16  ;;  %v6869_v21 = vrot.slane %v6775_v20, %v9047_v3 }
0x3f31   :  { %v10325_v17 = vsel %vm10461_vm8, %v10270_v47, %v6869_v21 }
0x3f43   :  { %v6377_v45 = vpop.xlane.xlu0 %6376 }
0x3f44   :  { %v6381_v2 = vsub.f32 %v6373_v10, %v6377_v45 }
0x3f46   :  { %v6383_v32 = vmul.f32 1.442695, %v6381_v2  ;;  %v7170_v2 = vld [vmem:[%s10431_s18] ss:$0 sm:$0xff]  ;;  %s8845_s18 = smov [#allocation15]  }
0x3f47   :  { %v6380_v9 = vpop.xlane.xlu1 %6379  ;;  %s7028_s10 = sshll.u32 %s8845_s18, 4  ;;  %s7029_s10 = int_to_ptr.vmem [resolvable:$true] %s7028_s10 }
0x3f48   :  { %8614 = vpow2.f32 %v6383_v32  ;;  %v6382_v28 = vsub.f32 %v6374_v43, %v6380_v9  ;;  %s8789_s16 = scalar_lea.vmem %s7029_s10, 256  ;;  %p8794_p1 = scmp.lt.s32.totalorder %s7029_s10, %s7029_s10 }
0x3f49   :  { %p8790_p0 = scmp.ne.s32.totalorder %s7029_s10, %s8789_s16  ;;  %p8795_p2 = scmp.lt.s32.totalorder %s8789_s16, %s8789_s16 }
0x3f4a   :  { %v6385_v60 = vmul.f32 1.442695, %v6382_v28 }
0x3f4b   :  { %p8796_p3 = por %p8795_p2, %p8794_p1 }
0x3f4c   :  { %8616 = vpow2.f32 %v6385_v60 }
0x3f4d   :  { %p8797_p4 = pnand %p8796_p3, %p8790_p0 }
0x3f52   :  { %v8615_v13 = vpop.eup %8614 }
0x3f53   :  { %v6387_v4 = vsel %vm2530_vm2, %v8615_v13, 0.0 }
0x3f54   :  { %6388 = vadd.xlane.f32.xlu0 %v6387_v4 }
0x3f56   :  { %v8617_v51 = vpop.eup %8616 }
0x3f57   :  { %v6390_v35 = vsel %vm2530_vm2, %v8617_v51, 0.0 }
0x3f58   :  { %6391 = vadd.xlane.f32.xlu0 %v6390_v35 }
0x3f6e   :  { %5997 = vrot.lane.b32.xlu0 %v10067_v18, %s8834_s5 }
0x3f72   :  { %6543 = vrot.lane.b32.xlu0 %v10254_v26, %s8834_s5 }
0x3f97   :  { %v6006_v47 = vpop.permute.xlu1 %6005 }
0x3fe1   :  { %v6389_v42 = vpop.xlane.xlu0 %6388 }
0x3fe2   :  { %8618 = vrcp.f32 %v6389_v42 }
0x3fe5   :  { %v6392_v7 = vpop.xlane.xlu0 %6391 }
0x3fe6   :  { %8620 = vrcp.f32 %v6392_v7 }
0x3fe9   :  { %v5998_v49 = vpop.permute.xlu0 %5997 }
0x3fea   :  { %v6008_v6 = vsel %vm388_vm5, %v5998_v49, %v6006_v47 }
0x3feb   :  { %v6010_v53 = vrot.slane %v6008_v6, 6 }
0x3fec   :  { %v8619_v44 = vpop.eup %8618 }
0x3fed   :  { %7935 = vmatmul.mubr.msk.f32.vlgmr.msra.gmra.mrb[42].mxu0 %vm2721_vm9, %v6010_v53  ;;  %v6395_v18 = vmul.f32 %v8619_v44, %v8615_v13  ;;  %v6544_v62 = vpop.permute.xlu0 %6543 }
0x3fee   :  { %7959 = vmatpush3.msra.mxu0 %v9663_v36  ;;  %7960 = vmatprep.mubr.msk.f32.mxu0 %vm8832_vm6, %v8830_v22 }
0x3fef   :  { %8220 = vmatprep.subr.bf16.mxu0 %v8831_v37 }
0x3ff0   :  { %v8621_v26 = vpop.eup %8620 }
0x3ff1   :  { %v6396_v57 = vmul.f32 %v8621_v26, %v8617_v51  ;;  %7961 = vmatmul.mubr.msk.f32.vlgmr.msra.gmra.mrb[44].mxu0 %vm2554_vm13, %v6395_v18 }
0x3ff2   :  { %8222 = vmatpush3.bf16.msra.mxu0 %v9954_v11  ;;  %7984 = vmatprep.mubr.msk.f32.mxu0 %vm8832_vm6, %v8830_v22  ;;  %vm10462_vm6 = vcmask 1045504  }
0x3ff3   :  { %7966 = vmatmul.mubr.msk.f32.vlgmr.msra.gmra.mrb[76].mxu1 %vm2554_vm13, %v6396_v57  ;;  %8223 = vmatprep.subr.bf16.mxu0 %v8831_v37  ;;  %vm10463_vm10 = vmmov %vm10462_vm6 }
0x3ff4   :  { %8235 = vmatpush3.bf16.msra.mxu1 %v8232_v12 }
0x3ff6   :  { %8225 = vmatpush3.bf16.msra.mxu0 %v9960_v14 }
0x3ff7   :  { %8226 = vmatprep.subr.bf16.mxu0 %v8831_v37 }
0x3ffa   :  { %8228 = vmatpush3.bf16.msra.mxu0 %v9970_v41 }
0x3ffb   :  { %8229 = vmatprep.subr.bf16.mxu0 %v8831_v37 }
0x3ffe   :  { %8231 = vmatpush3.bf16.msra.mxu0 %v9980_v38 }
0x40c0   :  { %v6079_v36 = vpop.f32.mrb[42].mxu0 }
0x40c1   :  { %v6080_v11 = vadd.f32 %v10069_v23, %v6079_v36  ;;  %v7936_v30 = vpop.f32.mrb[43].mxu0 }
0x40c3   :  { %8622 = vtanh.f32 %v6080_v11 }
0x40c4   :  { %v6466_v22 = vpop.f32.mrb[44].mxu0 }
0x40c5   :  { %v6549_v15 = vrot.slane %v6466_v22, 1  ;;  %v7962_v1 = vpop.f32.mrb[45].mxu0 }
0x40c6   :  { %v6539_v63 = vpop.f32.mrb[76].mxu1 }
0x40c7   :  { %6552 = vrot.lane.b32.xlu0 %v6539_v63, %s8834_s5  ;;  %v7967_v14 = vpop.f32.mrb[77].mxu1  ;;  %6550 = vrot.lane.b32.xlu1 %v6549_v15, %s8834_s5 }
0x40cd   :  { %v8623_v58 = vpop.eup %8622 }
0x40ce   :  { %v6783_v41 = vrot.slane %v8623_v58, %v9605_v52 }
0x40d0   :  { %v6784_v37 = vcombine.high %v6783_v41, %v6783_v41  ;;  %v6791_v38 = vrot.slane %v6783_v41, %v9605_v52 }
0x40d2   :  { %v6875_v31 = vrot.slane %v6791_v38, %v9047_v3  ;;  %v6798_v61 = vrot.slane %v6784_v37, %v9605_v52 }
0x40d4   :  { %v6902_v59 = vsel %vm10462_vm6, %v10320_v50, %v6875_v31  ;;  %v6879_v29 = vrot.slane %v6798_v61, %v9047_v3 }
0x40d6   :  { %v6903_v10 = vsel %vm10463_vm10, %v10325_v17, %v6879_v29 }
0x4139   :  { %v6553_v25 = vpop.permute.xlu0 %6552  ;;  %v6551_v5 = vpop.permute.xlu1 %6550 }
0x413a   :  { %v6557_v43 = vsel %vm388_vm5, %v10280_v0, %v6553_v25  ;;  %v6556_v56 = vsel %vm388_vm5, %v6544_v62, %v6551_v5  ;;  %v171_v0 = vld [vmem:[%s10430_s17 + $0x10] sm:$0xff] }
0x413b   :  { %v6561_v40 = vrot.slane %v6557_v43, 7  ;;  %v6560_v24 = vrot.slane %v6556_v56, 7  ;;  %v8236_v8 = vpack.c.bf16 %v172_v27, %v171_v0 }
0x413d   :  { %v6562_v46 = vsel %vm209_vm3, %v6560_v24, %v6561_v40  ;;  %8237 = vmatprep.subr.bf16.mxu1 %v8236_v8  ;;  %vm10464_vm3 = vcmask 1046528  }
0x413e   :  { %7985 = vmatmul.mubr.msk.f32.vlgmr.msra.gmra.mrb[46].mxu0 %vm2721_vm9, %v6562_v46  ;;  %8239 = vmatpush3.bf16.msra.mxu1 %v8236_v8  ;;  %vm10465_vm9 = vmmov %vm10464_vm3 }
0x4211   :  { %v6631_v33 = vpop.f32.mrb[46].mxu0 }
0x4212   :  { %v6632_v34 = vadd.f32 %v10069_v23, %v6631_v33  ;;  %v7986_v54 = vpop.f32.mrb[47].mxu0 }
0x4214   :  { %8624 = vtanh.f32 %v6632_v34 }
0x421e   :  { %v8625_v48 = vpop.eup %8624 }
0x421f   :  { %v6806_v19 = vrot.slane %v8625_v48, %v9605_v52 }
0x4221   :  { %v6807_v20 = vcombine.high %v6806_v19, %v6806_v19  ;;  %v6814_v16 = vrot.slane %v6806_v19, %v9605_v52 }
0x4223   :  { %v6885_v50 = vrot.slane %v6814_v16, %v9047_v3  ;;  %v6821_v21 = vrot.slane %v6807_v20, %v9605_v52 }
0x4225   :  { %v6904_v17 = vsel %vm10464_vm3, %v6902_v59, %v6885_v50  ;;  %v6889_v45 = vrot.slane %v6821_v21, %v9047_v3 }
0x4226   :  { %7995 = vmatprep.mubr.msk.f32.mxu1 %vm388_vm5, %v6904_v17 }
0x4227   :  { %v6905_v23 = vsel %vm10465_vm9, %v6903_v10, %v6889_v45 }
0x4228   :  { %7996 = vmatmul.mubr.msk.f32.vlgmr.msra.gmra.mrb[78].mxu1 %vm388_vm5, %v6905_v23  ;;  %vm10468_vm5 = vmmov %vm10466_vm11 }
0x4229   :  { %vm10469_vm1 = vmmov %vm10468_vm5 }
0x422a   :  { %vm10470_vm2 = vmmov %vm10469_vm1 }
0x422b   :  { %vm10471_vm13 = vmmov %vm10469_vm1 }
0x42fb   :  { %v7997_v32 = vpop.f32.mrb[78].mxu1 }
0x42fc   :  { %v6990_v9 = vadd.f32 %v7997_v32, %v7170_v2  ;;  %v6984_v28 = vpop.f32.mrb[79].mxu1 }
0x42fd   :  { %v6985_v60 = vadd.f32 %v7170_v2, %v6984_v28 }
0x42fe   :  { %v6996_v52 = vsel %vm10466_vm11, %v6990_v9, -inf }
0x42ff   :  { %6997 = vmax.xlane.f32.xlu0 %v6996_v52  ;;  %v6993_v13 = vsel %vm10467_vm12, %v6985_v60, -inf }
0x4300   :  { %6994 = vmax.xlane.f32.xlu1 %v6993_v13 }
0x438c   :  { %v6998_v3 = vpop.xlane.xlu0 %6997 }
0x438d   :  { %v7000_v4 = vsub.f32 %v6990_v9, %v6998_v3  ;;  %v6995_v51 = vpop.xlane.xlu1 %6994 }
0x438e   :  { %v6999_v35 = vsub.f32 %v6985_v60, %v6995_v51 }
0x438f   :  { %v7003_v42 = vmul.f32 1.442695, %v7000_v4 }
0x4390   :  { %v7001_v7 = vmul.f32 1.442695, %v6999_v35 }
0x4391   :  { %8626 = vpow2.f32 %v7003_v42 }
0x4392   :  { %8628 = vpow2.f32 %v7001_v7 }
0x439b   :  { %v8627_v47 = vpop.eup %8626 }
0x439c   :  { %v8629_v49 = vpop.eup %8628  ;;  %v7008_v6 = vsel %vm10468_vm5, %v8627_v47, 0.0 }
0x439d   :  { %7009 = vadd.xlane.f32.xlu1 %v7008_v6  ;;  %v7005_v53 = vsel %vm10469_vm1, %v8629_v49, 0.0 }
0x439e   :  { %7006 = vadd.xlane.f32.xlu0 %v7005_v53 }
0x442a   :  { %v7010_v44 = vpop.xlane.xlu1 %7009 }
0x442b   :  { %8630 = vlog2.f32 %v7010_v44  ;;  %v7007_v18 = vpop.xlane.xlu0 %7006 }
0x442c   :  { %8632 = vlog2.f32 %v7007_v18 }
0x4435   :  { %v8631_v26 = vpop.eup %8630 }
0x4436   :  { %v8633_v57 = vpop.eup %8632  ;;  %v7014_v36 = vmul.f32 0.6931472, %v8631_v26 }
0x4437   :  { %v7012_v11 = vmul.f32 0.6931472, %v8633_v57 }
0x4438   :  { %v7016_v30 = vadd.f32 %v7014_v36, %v6998_v3 }
0x4439   :  { %v7015_v22 = vadd.f32 %v7012_v11, %v6995_v51 }
0x443a   :  { %v7018_v15 = vsub.f32 %v6990_v9, %v7016_v30 }
0x443b   :  { %v7017_v1 = vsub.f32 %v6985_v60, %v7015_v22 }
0x443c   :  { %7020 = vst.msk [vmem:[#allocation15 + $0x8] sm:$0xff] %vm10470_vm2, %v7018_v15 }
0x443d   :  { %7019 = vst.msk [vmem:[#allocation15] sm:$0xff] %vm10471_vm13, %v7017_v1 }
0x443e   :  { %8800 = shalt.err (!%p8797_p4)
}
0x443f   :  { %s10472_s2 = sld [smem:[#allocation26_spill]] }
0x4445   :  { %s8801_s12 = scalar_lea.hbm %s10472_s2, 256 }
0x4446   :  { %p8802_p5 = scmp.ne.s32.totalorder %s10472_s2, %s8801_s12  ;;  %p8805_p6 = scmp.lt.u32.totalorder %s8801_s12, %s10472_s2 }
0x4448   :  { %p8807_p7 = pnand %p8805_p6, %p8802_p5 }
0x444a   :  { %8810 = shalt.err (!%p8807_p7)
}
0x444b   :  { %7034 = dma.vmem_to_hbm [thread:$0]  %s7029_s10, 256, %s10472_s2, [#allocation5], %s8822_s30, %s8822_s30, %s8823_s0  }
0x444c   :  { %8819 = dma.done.wait [#allocation5], 256  }
0x444d   :  { %8820 = vsyncadd [#allocation5], 4294967040 }
0x444e   :  { %7040 = vsyncpa [#allocation4], 1 }
0x444f   :  { %7041 = vsyncpa [#allocation7], 1 }
0x4450   :  { %7042 = vsyncpa [#allocation10], 1 }
0x4451   :  { %7043 = vsyncpa [#allocation13], 1 }
0x4452   :  { %7044 = vsyncpa [#allocation5], 1 }

</bundles_post_ra>
